<compile_context>
chip_gen: v5e
topology: v5e:2x2
jax: 0.10.0
libtpu: 0.0.40
codegen_flags: <defaults>
</compile_context>

<pallas_src>
import functools

import jax
import jax.numpy as jnp
from jax import lax
from jax.experimental import pallas as pl
from jax.experimental.pallas import tpu as pltpu


def _layernorm(x, gamma, beta, eps=1e-5):
    mu = jnp.mean(x, axis=-1, keepdims=True)
    xc = x - mu
    var = jnp.mean(xc * xc, axis=-1, keepdims=True)
    return xc * lax.rsqrt(var + eps) * gamma + beta


def _transformer_block_kernel(x_ref, wproj_ref, w1_ref, b1_ref, w2_ref, b2_ref,
                              g1_ref, be1_ref, g2_ref, be2_ref, o_ref,
                              attn_ref, *, nheads):
    bb, n, d = x_ref.shape
    fh = d // nheads
    scaling = float(fh) ** (-0.5)

    x3 = x_ref[...]                                  # (bb, n, d) f32
    xf = x3.reshape(bb * n, d)                       # flatten -> big-M matmuls

    # --- QKV projection: one (bb*n, d) @ (d, 3d) matmul (bf16 in, f32 acc) --
    qkv = jnp.dot(xf.astype(jnp.bfloat16), wproj_ref[...],
                  preferred_element_type=jnp.float32)         # (bb*n, 3d) f32
    qkv3 = qkv.reshape(bb, n, 3 * d)
    q = (qkv3[:, :, 0 * d:1 * d] * scaling).astype(jnp.bfloat16)
    k = qkv3[:, :, 1 * d:2 * d].astype(jnp.bfloat16)
    v = qkv3[:, :, 2 * d:3 * d].astype(jnp.bfloat16)

    # --- per-head attention; softmax over QUERIES (torch dim=-2) ------------
    for h in range(nheads):                          # static unroll over heads
        sl = slice(h * fh, (h + 1) * fh)
        # batched q @ k^T: contract last dims directly (no transpose of k)
        s = jnp.einsum('bqf,bkf->bqk', q[:, :, sl], k[:, :, sl],
                       preferred_element_type=jnp.float32)    # (bb, n, n) f32
        s = s - jnp.max(s, axis=1, keepdims=True)             # over queries
        e = jnp.exp(s)
        inv = pl.reciprocal(jnp.sum(e, axis=1, keepdims=True), approx=True)
        aw = (e * inv).astype(jnp.bfloat16)
        # write this head's output straight into the scratch slab (no concat)
        attn_ref[:, :, sl] = jnp.einsum('bqk,bkf->bqf', aw, v[:, :, sl],
                                        preferred_element_type=jnp.float32)

    attn = attn_ref[...].reshape(bb * n, d)

    # --- residual + layernorm 1 (f32) ---------------------------------------
    y = _layernorm(xf + attn, g1_ref[...], be1_ref[...])

    # --- MLP: Linear -> ReLU -> Linear (bf16 matmuls, f32 accumulation) -----
    h1 = jnp.dot(y.astype(jnp.bfloat16), w1_ref[...],
                 preferred_element_type=jnp.float32) + b1_ref[...]
    h1 = jnp.maximum(h1, 0.0)
    z = jnp.dot(h1.astype(jnp.bfloat16), w2_ref[...],
                preferred_element_type=jnp.float32) + b2_ref[...]

    # --- residual + layernorm 2 (f32) ---------------------------------------
    out = _layernorm(y + z, g2_ref[...], be2_ref[...])
    o_ref[...] = out.reshape(bb, n, d).astype(o_ref.dtype)


def _choose_block_b(B, N, target_rows=256):
    """Largest divisor bb of B with bb*N <= target_rows, keeping >=2 grid
    blocks when possible so both v7x TensorCores get work."""
    best = 1
    for bb in range(1, B + 1):
        if B % bb == 0 and bb * N <= max(target_rows, N):
            best = bb
    if best > 1 and B // best < 2:
        for bb in range(best - 1, 0, -1):
            if B % bb == 0 and B // bb >= 2:
                best = bb
                break
    return best


def transformer_block(x, params, *, nheads, block_b=None):
    """x: (B, N, d) float32.  params: dict of weight arrays (see make_params)."""
    B, N, d = x.shape
    assert d % nheads == 0
    bb = block_b if block_b is not None else _choose_block_b(B, N)
    assert B % bb == 0

    # MXU operands in bf16 (accumulation stays f32 in-kernel); layernorm /
    # bias parameters stay f32.
    wproj = params["wproj"].astype(jnp.bfloat16)   # (d, 3d)
    w1 = params["w1"].astype(jnp.bfloat16)         # (d, d)
    w2 = params["w2"].astype(jnp.bfloat16)         # (d, d)
    b1, b2 = params["b1"], params["b2"]            # (1, d) f32
    g1, be1 = params["g1"], params["be1"]          # (1, d) f32
    g2, be2 = params["g2"], params["be2"]          # (1, d) f32

    full = lambda a: pl.BlockSpec(a.shape, lambda i: (0,) * a.ndim)

    # Advisory cost estimate so XLA schedules surrounding ops sensibly.
    flops = B * (6 * N * d * d          # qkv projection
                 + 4 * N * N * d        # q@k^T and aw@v over all heads
                 + 4 * N * d * d)       # the two MLP matmuls
    cost = pl.CostEstimate(
        flops=int(flops),
        transcendentals=int(B * nheads * N * N),
        bytes_accessed=int(2 * x.size * 4
                           + 2 * (wproj.size + w1.size + w2.size)
                           + 6 * d * 4))

    # Rough VMEM need: double-buffered x/out blocks + resident weights +
    # scratch + a handful of (bb*N, d) f32 intermediates.  Only raise the
    # scoped limit above the 32 MiB default when it would not be enough
    # (matters for large d on v6e; for v7x's 64 MiB prefer feature-tiling or
    # single-buffered weights before exceeding ~48 MiB).
    blk = bb * N * d * 4
    w_bytes = 2 * (wproj.size + w1.size + w2.size)
    vmem_est = 12 * blk + 2 * w_bytes
    vmem_limit = int(vmem_est * 3 // 2) if vmem_est > 30 * 2 ** 20 else None

    kernel = functools.partial(_transformer_block_kernel, nheads=nheads)
    return pl.pallas_call(
        kernel,
        out_shape=jax.ShapeDtypeStruct((B, N, d), x.dtype),
        grid_spec=pltpu.PrefetchScalarGridSpec(
            num_scalar_prefetch=0,
            grid=(B // bb,),
            in_specs=[
                pl.BlockSpec((bb, N, d), lambda i: (i, 0, 0)),   # x
                full(wproj),
                full(w1), full(b1),
                full(w2), full(b2),
                full(g1), full(be1),
                full(g2), full(be2),
            ],
            out_specs=pl.BlockSpec((bb, N, d), lambda i: (i, 0, 0)),
            scratch_shapes=[pltpu.VMEM((bb, N, d), jnp.float32)],
        ),
        compiler_params=pltpu.CompilerParams(
            dimension_semantics=("parallel",),
            vmem_limit_bytes=vmem_limit),
        cost_estimate=cost,
    )(x, wproj, w1, b1, w2, b2, g1, be1, g2, be2)


def transformer_block_reference(x, params, *, nheads):
    """Pure-JAX f32 reference matching the PyTorch forward exactly."""
    B, N, d = x.shape
    fh = d // nheads
    qkv = x @ params["wproj"]                       # (B, N, 3d)
    q = qkv[..., :d] * (float(fh) ** -0.5)
    k = qkv[..., d:2 * d]
    v = qkv[..., 2 * d:]
    q = q.reshape(B, N, nheads, fh).transpose(0, 2, 1, 3)
    k = k.reshape(B, N, nheads, fh).transpose(0, 2, 1, 3)
    v = v.reshape(B, N, nheads, fh).transpose(0, 2, 1, 3)
    aw = q @ jnp.swapaxes(k, 2, 3)                  # (B, H, N, N)
    aw = jax.nn.softmax(aw, axis=-2)                # softmax over queries
    out = aw @ v
    out = out.transpose(0, 2, 1, 3).reshape(B, N, d)

    def ln(t, g, b):
        mu = t.mean(-1, keepdims=True)
        var = ((t - mu) ** 2).mean(-1, keepdims=True)
        return (t - mu) / jnp.sqrt(var + 1e-5) * g + b

    y = ln(x + out, params["g1"], params["be1"])
    z = jnp.maximum(y @ params["w1"] + params["b1"], 0.0) @ params["w2"] + params["b2"]
    return ln(y + z, params["g2"], params["be2"])


def make_params(key, d):
    ks = jax.random.split(key, 8)
    scale = 0.1
    return {
        # Linear(d, 3d, bias=False): torch weight is (3d, d); store transposed.
        "wproj": scale * jax.random.normal(ks[0], (d, 3 * d), jnp.float32),
        "w1": scale * jax.random.normal(ks[1], (d, d), jnp.float32),
        "b1": scale * jax.random.normal(ks[2], (1, d), jnp.float32),
        "w2": scale * jax.random.normal(ks[3], (d, d), jnp.float32),
        "b2": scale * jax.random.normal(ks[4], (1, d), jnp.float32),
        "g1": 1.0 + scale * jax.random.normal(ks[5], (1, d), jnp.float32),
        "be1": scale * jax.random.normal(ks[6], (1, d), jnp.float32),
        "g2": 1.0 + scale * jax.random.normal(ks[7], (1, d), jnp.float32),
        "be2": jnp.zeros((1, d), jnp.float32),
    }


if __name__ == "__main__":
    B, N, d, H = 16, 16, 128, 4     # d divisible by H; d = lane width
    key = jax.random.PRNGKey(0)
    kx, kp = jax.random.split(key)
    x = jax.random.normal(kx, (B, N, d), jnp.float32)
    params = make_params(kp, d)

    out = jax.block_until_ready(transformer_block(x, params, nheads=H))
    ref = transformer_block_reference(x, params, nheads=H)

    assert out.shape == (B, N, d)
    max_err = float(jnp.max(jnp.abs(out - ref)))
    # bf16 MXU operands with f32 accumulation -> loosened tolerance vs the
    # pure-f32 reference (statistics/residuals are kept in f32).
    assert jnp.allclose(out, ref, atol=7e-2, rtol=5e-2), max_err
    print("KERNEL_OK")
</pallas_src>

<mosaic_0001>
module attributes {stable_mosaic.version = 11 : i64} {
  func.func @_transformer_block_kernel(%arg0: i32, %arg1: memref<8x16x128xf32, #tpu.memory_space<vmem>>, %arg2: memref<128x384xbf16, #tpu.memory_space<vmem>>, %arg3: memref<128x128xbf16, #tpu.memory_space<vmem>>, %arg4: memref<1x128xf32, #tpu.memory_space<vmem>>, %arg5: memref<128x128xbf16, #tpu.memory_space<vmem>>, %arg6: memref<1x128xf32, #tpu.memory_space<vmem>>, %arg7: memref<1x128xf32, #tpu.memory_space<vmem>>, %arg8: memref<1x128xf32, #tpu.memory_space<vmem>>, %arg9: memref<1x128xf32, #tpu.memory_space<vmem>>, %arg10: memref<1x128xf32, #tpu.memory_space<vmem>>, %arg11: memref<8x16x128xf32, #tpu.memory_space<vmem>>, %arg12: memref<8x16x128xf32, #tpu.memory_space<vmem>>) attributes {dimension_semantics = [#tpu.dimension_semantics<parallel>], iteration_bounds = array<i64: 2>, scalar_prefetch = 0 : i64, scratch_operands = 1 : i64, tpu.core_type = #tpu.core_type<tc>, window_params = [{transform_indices = @transform_0, window_bounds = array<i64: 8, 16, 128>}, {pipeline_mode = #tpu.pipeline_mode<synchronous>, transform_indices = @transform_1, window_bounds = array<i64: 128, 384>}, {pipeline_mode = #tpu.pipeline_mode<synchronous>, transform_indices = @transform_2, window_bounds = array<i64: 128, 128>}, {pipeline_mode = #tpu.pipeline_mode<synchronous>, transform_indices = @transform_3, window_bounds = array<i64: 1, 128>}, {pipeline_mode = #tpu.pipeline_mode<synchronous>, transform_indices = @transform_4, window_bounds = array<i64: 128, 128>}, {pipeline_mode = #tpu.pipeline_mode<synchronous>, transform_indices = @transform_5, window_bounds = array<i64: 1, 128>}, {pipeline_mode = #tpu.pipeline_mode<synchronous>, transform_indices = @transform_6, window_bounds = array<i64: 1, 128>}, {pipeline_mode = #tpu.pipeline_mode<synchronous>, transform_indices = @transform_7, window_bounds = array<i64: 1, 128>}, {pipeline_mode = #tpu.pipeline_mode<synchronous>, transform_indices = @transform_8, window_bounds = array<i64: 1, 128>}, {pipeline_mode = #tpu.pipeline_mode<synchronous>, transform_indices = @transform_9, window_bounds = array<i64: 1, 128>}, {transform_indices = @transform_10, window_bounds = array<i64: 8, 16, 128>}]} {
    %c0 = arith.constant 0 : index
    %c0_0 = arith.constant 0 : index
    %c0_1 = arith.constant 0 : index
    %0 = vector.load %arg1[%c0, %c0_0, %c0_1] : memref<8x16x128xf32, #tpu.memory_space<vmem>>, vector<8x16x128xf32>
    %1 = vector.shape_cast %0 : vector<8x16x128xf32> to vector<128x128xf32>
    %2 = arith.truncf %1 : vector<128x128xf32> to vector<128x128xbf16>
    %c0_2 = arith.constant 0 : index
    %c0_3 = arith.constant 0 : index
    %3 = vector.load %arg2[%c0_2, %c0_3] : memref<128x384xbf16, #tpu.memory_space<vmem>>, vector<128x384xbf16>
    %cst = arith.constant dense<0.000000e+00> : vector<128x384xf32>
    %4 = tpu.matmul %2, %3, %cst {dimension_numbers = #tpu.dot_dimension_numbers<[1], [0], [0], [1], [0, 0, 1, 1], [], []>} : vector<128x128xbf16>, vector<128x384xbf16>, vector<128x384xf32> -> vector<128x384xf32>
    %5 = vector.shape_cast %4 : vector<128x384xf32> to vector<8x16x384xf32>
    %6 = vector.extract_strided_slice %5 {offsets = [0, 0, 0], sizes = [8, 16, 128], strides = [1, 1, 1]} : vector<8x16x384xf32> to vector<8x16x128xf32>
    %cst_4 = arith.constant 0.176776692 : f32
    %7 = vector.broadcast %cst_4 : f32 to vector<8x16x128xf32>
    %8 = arith.mulf %6, %7 : vector<8x16x128xf32>
    %9 = arith.truncf %8 : vector<8x16x128xf32> to vector<8x16x128xbf16>
    %10 = vector.extract_strided_slice %5 {offsets = [0, 0, 128], sizes = [8, 16, 128], strides = [1, 1, 1]} : vector<8x16x384xf32> to vector<8x16x128xf32>
    %11 = arith.truncf %10 : vector<8x16x128xf32> to vector<8x16x128xbf16>
    %12 = vector.extract_strided_slice %5 {offsets = [0, 0, 256], sizes = [8, 16, 128], strides = [1, 1, 1]} : vector<8x16x384xf32> to vector<8x16x128xf32>
    %13 = arith.truncf %12 : vector<8x16x128xf32> to vector<8x16x128xbf16>
    %14 = vector.extract_strided_slice %9 {offsets = [0, 0, 0], sizes = [8, 16, 32], strides = [1, 1, 1]} : vector<8x16x128xbf16> to vector<8x16x32xbf16>
    %15 = vector.extract_strided_slice %11 {offsets = [0, 0, 0], sizes = [8, 16, 32], strides = [1, 1, 1]} : vector<8x16x128xbf16> to vector<8x16x32xbf16>
    "tpu.trace_start"() <{level = 10 : i32, message = "bqf,bkf->bqk"}> : () -> ()
    %cst_5 = arith.constant dense<0.000000e+00> : vector<8x16x16xf32>
    %16 = tpu.matmul %14, %15, %cst_5 {dimension_numbers = #tpu.dot_dimension_numbers<[2], [2], [1], [1], [0, 0, 0, 1, 1, 1], [0], [0]>} : vector<8x16x32xbf16>, vector<8x16x32xbf16>, vector<8x16x16xf32> -> vector<8x16x16xf32>
    "tpu.trace_stop"() : () -> ()
    %cst_6 = arith.constant dense<0xFF800000> : vector<8x16xf32>
    %17 = vector.multi_reduction <maximumf>, %16, %cst_6 [1] : vector<8x16x16xf32> to vector<8x16xf32>
    %18 = vector.shape_cast %17 : vector<8x16xf32> to vector<8x1x16xf32>
    %19 = vector.broadcast %18 : vector<8x1x16xf32> to vector<8x16x16xf32>
    %20 = arith.subf %16, %19 : vector<8x16x16xf32>
    %21 = math.exp %20 : vector<8x16x16xf32>
    %cst_7 = arith.constant dense<0.000000e+00> : vector<8x16xf32>
    %22 = vector.multi_reduction <add>, %21, %cst_7 [1] : vector<8x16x16xf32> to vector<8x16xf32>
    %23 = vector.shape_cast %22 : vector<8x16xf32> to vector<8x1x16xf32>
    %24 = tpu.reciprocal %23 {approx = true} : vector<8x1x16xf32> -> vector<8x1x16xf32>
    %25 = vector.broadcast %24 : vector<8x1x16xf32> to vector<8x16x16xf32>
    %26 = arith.mulf %21, %25 : vector<8x16x16xf32>
    %27 = arith.truncf %26 : vector<8x16x16xf32> to vector<8x16x16xbf16>
    %28 = vector.extract_strided_slice %13 {offsets = [0, 0, 0], sizes = [8, 16, 32], strides = [1, 1, 1]} : vector<8x16x128xbf16> to vector<8x16x32xbf16>
    "tpu.trace_start"() <{level = 10 : i32, message = "bqk,bkf->bqf"}> : () -> ()
    %cst_8 = arith.constant dense<0.000000e+00> : vector<8x16x32xf32>
    %29 = tpu.matmul %27, %28, %cst_8 {dimension_numbers = #tpu.dot_dimension_numbers<[2], [1], [1], [2], [0, 0, 0, 1, 1, 2], [0], [0]>} : vector<8x16x16xbf16>, vector<8x16x32xbf16>, vector<8x16x32xf32> -> vector<8x16x32xf32>
    "tpu.trace_stop"() : () -> ()
    %c0_9 = arith.constant 0 : index
    %c0_10 = arith.constant 0 : index
    %c0_11 = arith.constant 0 : index
    %30 = vector.load %arg12[%c0_9, %c0_10, %c0_11] : memref<8x16x128xf32, #tpu.memory_space<vmem>>, vector<8x16x32xf32>
    tpu.vector_store %arg12[%c0_9, %c0_10, %c0_11], %29 {strides = array<i32>} : memref<8x16x128xf32, #tpu.memory_space<vmem>>, vector<8x16x32xf32>,
    %31 = vector.extract_strided_slice %9 {offsets = [0, 0, 32], sizes = [8, 16, 32], strides = [1, 1, 1]} : vector<8x16x128xbf16> to vector<8x16x32xbf16>
    %32 = vector.extract_strided_slice %11 {offsets = [0, 0, 32], sizes = [8, 16, 32], strides = [1, 1, 1]} : vector<8x16x128xbf16> to vector<8x16x32xbf16>
    "tpu.trace_start"() <{level = 10 : i32, message = "bqf,bkf->bqk"}> : () -> ()
    %cst_12 = arith.constant dense<0.000000e+00> : vector<8x16x16xf32>
    %33 = tpu.matmul %31, %32, %cst_12 {dimension_numbers = #tpu.dot_dimension_numbers<[2], [2], [1], [1], [0, 0, 0, 1, 1, 1], [0], [0]>} : vector<8x16x32xbf16>, vector<8x16x32xbf16>, vector<8x16x16xf32> -> vector<8x16x16xf32>
    "tpu.trace_stop"() : () -> ()
    %cst_13 = arith.constant dense<0xFF800000> : vector<8x16xf32>
    %34 = vector.multi_reduction <maximumf>, %33, %cst_13 [1] : vector<8x16x16xf32> to vector<8x16xf32>
    %35 = vector.shape_cast %34 : vector<8x16xf32> to vector<8x1x16xf32>
    %36 = vector.broadcast %35 : vector<8x1x16xf32> to vector<8x16x16xf32>
    %37 = arith.subf %33, %36 : vector<8x16x16xf32>
    %38 = math.exp %37 : vector<8x16x16xf32>
    %cst_14 = arith.constant dense<0.000000e+00> : vector<8x16xf32>
    %39 = vector.multi_reduction <add>, %38, %cst_14 [1] : vector<8x16x16xf32> to vector<8x16xf32>
    %40 = vector.shape_cast %39 : vector<8x16xf32> to vector<8x1x16xf32>
    %41 = tpu.reciprocal %40 {approx = true} : vector<8x1x16xf32> -> vector<8x1x16xf32>
    %42 = vector.broadcast %41 : vector<8x1x16xf32> to vector<8x16x16xf32>
    %43 = arith.mulf %38, %42 : vector<8x16x16xf32>
    %44 = arith.truncf %43 : vector<8x16x16xf32> to vector<8x16x16xbf16>
    %45 = vector.extract_strided_slice %13 {offsets = [0, 0, 32], sizes = [8, 16, 32], strides = [1, 1, 1]} : vector<8x16x128xbf16> to vector<8x16x32xbf16>
    "tpu.trace_start"() <{level = 10 : i32, message = "bqk,bkf->bqf"}> : () -> ()
    %cst_15 = arith.constant dense<0.000000e+00> : vector<8x16x32xf32>
    %46 = tpu.matmul %44, %45, %cst_15 {dimension_numbers = #tpu.dot_dimension_numbers<[2], [1], [1], [2], [0, 0, 0, 1, 1, 2], [0], [0]>} : vector<8x16x16xbf16>, vector<8x16x32xbf16>, vector<8x16x32xf32> -> vector<8x16x32xf32>
    "tpu.trace_stop"() : () -> ()
    %c0_16 = arith.constant 0 : index
    %c0_17 = arith.constant 0 : index
    %c32 = arith.constant 32 : index
    %47 = vector.load %arg12[%c0_16, %c0_17, %c32] : memref<8x16x128xf32, #tpu.memory_space<vmem>>, vector<8x16x32xf32>
    tpu.vector_store %arg12[%c0_16, %c0_17, %c32], %46 {strides = array<i32>} : memref<8x16x128xf32, #tpu.memory_space<vmem>>, vector<8x16x32xf32>,
    %48 = vector.extract_strided_slice %9 {offsets = [0, 0, 64], sizes = [8, 16, 32], strides = [1, 1, 1]} : vector<8x16x128xbf16> to vector<8x16x32xbf16>
    %49 = vector.extract_strided_slice %11 {offsets = [0, 0, 64], sizes = [8, 16, 32], strides = [1, 1, 1]} : vector<8x16x128xbf16> to vector<8x16x32xbf16>
    "tpu.trace_start"() <{level = 10 : i32, message = "bqf,bkf->bqk"}> : () -> ()
    %cst_18 = arith.constant dense<0.000000e+00> : vector<8x16x16xf32>
    %50 = tpu.matmul %48, %49, %cst_18 {dimension_numbers = #tpu.dot_dimension_numbers<[2], [2], [1], [1], [0, 0, 0, 1, 1, 1], [0], [0]>} : vector<8x16x32xbf16>, vector<8x16x32xbf16>, vector<8x16x16xf32> -> vector<8x16x16xf32>
    "tpu.trace_stop"() : () -> ()
    %cst_19 = arith.constant dense<0xFF800000> : vector<8x16xf32>
    %51 = vector.multi_reduction <maximumf>, %50, %cst_19 [1] : vector<8x16x16xf32> to vector<8x16xf32>
    %52 = vector.shape_cast %51 : vector<8x16xf32> to vector<8x1x16xf32>
    %53 = vector.broadcast %52 : vector<8x1x16xf32> to vector<8x16x16xf32>
    %54 = arith.subf %50, %53 : vector<8x16x16xf32>
    %55 = math.exp %54 : vector<8x16x16xf32>
    %cst_20 = arith.constant dense<0.000000e+00> : vector<8x16xf32>
    %56 = vector.multi_reduction <add>, %55, %cst_20 [1] : vector<8x16x16xf32> to vector<8x16xf32>
    %57 = vector.shape_cast %56 : vector<8x16xf32> to vector<8x1x16xf32>
    %58 = tpu.reciprocal %57 {approx = true} : vector<8x1x16xf32> -> vector<8x1x16xf32>
    %59 = vector.broadcast %58 : vector<8x1x16xf32> to vector<8x16x16xf32>
    %60 = arith.mulf %55, %59 : vector<8x16x16xf32>
    %61 = arith.truncf %60 : vector<8x16x16xf32> to vector<8x16x16xbf16>
    %62 = vector.extract_strided_slice %13 {offsets = [0, 0, 64], sizes = [8, 16, 32], strides = [1, 1, 1]} : vector<8x16x128xbf16> to vector<8x16x32xbf16>
    "tpu.trace_start"() <{level = 10 : i32, message = "bqk,bkf->bqf"}> : () -> ()
    %cst_21 = arith.constant dense<0.000000e+00> : vector<8x16x32xf32>
    %63 = tpu.matmul %61, %62, %cst_21 {dimension_numbers = #tpu.dot_dimension_numbers<[2], [1], [1], [2], [0, 0, 0, 1, 1, 2], [0], [0]>} : vector<8x16x16xbf16>, vector<8x16x32xbf16>, vector<8x16x32xf32> -> vector<8x16x32xf32>
    "tpu.trace_stop"() : () -> ()
    %c0_22 = arith.constant 0 : index
    %c0_23 = arith.constant 0 : index
    %c64 = arith.constant 64 : index
    %64 = vector.load %arg12[%c0_22, %c0_23, %c64] : memref<8x16x128xf32, #tpu.memory_space<vmem>>, vector<8x16x32xf32>
    tpu.vector_store %arg12[%c0_22, %c0_23, %c64], %63 {strides = array<i32>} : memref<8x16x128xf32, #tpu.memory_space<vmem>>, vector<8x16x32xf32>,
    %65 = vector.extract_strided_slice %9 {offsets = [0, 0, 96], sizes = [8, 16, 32], strides = [1, 1, 1]} : vector<8x16x128xbf16> to vector<8x16x32xbf16>
    %66 = vector.extract_strided_slice %11 {offsets = [0, 0, 96], sizes = [8, 16, 32], strides = [1, 1, 1]} : vector<8x16x128xbf16> to vector<8x16x32xbf16>
    "tpu.trace_start"() <{level = 10 : i32, message = "bqf,bkf->bqk"}> : () -> ()
    %cst_24 = arith.constant dense<0.000000e+00> : vector<8x16x16xf32>
    %67 = tpu.matmul %65, %66, %cst_24 {dimension_numbers = #tpu.dot_dimension_numbers<[2], [2], [1], [1], [0, 0, 0, 1, 1, 1], [0], [0]>} : vector<8x16x32xbf16>, vector<8x16x32xbf16>, vector<8x16x16xf32> -> vector<8x16x16xf32>
    "tpu.trace_stop"() : () -> ()
    %cst_25 = arith.constant dense<0xFF800000> : vector<8x16xf32>
    %68 = vector.multi_reduction <maximumf>, %67, %cst_25 [1] : vector<8x16x16xf32> to vector<8x16xf32>
    %69 = vector.shape_cast %68 : vector<8x16xf32> to vector<8x1x16xf32>
    %70 = vector.broadcast %69 : vector<8x1x16xf32> to vector<8x16x16xf32>
    %71 = arith.subf %67, %70 : vector<8x16x16xf32>
    %72 = math.exp %71 : vector<8x16x16xf32>
    %cst_26 = arith.constant dense<0.000000e+00> : vector<8x16xf32>
    %73 = vector.multi_reduction <add>, %72, %cst_26 [1] : vector<8x16x16xf32> to vector<8x16xf32>
    %74 = vector.shape_cast %73 : vector<8x16xf32> to vector<8x1x16xf32>
    %75 = tpu.reciprocal %74 {approx = true} : vector<8x1x16xf32> -> vector<8x1x16xf32>
    %76 = vector.broadcast %75 : vector<8x1x16xf32> to vector<8x16x16xf32>
    %77 = arith.mulf %72, %76 : vector<8x16x16xf32>
    %78 = arith.truncf %77 : vector<8x16x16xf32> to vector<8x16x16xbf16>
    %79 = vector.extract_strided_slice %13 {offsets = [0, 0, 96], sizes = [8, 16, 32], strides = [1, 1, 1]} : vector<8x16x128xbf16> to vector<8x16x32xbf16>
    "tpu.trace_start"() <{level = 10 : i32, message = "bqk,bkf->bqf"}> : () -> ()
    %cst_27 = arith.constant dense<0.000000e+00> : vector<8x16x32xf32>
    %80 = tpu.matmul %78, %79, %cst_27 {dimension_numbers = #tpu.dot_dimension_numbers<[2], [1], [1], [2], [0, 0, 0, 1, 1, 2], [0], [0]>} : vector<8x16x16xbf16>, vector<8x16x32xbf16>, vector<8x16x32xf32> -> vector<8x16x32xf32>
    "tpu.trace_stop"() : () -> ()
    %c0_28 = arith.constant 0 : index
    %c0_29 = arith.constant 0 : index
    %c96 = arith.constant 96 : index
    %81 = vector.load %arg12[%c0_28, %c0_29, %c96] : memref<8x16x128xf32, #tpu.memory_space<vmem>>, vector<8x16x32xf32>
    tpu.vector_store %arg12[%c0_28, %c0_29, %c96], %80 {strides = array<i32>} : memref<8x16x128xf32, #tpu.memory_space<vmem>>, vector<8x16x32xf32>,
    %c0_30 = arith.constant 0 : index
    %c0_31 = arith.constant 0 : index
    %c0_32 = arith.constant 0 : index
    %82 = vector.load %arg12[%c0_30, %c0_31, %c0_32] : memref<8x16x128xf32, #tpu.memory_space<vmem>>, vector<8x16x128xf32>
    %83 = vector.shape_cast %82 : vector<8x16x128xf32> to vector<128x128xf32>
    %84 = arith.addf %1, %83 : vector<128x128xf32>
    %c0_33 = arith.constant 0 : index
    %c0_34 = arith.constant 0 : index
    %85 = vector.load %arg7[%c0_33, %c0_34] : memref<1x128xf32, #tpu.memory_space<vmem>>, vector<1x128xf32>
    %c0_35 = arith.constant 0 : index
    %c0_36 = arith.constant 0 : index
    %86 = vector.load %arg8[%c0_35, %c0_36] : memref<1x128xf32, #tpu.memory_space<vmem>>, vector<1x128xf32>
    %cst_37 = arith.constant dense<0.000000e+00> : vector<128xf32>
    %87 = vector.multi_reduction <add>, %84, %cst_37 [1] : vector<128x128xf32> to vector<128xf32>
    %88 = vector.shape_cast %87 : vector<128xf32> to vector<128x1xf32>
    %cst_38 = arith.constant 1.280000e+02 : f32
    %89 = vector.broadcast %cst_38 : f32 to vector<128x1xf32>
    %90 = arith.divf %88, %89 : vector<128x1xf32>
    %91 = vector.broadcast %90 : vector<128x1xf32> to vector<128x128xf32>
    %92 = arith.subf %84, %91 : vector<128x128xf32>
    %93 = arith.mulf %92, %92 : vector<128x128xf32>
    %cst_39 = arith.constant dense<0.000000e+00> : vector<128xf32>
    %94 = vector.multi_reduction <add>, %93, %cst_39 [1] : vector<128x128xf32> to vector<128xf32>
    %95 = vector.shape_cast %94 : vector<128xf32> to vector<128x1xf32>
    %cst_40 = arith.constant 1.280000e+02 : f32
    %96 = vector.broadcast %cst_40 : f32 to vector<128x1xf32>
    %97 = arith.divf %95, %96 : vector<128x1xf32>
    %cst_41 = arith.constant 9.99999974E-6 : f32
    %98 = vector.broadcast %cst_41 : f32 to vector<128x1xf32>
    %99 = arith.addf %97, %98 : vector<128x1xf32>
    %100 = math.rsqrt %99 : vector<128x1xf32>
    %101 = vector.broadcast %100 : vector<128x1xf32> to vector<128x128xf32>
    %102 = arith.mulf %92, %101 : vector<128x128xf32>
    %103 = vector.broadcast %85 : vector<1x128xf32> to vector<128x128xf32>
    %104 = arith.mulf %102, %103 : vector<128x128xf32>
    %105 = vector.broadcast %86 : vector<1x128xf32> to vector<128x128xf32>
    %106 = arith.addf %104, %105 : vector<128x128xf32>
    %107 = arith.truncf %106 : vector<128x128xf32> to vector<128x128xbf16>
    %c0_42 = arith.constant 0 : index
    %c0_43 = arith.constant 0 : index
    %108 = vector.load %arg3[%c0_42, %c0_43] : memref<128x128xbf16, #tpu.memory_space<vmem>>, vector<128x128xbf16>
    %cst_44 = arith.constant dense<0.000000e+00> : vector<128x128xf32>
    %109 = tpu.matmul %107, %108, %cst_44 {dimension_numbers = #tpu.dot_dimension_numbers<[1], [0], [0], [1], [0, 0, 1, 1], [], []>} : vector<128x128xbf16>, vector<128x128xbf16>, vector<128x128xf32> -> vector<128x128xf32>
    %c0_45 = arith.constant 0 : index
    %c0_46 = arith.constant 0 : index
    %110 = vector.load %arg4[%c0_45, %c0_46] : memref<1x128xf32, #tpu.memory_space<vmem>>, vector<1x128xf32>
    %111 = vector.broadcast %110 : vector<1x128xf32> to vector<128x128xf32>
    %112 = arith.addf %109, %111 : vector<128x128xf32>
    %cst_47 = arith.constant 0.000000e+00 : f32
    %113 = vector.broadcast %cst_47 : f32 to vector<128x128xf32>
    %114 = arith.maximumf %112, %113 : vector<128x128xf32>
    %115 = arith.truncf %114 : vector<128x128xf32> to vector<128x128xbf16>
    %c0_48 = arith.constant 0 : index
    %c0_49 = arith.constant 0 : index
    %116 = vector.load %arg5[%c0_48, %c0_49] : memref<128x128xbf16, #tpu.memory_space<vmem>>, vector<128x128xbf16>
    %cst_50 = arith.constant dense<0.000000e+00> : vector<128x128xf32>
    %117 = tpu.matmul %115, %116, %cst_50 {dimension_numbers = #tpu.dot_dimension_numbers<[1], [0], [0], [1], [0, 0, 1, 1], [], []>} : vector<128x128xbf16>, vector<128x128xbf16>, vector<128x128xf32> -> vector<128x128xf32>
    %c0_51 = arith.constant 0 : index
    %c0_52 = arith.constant 0 : index
    %118 = vector.load %arg6[%c0_51, %c0_52] : memref<1x128xf32, #tpu.memory_space<vmem>>, vector<1x128xf32>
    %119 = vector.broadcast %118 : vector<1x128xf32> to vector<128x128xf32>
    %120 = arith.addf %117, %119 : vector<128x128xf32>
    %121 = arith.addf %106, %120 : vector<128x128xf32>
    %c0_53 = arith.constant 0 : index
    %c0_54 = arith.constant 0 : index
    %122 = vector.load %arg9[%c0_53, %c0_54] : memref<1x128xf32, #tpu.memory_space<vmem>>, vector<1x128xf32>
    %c0_55 = arith.constant 0 : index
    %c0_56 = arith.constant 0 : index
    %123 = vector.load %arg10[%c0_55, %c0_56] : memref<1x128xf32, #tpu.memory_space<vmem>>, vector<1x128xf32>
    %cst_57 = arith.constant dense<0.000000e+00> : vector<128xf32>
    %124 = vector.multi_reduction <add>, %121, %cst_57 [1] : vector<128x128xf32> to vector<128xf32>
    %125 = vector.shape_cast %124 : vector<128xf32> to vector<128x1xf32>
    %cst_58 = arith.constant 1.280000e+02 : f32
    %126 = vector.broadcast %cst_58 : f32 to vector<128x1xf32>
    %127 = arith.divf %125, %126 : vector<128x1xf32>
    %128 = vector.broadcast %127 : vector<128x1xf32> to vector<128x128xf32>
    %129 = arith.subf %121, %128 : vector<128x128xf32>
    %130 = arith.mulf %129, %129 : vector<128x128xf32>
    %cst_59 = arith.constant dense<0.000000e+00> : vector<128xf32>
    %131 = vector.multi_reduction <add>, %130, %cst_59 [1] : vector<128x128xf32> to vector<128xf32>
    %132 = vector.shape_cast %131 : vector<128xf32> to vector<128x1xf32>
    %cst_60 = arith.constant 1.280000e+02 : f32
    %133 = vector.broadcast %cst_60 : f32 to vector<128x1xf32>
    %134 = arith.divf %132, %133 : vector<128x1xf32>
    %cst_61 = arith.constant 9.99999974E-6 : f32
    %135 = vector.broadcast %cst_61 : f32 to vector<128x1xf32>
    %136 = arith.addf %134, %135 : vector<128x1xf32>
    %137 = math.rsqrt %136 : vector<128x1xf32>
    %138 = vector.broadcast %137 : vector<128x1xf32> to vector<128x128xf32>
    %139 = arith.mulf %129, %138 : vector<128x128xf32>
    %140 = vector.broadcast %122 : vector<1x128xf32> to vector<128x128xf32>
    %141 = arith.mulf %139, %140 : vector<128x128xf32>
    %142 = vector.broadcast %123 : vector<1x128xf32> to vector<128x128xf32>
    %143 = arith.addf %141, %142 : vector<128x128xf32>
    %144 = vector.shape_cast %143 : vector<128x128xf32> to vector<8x16x128xf32>
    %c0_62 = arith.constant 0 : index
    %c0_63 = arith.constant 0 : index
    %c0_64 = arith.constant 0 : index
    %145 = vector.load %arg11[%c0_62, %c0_63, %c0_64] : memref<8x16x128xf32, #tpu.memory_space<vmem>>, vector<8x16x128xf32>
    tpu.vector_store %arg11[%c0_62, %c0_63, %c0_64], %144 {strides = array<i32>} : memref<8x16x128xf32, #tpu.memory_space<vmem>>, vector<8x16x128xf32>,
    return
  }
  func.func @transform_0(%arg0: i32) -> (i32, i32, i32) {
    %c0_i32 = arith.constant 0 : i32
    %c0_i32_0 = arith.constant 0 : i32
    %c0_i32_1 = arith.constant 0 : i32
    return %arg0, %c0_i32, %c0_i32_0 : i32, i32, i32
  }
  func.func @transform_1(%arg0: i32) -> (i32, i32) {
    %c0_i32 = arith.constant 0 : i32
    %c0_i32_0 = arith.constant 0 : i32
    %c0_i32_1 = arith.constant 0 : i32
    return %c0_i32, %c0_i32_0 : i32, i32
  }
  func.func @transform_2(%arg0: i32) -> (i32, i32) {
    %c0_i32 = arith.constant 0 : i32
    %c0_i32_0 = arith.constant 0 : i32
    %c0_i32_1 = arith.constant 0 : i32
    return %c0_i32, %c0_i32_0 : i32, i32
  }
  func.func @transform_3(%arg0: i32) -> (i32, i32) {
    %c0_i32 = arith.constant 0 : i32
    %c0_i32_0 = arith.constant 0 : i32
    %c0_i32_1 = arith.constant 0 : i32
    return %c0_i32, %c0_i32_0 : i32, i32
  }
  func.func @transform_4(%arg0: i32) -> (i32, i32) {
    %c0_i32 = arith.constant 0 : i32
    %c0_i32_0 = arith.constant 0 : i32
    %c0_i32_1 = arith.constant 0 : i32
    return %c0_i32, %c0_i32_0 : i32, i32
  }
  func.func @transform_5(%arg0: i32) -> (i32, i32) {
    %c0_i32 = arith.constant 0 : i32
    %c0_i32_0 = arith.constant 0 : i32
    %c0_i32_1 = arith.constant 0 : i32
    return %c0_i32, %c0_i32_0 : i32, i32
  }
  func.func @transform_6(%arg0: i32) -> (i32, i32) {
    %c0_i32 = arith.constant 0 : i32
    %c0_i32_0 = arith.constant 0 : i32
    %c0_i32_1 = arith.constant 0 : i32
    return %c0_i32, %c0_i32_0 : i32, i32
  }
  func.func @transform_7(%arg0: i32) -> (i32, i32) {
    %c0_i32 = arith.constant 0 : i32
    %c0_i32_0 = arith.constant 0 : i32
    %c0_i32_1 = arith.constant 0 : i32
    return %c0_i32, %c0_i32_0 : i32, i32
  }
  func.func @transform_8(%arg0: i32) -> (i32, i32) {
    %c0_i32 = arith.constant 0 : i32
    %c0_i32_0 = arith.constant 0 : i32
    %c0_i32_1 = arith.constant 0 : i32
    return %c0_i32, %c0_i32_0 : i32, i32
  }
  func.func @transform_9(%arg0: i32) -> (i32, i32) {
    %c0_i32 = arith.constant 0 : i32
    %c0_i32_0 = arith.constant 0 : i32
    %c0_i32_1 = arith.constant 0 : i32
    return %c0_i32, %c0_i32_0 : i32, i32
  }
  func.func @transform_10(%arg0: i32) -> (i32, i32, i32) {
    %c0_i32 = arith.constant 0 : i32
    %c0_i32_0 = arith.constant 0 : i32
    %c0_i32_1 = arith.constant 0 : i32
    return %arg0, %c0_i32, %c0_i32_0 : i32, i32, i32
  }
}

</mosaic_0001>

<bundles_post_ra>
// kernel: tpu_custom_call.1
= control target key start
LH: loop header
LB: loop body
LE: loop exit
PB: predicated region body
PF: predicated region fallthrough
CT: control target
= control target key end

     0   :  { %s7625_s0 = inlined_call_operand.hbm [shape: f32[16,16,128], index: 0, kind: input, shape index: {}]   ;;  %s7626_s1 = inlined_call_operand.hbm [shape: bf16[128,384], index: 1, kind: input, shape index: {}]   ;;  %s7627_s2 = inlined_call_operand.hbm [shape: bf16[128,128], index: 2, kind: input, shape index: {}]   ;;  %s7628_s3 = inlined_call_operand.vmem [shape: f32[1,128], index: 3, kind: input, shape index: {}]   ;;  %s7629_s4 = inlined_call_operand.hbm [shape: bf16[128,128], index: 4, kind: input, shape index: {}]   ;;  %s7630_s5 = inlined_call_operand.vmem [shape: f32[1,128], index: 5, kind: input, shape index: {}]   ;;  %s7631_s6 = inlined_call_operand.vmem [shape: f32[1,128], index: 6, kind: input, shape index: {}]   ;;  %s7632_s7 = inlined_call_operand.vmem [shape: f32[1,128], index: 7, kind: input, shape index: {}]   ;;  %s7633_s8 = inlined_call_operand.vmem [shape: f32[1,128], index: 8, kind: input, shape index: {}]   ;;  %s7634_s9 = inlined_call_operand.vmem [shape: f32[1,128], index: 9, kind: input, shape index: {}]   ;;  %s7635_s10 = inlined_call_operand.hbm [shape: f32[16,16,128], index: 10, kind: output, shape index: {}]  }
   0x1   :  { %7636 = sst [smem:[#allocation17_spill]] %s7626_s1 }
   0x2   :  { %7637 = sst [smem:[#allocation18_spill]] %s7627_s2 }
   0x3   :  { %7638 = sst [smem:[#allocation19_spill]] %s7629_s4 }
   0x4   :  { %15 = vsyncpa [#allocation4], 0 }
   0x5   :  { %17 = vsyncpa [#allocation4 + $0x1], 0 }
   0x6   :  { %18 = vsyncpa [#allocation7], 0 }
   0x7   :  { %19 = vsyncpa [#allocation10], 0 }
   0x8   :  { %20 = vsyncpa [#allocation5], 0 }
   0x9   :  { %22 = vsyncpa [#allocation5 + $0x1], 0  ;;  %s5775_s13 = smov 0   ;;  %s5777_s14 = smov 0  }
   0xa   :  { %s5779_s15 = smov 0   ;;  %s5781_s16 = smov 0  }
   0xb LB: > { %s5796_s17 = sadd.s32 4294967295, %s5703_s16   ;;  %s4834_s18 = sadd.s32 4294967294, %s5703_s16   ;;  %s5703_s16 = sphi %s5781_s16, %s7654_s16   ;;  %s5699_s15 = sphi %s5779_s15, %s7653_s15   ;;  %s5695_s14 = sphi %s5777_s14, %s7652_s14   ;;  %s5691_s13 = sphi %s5775_s13, %s7651_s13  }
   0xc   : > { %p48_p0 = scmp.ne.s32.totalorder %s5695_s14, %s5691_s13  ;;  %p49_p1 = scmp.eq.s32.totalorder %s5796_s17, 0 }
   0xd   : > { %p261_p2 = scmp.eq.s32.totalorder %s5796_s17, 1  ;;  %p267_p3 = scmp.eq.s32.totalorder %s4834_s18, 1 }
   0xe   : > { %p5805_p4 = por %p49_p1, %p48_p0  ;;  %p4835_p5 = scmp.ge.s32.totalorder %s5703_s16, 1 }
   0xf   : > { %p5810_p6 = por %p267_p3, %p48_p0  ;;  %p274_p7 = scmp.lt.s32.totalorder %s5703_s16, 3 }
  0x10   : > { %s7641_s1 = sld [smem:[#allocation17_spill]]  ;;  %s5705_s25 = smov [#allocation6]  }
  0x11   : > { %p5818_p8 = pnand %p4835_p5, %p274_p7  ;;  %s287_s26 = sshll.u32 %s5705_s25, 4  ;;  %s288_s26 = int_to_ptr.vmem [resolvable:$true] %s287_s26 }
  0x12   : > { %s7644_s2 = sld [smem:[#allocation18_spill]]  ;;  %s5706_s11 = smov 192  }
  0x13   : > { %p5156_p9 = pneg %p5818_p8  ;;  %s5707_s12 = smov 12  }
  0x14   : > { %s5708_s18 = smov [#allocation8]   ;;  %s5709_s22 = smov 64  }
  0x15   : > { %p5826_p10 = pnand %p5156_p9, %p49_p1  ;;  %s301_s21 = sshll.u32 %s5708_s18, 4  ;;  %s302_s21 = int_to_ptr.vmem [resolvable:$true] %s301_s21 }
  0x16   : > { %s285_s23 = sshll.u32 %s7641_s1, 4  ;;  %s5710_s25 = smov 4   ;;  %s286_s23 = int_to_ptr.hbm [resolvable:$true] %s285_s23 }
  0x17   : > { %5159 = dma.hbm_to_vmem [thread:$0]  (!%p5826_p10), %s286_s23, 3072, %s288_s26, [#allocation7], %s5706_s11, %s5706_s11, %s5707_s12  }
  0x18   : > { %s299_s30 = sshll.u32 %s7644_s2, 4  ;;  %s7645_s4 = sld [smem:[#allocation19_spill]]  ;;  %s300_s30 = int_to_ptr.hbm [resolvable:$true] %s299_s30 }
  0x19   : > { %5162 = dma.hbm_to_vmem [thread:$0]  (!%p5826_p10), %s300_s30, 1024, %s302_s21, [#allocation7], %s5709_s22, %s5709_s22, %s5710_s25  }
  0x1a   : > { %s5711_s23 = smov [#allocation9]   ;;  %s5844_s11 = sadd.s32 1, %s5703_s16  }
  0x1b   : > { %s318_s26 = sshll.u32 %s5711_s23, 4  ;;  %s32_s12 = ssub.s32 %s5703_s16, %s5844_s11  ;;  %s319_s26 = int_to_ptr.vmem [resolvable:$true] %s318_s26 }
  0x1c   : > { %s35_s18 = sadd.s32 1, %s5699_s15  ;;  %p33_p12 = scmp.eq.s32.totalorder %s32_s12, 0 }
  0x1d   : > { %p42_p13 = scmp.ne.s32.totalorder %s5699_s15, %s5695_s14  ;;  %p43_p0 = scmp.eq.s32.totalorder %s5703_s16, 0 }
  0x1e   : > { %s316_s1 = sshll.u32 %s7645_s4, 4  ;;  %p5177_p3 = scmp.lt.s32.totalorder %s5703_s16, 2  ;;  %s317_s1 = int_to_ptr.hbm [resolvable:$true] %s316_s1 }
  0x1f   : > { %5165 = dma.hbm_to_vmem [thread:$0]  (!%p5826_p10), %s317_s1, 1024, %s319_s26, [#allocation10], %s5709_s22, %s5709_s22, %s5710_s25  }
  0x20   : > { %s5854_s30 = scalar_select %p33_p12, %s5699_s15, %s35_s18  }
  0x21   : > { %p44_p5 = por %p43_p0, %p42_p13  ;;  %p5858_p7 = por %p261_p2, %p42_p13 }
  0x22   : > { %7646 = sst [smem:[#allocation16_spill]] %s5854_s30  ;;  %s347_s27 = sand.u32 1, %s5699_s15  }
  0x23   : > { %s5081_s1 = sshll.u32 %s5703_s16, 7  ;;  %s4840_s22 = sshll.u32 %s347_s27, 7 }
  0x24   : > { %s357_s29 = scalar_lea.hbm %s7625_s0, %s5081_s1  ;;  %s351_s26 = scalar_lea.vmem [#allocation3], %s4840_s22 }
  0x25   : > { %s358_s23 = sshll.u32 %s357_s29, 4  ;;  %s360_s12 = sshll.u32 %s351_s26, 4  ;;  %s359_s23 = int_to_ptr.hbm [resolvable:$true] %s358_s23  ;;  %s361_s12 = int_to_ptr.vmem [resolvable:$true] %s360_s12 }
  0x26   : > { %p5869_p9 = pnand %p5177_p3, %p44_p5  ;;  %s348_s2 = scalar_lea.sflag [#allocation4], %s347_s27 }
  0x27   : > { %s5599_s4 = sshra.s32 %s359_s23, 4  ;;  %s5606_s25 = scalar_lea.hbm %s7625_s0, 256  ;;  %s5600_s4 = int_to_ptr.hbm [resolvable:$true] %s5599_s4 }
  0x28   : > { %s5601_s30 = scalar_lea.hbm %s5600_s4, 128  ;;  %p5603_p10 = pneg %p5869_p9 }
  0x29   : > { %p5602_p2 = scmp.ne.s32.totalorder %s5600_s4, %s5601_s30  ;;  %p5607_p0 = scmp.lt.s32.totalorder %s5600_s4, %s7625_s0 }
  0x2a   : > { %p5608_p3 = scmp.lt.s32.totalorder %s5606_s25, %s5601_s30 }
  0x2b   : > { %p5604_p12 = pnand %p5603_p10, %p5602_p2 }
  0x2c   : > { %p5609_p5 = por %p5608_p3, %p5607_p0 }
  0x2d   : > { %p5605_p13 = pneg %p5604_p12 }
  0x2f   : > { %p5610_p11 = pnand %p5609_p5, %p5605_p13 }
  0x31   : > { %5613 = shalt.err (!%p5610_p11)
}
  0x32   : > { %s5712_s27 = smov 128   ;;  %s5713_s26 = smov 8  }
  0x33   : > { %5169 = dma.hbm_to_vmem [thread:$0]  (!%p5869_p9), %s359_s23, 2048, %s361_s12, %s348_s2, %s5712_s27, %s5712_s27, %s5713_s26  }
  0x34   : > { %372 = sbr.rel (%p5818_p8) target bundleno = 2530 (0x9e2), region = 60  ;;  %s5886_s1 = sand.u32 (!%p5818_p8), 1, %s5695_s14  }
  0x35   : > { %s4845_s4 = sshll.u32 (!%p5818_p8), %s5886_s1, 7  ;;  %s375_s30 = scalar_lea.sflag (!%p5818_p8), [#allocation4], %s5886_s1 }
  0x36   : > { %s5892_s22 = scalar_lea.vmem (!%p5818_p8), [#allocation3], %s4845_s4 }
  0x39   : > { %5674 = dma.done.wait (%p5805_p4), %s375_s30, 2048  }
  0x3a   : > { %5676 = vsyncadd (%p5805_p4), %s375_s30, 4294965248 }
  0x3b   : > { %5678 = dma.done.wait (%p49_p1), [#allocation7], 4096  }
  0x3c   : > { %5680 = vsyncadd (%p49_p1), [#allocation7], 4294963200 }
  0x3d   : > { %5682 = dma.done.wait (%p49_p1), [#allocation10], 1024  }
  0x3e   : > { %5684 = vsyncadd (%p49_p1), [#allocation10], 4294966272  ;;  %v4936_v0 = vld [vmem:[#allocation6 + $0xa8] sm:$0xf]  ;;  %v5104_v1 = vld [vmem:[#allocation6 + $0xb0] sm:$0xf0] }
  0x3f   : > { %v5103_v2 = vld [vmem:[#allocation6 + $0xac] sm:$0xf]  ;;  %v4937_v3 = vor.u32 %v5104_v1, %v4936_v0  ;;  %v4938_v4 = vld [vmem:[#allocation6 + $0xb4] sm:$0xf0]  ;;  %v4924_v5 = vld [vmem:[#allocation6 + $0x90] sm:$0xf] }
  0x40   : > { %v5101_v6 = vld [vmem:[#allocation6 + $0x98] sm:$0xf0]  ;;  %v4941_v7 = vor.u32 %v5103_v2, %v4938_v4  ;;  %v5100_v8 = vld [vmem:[#allocation6 + $0x94] sm:$0xf]  ;;  %v4926_v9 = vld [vmem:[#allocation6 + $0x9c] sm:$0xf0] }
  0x41   : > { %618 = vmatpush.bf16.msra.mxu0 %v4937_v3  ;;  %v4925_v10 = vor.u32 %v5101_v6, %v4924_v5  ;;  %v4929_v11 = vor.u32 %v5100_v8, %v4926_v9  ;;  %v4912_v12 = vld [vmem:[#allocation6 + $0x78] sm:$0xf]  ;;  %v5098_v13 = vld [vmem:[#allocation6 + $0x80] sm:$0xf0]  ;;  %v5097_v14 = vld [vmem:[#allocation6 + $0x7c] sm:$0xf] }
  0x42   : > { %667 = vmatpush.bf16.msra.mxu1 %v4941_v7  ;;  %v4914_v15 = vld [vmem:[#allocation6 + $0x84] sm:$0xf0]  ;;  %v4913_v16 = vor.u32 %v5098_v13, %v4912_v12  ;;  %v4900_v18 = vld [vmem:[#allocation6 + $0x60] sm:$0xf]  ;;  %v5095_v19 = vld [vmem:[#allocation6 + $0x68] sm:$0xf0] }
  0x43   : > { %v4917_v17 = vor.u32 %v5097_v14, %v4914_v15  ;;  %v5094_v20 = vld [vmem:[#allocation6 + $0x64] sm:$0xf]  ;;  %v4902_v21 = vld [vmem:[#allocation6 + $0x6c] sm:$0xf0]  ;;  %v4888_v22 = vld [vmem:[#allocation6 + $0x48] sm:$0xf]  ;;  %v4901_v23 = vor.u32 %v5095_v19, %v4900_v18 }
  0x44   : > { %v5092_v24 = vld [vmem:[#allocation6 + $0x50] sm:$0xf0]  ;;  %v5091_v25 = vld [vmem:[#allocation6 + $0x4c] sm:$0xf]  ;;  %v4890_v26 = vld [vmem:[#allocation6 + $0x54] sm:$0xf0]  ;;  %v4905_v27 = vor.u32 %v5094_v20, %v4902_v21 }
  0x45   : > { %619 = vmatpush.bf16.msra.mxu0 %v4925_v10  ;;  %v4889_v28 = vor.u32 %v5092_v24, %v4888_v22  ;;  %v4893_v29 = vor.u32 %v5091_v25, %v4890_v26  ;;  %v4876_v30 = vld [vmem:[#allocation6 + $0x30] sm:$0xf]  ;;  %v5089_v31 = vld [vmem:[#allocation6 + $0x38] sm:$0xf0]  ;;  %v5088_v32 = vld [vmem:[#allocation6 + $0x34] sm:$0xf] }
  0x46   : > { %668 = vmatpush.bf16.msra.mxu1 %v4929_v11  ;;  %v4878_v33 = vld [vmem:[#allocation6 + $0x3c] sm:$0xf0]  ;;  %v4877_v34 = vor.u32 %v5089_v31, %v4876_v30  ;;  %v4864_v36 = vld [vmem:[#allocation6 + $0x18] sm:$0xf]  ;;  %v5086_v37 = vld [vmem:[#allocation6 + $0x20] sm:$0xf0] }
  0x47   : > { %v4881_v35 = vor.u32 %v5088_v32, %v4878_v33  ;;  %v5085_v38 = vld [vmem:[#allocation6 + $0x1c] sm:$0xf]  ;;  %v4866_v39 = vld [vmem:[#allocation6 + $0x24] sm:$0xf0]  ;;  %v4865_v40 = vor.u32 %v5086_v37, %v4864_v36  ;;  %v4852_v42 = vld [vmem:[#allocation6] sm:$0xf] }
  0x48   : > { %v4869_v41 = vor.u32 %v5085_v38, %v4866_v39  ;;  %v5083_v43 = vld [vmem:[#allocation6 + $0x8] sm:$0xf0]  ;;  %v5082_v44 = vld [vmem:[#allocation6 + $0x4] sm:$0xf]  ;;  %v4854_v45 = vld [vmem:[#allocation6 + $0xc] sm:$0xf0] }
  0x49   : > { %620 = vmatpush.bf16.msra.mxu0 %v4913_v16  ;;  %v4853_v46 = vor.u32 %v5083_v43, %v4852_v42  ;;  %v434_v47 = vld [vmem:[%s5892_s22] sm:$0xff]  ;;  %v435_v48 = vld [vmem:[%s5892_s22 + $0x8] sm:$0xff]  ;;  %v4857_v49 = vor.u32 %v5082_v44, %v4854_v45  ;;  %v436_v51 = vld [vmem:[%s5892_s22 + $0x10] sm:$0xff]  ;;  %vm839_vm0 = vcmask 261120   ;;  %s5714_s2 = smov 96   ;;  %s5715_s19 = smov 64  }
  0x4a   : > { %669 = vmatpush.bf16.msra.mxu1 %v4917_v17  ;;  %v5908_v50 = vpack.c.bf16 %v435_v48, %v434_v47  ;;  %v437_v52 = vld [vmem:[%s5892_s22 + $0x18] sm:$0xff]  ;;  %v4944_v54 = vld [vmem:[#allocation6 + $0xb0] sm:$0xf]  ;;  %v438_v57 = vld [vmem:[%s5892_s22 + $0x20] sm:$0xff]  ;;  %vm1070_vm1 = vcmask 130048   ;;  %s5716_s24 = smov 32  }
  0x4b   : > { %v5914_v53 = vpack.c.bf16 %v437_v52, %v436_v51  ;;  %v5105_v55 = vld [vmem:[#allocation6 + $0xb8] sm:$0xf0]  ;;  %v439_v58 = vld [vmem:[%s5892_s22 + $0x28] sm:$0xff]  ;;  %v4932_v60 = vld [vmem:[#allocation6 + $0x98] sm:$0xf]  ;;  %vm2231_vm2 = vcmask 523520  }
  0x4c   : > { %v4945_v56 = vor.u32 %v5105_v55, %v4944_v54  ;;  %v5920_v59 = vpack.c.bf16 %v439_v58, %v438_v57  ;;  %v5102_v61 = vld [vmem:[#allocation6 + $0xa0] sm:$0xf0]  ;;  %v4920_v63 = vld [vmem:[#allocation6 + $0x80] sm:$0xf]  ;;  %v5099_v0 = vld [vmem:[#allocation6 + $0x88] sm:$0xf0] }
  0x4d   : > { %621 = vmatpush.bf16.msra.mxu0 %v4901_v23  ;;  %v4933_v62 = vor.u32 %v5102_v61, %v4932_v60  ;;  %v4921_v1 = vor.u32 %v5099_v0, %v4920_v63  ;;  %v4908_v2 = vld [vmem:[#allocation6 + $0x68] sm:$0xf]  ;;  %v5096_v3 = vld [vmem:[#allocation6 + $0x70] sm:$0xf0]  ;;  %v4896_v5 = vld [vmem:[#allocation6 + $0x50] sm:$0xf] }
  0x4e   : > { %670 = vmatpush.bf16.msra.mxu1 %v4905_v27  ;;  %5124 = vmatpush.bf16.msra.mxu2 %v4945_v56  ;;  %v4909_v4 = vor.u32 %v5096_v3, %v4908_v2  ;;  %v5093_v6 = vld [vmem:[#allocation6 + $0x58] sm:$0xf0]  ;;  %v440_v7 = vld [vmem:[%s5892_s22 + $0x30] sm:$0xff]  ;;  %v4884_v11 = vld [vmem:[#allocation6 + $0x38] sm:$0xf]  ;;  %vm2936_vm3 = vcmask 785920  }
  0x4f   : > { %v441_v8 = vld [vmem:[%s5892_s22 + $0x38] sm:$0xff]  ;;  %v4897_v9 = vor.u32 %v5093_v6, %v4896_v5  ;;  %v5090_v12 = vld [vmem:[#allocation6 + $0x40] sm:$0xf0]  ;;  %v4872_v14 = vld [vmem:[#allocation6 + $0x20] sm:$0xf]  ;;  %vm3641_vm4 = vcmask 1048320  }
  0x50   : > { %v453_v10 = vpack.c.bf16 %v441_v8, %v440_v7  ;;  %v4885_v13 = vor.u32 %v5090_v12, %v4884_v11  ;;  %v5087_v15 = vld [vmem:[#allocation6 + $0x28] sm:$0xf0]  ;;  %v4860_v17 = vld [vmem:[#allocation6 + $0x8] sm:$0xf]  ;;  %v5084_v18 = vld [vmem:[#allocation6 + $0x10] sm:$0xf0] }
  0x51   : > { %622 = vmatpush.bf16.msra.mxu0 %v4889_v28  ;;  %v4873_v16 = vor.u32 %v5087_v15, %v4872_v14  ;;  %v4861_v19 = vor.u32 %v5084_v18, %v4860_v17  ;;  %v442_v20 = vld [vmem:[%s5892_s22 + $0x40] sm:$0xff]  ;;  %v443_v21 = vld [vmem:[%s5892_s22 + $0x48] sm:$0xff]  ;;  %v444_v23 = vld [vmem:[%s5892_s22 + $0x50] sm:$0xff]  ;;  %s4716_s28 = scalar_lea.sflag [#allocation5], %s5886_s1 }
  0x52   : > { %671 = vmatpush.bf16.msra.mxu1 %v4893_v29  ;;  %5125 = vmatpush.bf16.msra.mxu2 %v4933_v62  ;;  %v454_v22 = vpack.c.bf16 %v443_v21, %v442_v20  ;;  %v445_v24 = vld [vmem:[%s5892_s22 + $0x58] sm:$0xff]  ;;  %v446_v26 = vld [vmem:[%s5892_s22 + $0x60] sm:$0xff]  ;;  %v447_v27 = vld [vmem:[%s5892_s22 + $0x68] sm:$0xff] }
  0x53   : > { %v455_v25 = vpack.c.bf16 %v445_v24, %v444_v23  ;;  %v456_v28 = vpack.c.bf16 %v447_v27, %v446_v26  ;;  %v448_v29 = vld [vmem:[%s5892_s22 + $0x70] sm:$0xff]  ;;  %v449_v30 = vld [vmem:[%s5892_s22 + $0x78] sm:$0xff] }
  0x54   : > { %v457_v31 = vpack.c.bf16 %v449_v30, %v448_v29 }
  0x55   : > { %623 = vmatpush.bf16.msra.mxu0 %v4877_v34 }
  0x56   : > { %672 = vmatpush.bf16.msra.mxu1 %v4881_v35  ;;  %5126 = vmatpush.bf16.msra.mxu2 %v4921_v1 }
  0x59   : > { %624 = vmatpush.bf16.msra.mxu0 %v4865_v40 }
  0x5a   : > { %673 = vmatpush.bf16.msra.mxu1 %v4869_v41  ;;  %5127 = vmatpush.bf16.msra.mxu2 %v4909_v4 }
  0x5d   : > { %625 = vmatpush.bf16.msra.mxu0 %v4853_v46 }
  0x5e   : > { %674 = vmatpush.bf16.msra.mxu1 %v4857_v49  ;;  %5128 = vmatpush.bf16.msra.mxu2 %v4897_v9 }
  0x60   : > { %626 = vmatmul.bf16.vlgmr.msra.gmra.mxu0 %v5908_v50 }
  0x61   : > { %675 = vmatmul.bf16.vlgmr.msra.gmra.mxu1 %v5908_v50 }
  0x62   : > { %716 = vmatpush.bf16.msrb.mxu1 %v4945_v56  ;;  %5129 = vmatpush.bf16.msra.mxu2 %v4885_v13 }
  0x66   : > { %717 = vmatpush.bf16.msrb.mxu1 %v4933_v62  ;;  %5130 = vmatpush.bf16.msra.mxu2 %v4873_v16 }
  0x6a   : > { %718 = vmatpush.bf16.msrb.mxu1 %v4921_v1  ;;  %5131 = vmatpush.bf16.msra.mxu2 %v4861_v19 }
  0x6d   : > { %739 = vmatmul.bf16.vlgmr.msra.gmra.mxu2 %v453_v10 }
  0x6e   : > { %719 = vmatpush.bf16.msrb.mxu1 %v4909_v4 }
  0x70   : > { %631 = vmatmul.bf16.gmra.mxu0 %v5914_v53 }
  0x71   : > { %680 = vmatmul.bf16.gmra.mxu1 %v5914_v53 }
  0x72   : > { %720 = vmatpush.bf16.msrb.mxu1 %v4897_v9 }
  0x76   : > { %721 = vmatpush.bf16.msrb.mxu1 %v4885_v13 }
  0x7a   : > { %722 = vmatpush.bf16.msrb.mxu1 %v4873_v16 }
  0x7d   : > { %744 = vmatmul.bf16.gmra.mxu2 %v454_v22 }
  0x7e   : > { %723 = vmatpush.bf16.msrb.mxu1 %v4861_v19 }
  0x80   : > { %636 = vmatmul.bf16.gmra.mxu0 %v5920_v59 }
  0x81   : > { %685 = vmatmul.bf16.gmra.mxu1 %v5920_v59 }
  0x8d   : > { %749 = vmatmul.bf16.gmra.mxu2 %v455_v25 }
  0x90   : > { %641 = vmatmul.bf16.gmra.mxu0 %v453_v10 }
  0x91   : > { %690 = vmatmul.bf16.gmra.mxu1 %v453_v10 }
  0x9d   : > { %754 = vmatmul.bf16.gmra.mxu2 %v456_v28 }
  0xa0   : > { %646 = vmatmul.bf16.gmra.mxu0 %v454_v22 }
  0xa1   : > { %695 = vmatmul.bf16.gmra.mxu1 %v454_v22 }
  0xad   : > { %759 = vmatmul.bf16.gmra.mxu2 %v457_v31 }
  0xb0   : > { %651 = vmatmul.bf16.gmra.mxu0 %v455_v25 }
  0xb1   : > { %700 = vmatmul.bf16.gmra.mxu1 %v455_v25 }
  0xc0   : > { %656 = vmatmul.bf16.gmra.mxu0 %v456_v28 }
  0xc1   : > { %705 = vmatmul.bf16.gmra.mxu1 %v456_v28 }
  0xd0   : > { %661 = vmatmul.bf16.gmra.mxu0 %v457_v31 }
  0xd1   : > { %710 = vmatmul.bf16.gmra.mxu1 %v457_v31 }
  0xdd   : > { %v627_v32 = vpop.f32.mrf.mxu0 }
  0xde   : > { %v676_v33 = vpop.f32.mrf.mxu1  ;;  %v765_v39 = vmul.f32 0.17677669, %v627_v32 }
  0xdf   : > { %v797_v34 = vpack.c.bf16 %v676_v33, %v676_v33 }
  0xe0   : > { %v781_v44 = vpack.c.bf16 %v765_v39, %v765_v39 }
  0xe1   : > { %724 = vmatmul.bf16.vlgmr.msrb.gmra.mxu1 %v5908_v50  ;;  %v836_v40 = vunpack.c.l.b16 %v797_v34 }
  0xe2   : > { %v831_v49 = vunpack.c.l.b16 %v781_v44 }
  0xe5   : > { %v629_v35 = vpop.f32.mrf.mxu0 }
  0xe6   : > { %v678_v36 = vpop.f32.mrf.mxu1  ;;  %v766_v37 = vmul.f32 0.17677669, %v629_v35 }
  0xe7   : > { %v798_v38 = vpack.c.bf16 %v678_v36, %v678_v36 }
  0xe8   : > { %v782_v42 = vpack.c.bf16 %v766_v37, %v766_v37 }
  0xe9   : > { %v837_v41 = vunpack.c.l.b16 %v798_v38 }
  0xea   : > { %v832_v48 = vunpack.c.l.b16 %v782_v42 }
  0xeb   : > { %v5935_v43 = vpack.c.b16 %v837_v41, %v836_v40 }
  0xec   : > { %v5942_v51 = vpack.c.b16 %v832_v48, %v831_v49 }
  0xed   : > { %1545 = vrot.lane.b32.xlu0 %v5935_v43, %s5714_s2  ;;  %v632_v45 = vpop.f32.mrf.mxu0  ;;  %v844_v46 = vsel %vm839_vm0, %v5935_v43, 0 }
  0xee   : > { %v681_v47 = vpop.f32.mrf.mxu1  ;;  %853 = vmatpush.bf16.xpose.msra.mxu3 %v844_v46  ;;  %v767_v50 = vmul.f32 0.17677669, %v632_v45 }
  0xef   : > { %v799_v52 = vpack.c.bf16 %v681_v47, %v681_v47 }
  0xf0   : > { %v783_v55 = vpack.c.bf16 %v767_v50, %v767_v50  ;;  %v5973_v37 = vpop.f32.mrf.mxu2 }
  0xf1   : > { %729 = vmatmul.bf16.gmra.mxu1 %v5914_v53  ;;  %v867_v61 = vunpack.c.l.b16 %v799_v52 }
  0xf2   : > { %v862_v63 = vunpack.c.l.b16 %v783_v55 }
  0xf5   : > { %4946 = vmatmul.msk.bf16.vlgmr.msra.gmra.mxu3 %vm839_vm0, %v5942_v51  ;;  %1543 = vrot.lane.b32.xlu0 %v5942_v51, %s5714_s2  ;;  %v634_v54 = vpop.f32.mrf.mxu0 }
  0xf6   : > { %v683_v56 = vpop.f32.mrf.mxu1  ;;  %v768_v57 = vmul.f32 0.17677669, %v634_v54 }
  0xf7   : > { %v800_v58 = vpack.c.bf16 %v683_v56, %v683_v56 }
  0xf8   : > { %v784_v60 = vpack.c.bf16 %v768_v57, %v768_v57  ;;  %v5979_v50 = vpop.f32.mrf.mxu2 }
  0xf9   : > { %v868_v62 = vunpack.c.l.b16 %v800_v58 }
  0xfa   : > { %v863_v53 = vunpack.c.l.b16 %v784_v60 }
  0xfb   : > { %v5948_v0 = vpack.c.b16 %v868_v62, %v867_v61 }
  0xfc   : > { %v5950_v1 = vpack.c.b16 %v863_v53, %v862_v63 }
  0xfd   : > { %1569 = vrot.lane.b32.xlu1 %v5948_v0, %s5714_s2  ;;  %v637_v2 = vpop.f32.mrf.mxu0  ;;  %v874_v3 = vsel %vm839_vm0, %v5948_v0, 0 }
  0xfe   : > { %v686_v4 = vpop.f32.mrf.mxu1  ;;  %883 = vmatpush.bf16.xpose.msrb.mxu3 %v874_v3  ;;  %1567 = vrot.lane.b32.xlu2 %v5950_v1, %s5714_s2  ;;  %v769_v10 = vmul.f32 0.17677669, %v637_v2 }
  0xff   : > { %v801_v5 = vpack.c.bf16 %v686_v4, %v686_v4 }
 0x100   : > { %v785_v15 = vpack.c.bf16 %v769_v10, %v769_v10  ;;  %v745_v62 = vpop.f32.mrf.mxu2 }
 0x101   : > { %734 = vmatmul.bf16.gmra.mxu1 %v5920_v59  ;;  %v897_v11 = vunpack.c.l.b16 %v801_v5  ;;  %v821_v5 = vpack.c.bf16 %v745_v62, %v745_v62 }
 0x102   : > { %v892_v19 = vunpack.c.l.b16 %v785_v15 }
 0x105   : > { %4947 = vmatmul.msk.bf16.vlgmr.msrb.gmra.mxu3 %vm839_vm0, %v5950_v1  ;;  %v639_v6 = vpop.f32.mrf.mxu0 }
 0x106   : > { %v688_v7 = vpop.f32.mrf.mxu1  ;;  %v770_v9 = vmul.f32 0.17677669, %v639_v6 }
 0x107   : > { %v802_v8 = vpack.c.bf16 %v688_v7, %v688_v7 }
 0x108   : > { %v786_v14 = vpack.c.bf16 %v770_v9, %v770_v9 }
 0x109   : > { %v898_v12 = vunpack.c.l.b16 %v802_v8 }
 0x10a   : > { %v893_v18 = vunpack.c.l.b16 %v786_v14  ;;  %v1422_v14 = vunpack.c.l.b16 %v821_v5 }
 0x10b   : > { %v5961_v13 = vpack.c.b16 %v898_v12, %v897_v11  ;;  %v747_v11 = vpop.f32.mrf.mxu2 }
 0x10c   : > { %v5965_v20 = vpack.c.b16 %v893_v18, %v892_v19  ;;  %v822_v15 = vpack.c.bf16 %v747_v11, %v747_v11 }
 0x10d   : > { %v642_v16 = vpop.f32.mrf.mxu0  ;;  %v904_v17 = vsel %vm839_vm0, %v5961_v13, 0 }
 0x10e   : > { %v691_v59 = vpop.f32.mrf.mxu1  ;;  %913 = vmatpush.bf16.xpose.msra.mxu3 %v904_v17  ;;  %v771_v26 = vmul.f32 0.17677669, %v642_v16 }
 0x10f   : > { %v803_v21 = vpack.c.bf16 %v691_v59, %v691_v59  ;;  %v1423_v59 = vunpack.c.l.b16 %v822_v15 }
 0x110   : > { %v787_v31 = vpack.c.bf16 %v771_v26, %v771_v26 }
 0x111   : > { %v927_v27 = vunpack.c.l.b16 %v803_v21 }
 0x112   : > { %v922_v36 = vunpack.c.l.b16 %v787_v31 }
 0x115   : > { %4948 = vmatmul.msk.bf16.vlgmr.msra.gmra.mxu3 %vm839_vm0, %v5965_v20  ;;  %v644_v22 = vpop.f32.mrf.mxu0 }
 0x116   : > { %v693_v23 = vpop.f32.mrf.mxu1  ;;  %v772_v24 = vmul.f32 0.17677669, %v644_v22  ;;  %v6005_v22 = vpack.c.b16 %v1423_v59, %v1422_v14 }
 0x117   : > { %v804_v25 = vpack.c.bf16 %v693_v23, %v693_v23 }
 0x118   : > { %v788_v29 = vpack.c.bf16 %v772_v24, %v772_v24  ;;  %1436 = vmatpush.bf16.msrb.mxu2 %v6005_v22 }
 0x119   : > { %v928_v28 = vunpack.c.l.b16 %v804_v25 }
 0x11a   : > { %v923_v35 = vunpack.c.l.b16 %v788_v29 }
 0x11b   : > { %v5969_v30 = vpack.c.b16 %v928_v28, %v927_v27 }
 0x11c   : > { %v5975_v39 = vpack.c.b16 %v923_v35, %v922_v36 }
 0x11d   : > { %v647_v32 = vpop.f32.mrf.mxu0  ;;  %v934_v33 = vsel %vm839_vm0, %v5969_v30, 0 }
 0x11e   : > { %v696_v34 = vpop.f32.mrf.mxu1  ;;  %943 = vmatpush.bf16.xpose.msrb.mxu3 %v934_v33  ;;  %v773_v38 = vmul.f32 0.17677669, %v647_v32 }
 0x11f   : > { %v805_v40 = vpack.c.bf16 %v696_v34, %v696_v34 }
 0x120   : > { %v789_v42 = vpack.c.bf16 %v773_v38, %v773_v38 }
 0x121   : > { %v957_v48 = vunpack.c.l.b16 %v805_v40 }
 0x122   : > { %v952_v52 = vunpack.c.l.b16 %v789_v42 }
 0x125   : > { %4949 = vmatmul.msk.bf16.vlgmr.msrb.gmra.mxu3 %vm839_vm0, %v5975_v39  ;;  %v649_v41 = vpop.f32.mrf.mxu0 }
 0x126   : > { %v774_v44 = vmul.f32 0.17677669, %v649_v41  ;;  %v698_v45 = vpop.f32.mrf.mxu1 }
 0x127   : > { %v806_v46 = vpack.c.bf16 %v698_v45, %v698_v45  ;;  %v750_v45 = vpop.f32.mrf.mxu2 }
 0x128   : > { %v790_v47 = vpack.c.bf16 %v774_v44, %v774_v44 }
 0x129   : > { %v958_v49 = vunpack.c.l.b16 %v806_v46 }
 0x12a   : > { %v953_v54 = vunpack.c.l.b16 %v790_v47 }
 0x12b   : > { %v5981_v55 = vpack.c.b16 %v958_v49, %v957_v48 }
 0x12c   : > { %v5983_v56 = vpack.c.b16 %v953_v54, %v952_v52 }
 0x12d   : > { %1641 = vrot.lane.b32.xlu1 %v5981_v55, %s5714_s2  ;;  %v652_v57 = vpop.f32.mrf.mxu0  ;;  %v964_v58 = vsel %vm839_vm0, %v5981_v55, 0 }
 0x12e   : > { %v701_v60 = vpop.f32.mrf.mxu1  ;;  %973 = vmatpush.bf16.xpose.msra.mxu3 %v964_v58  ;;  %1639 = vrot.lane.b32.xlu2 %v5983_v56, %s5714_s2  ;;  %v775_v61 = vmul.f32 0.17677669, %v652_v57 }
 0x12f   : > { %v807_v63 = vpack.c.bf16 %v701_v60, %v701_v60 }
 0x130   : > { %v791_v53 = vpack.c.bf16 %v775_v61, %v775_v61 }
 0x131   : > { %v987_v6 = vunpack.c.l.b16 %v807_v63 }
 0x132   : > { %v982_v8 = vunpack.c.l.b16 %v791_v53  ;;  %v752_v53 = vpop.f32.mrf.mxu2 }
 0x135   : > { %4950 = vmatmul.msk.bf16.vlgmr.msra.gmra.mxu3 %vm839_vm0, %v5983_v56  ;;  %v654_v2 = vpop.f32.mrf.mxu0 }
 0x136   : > { %v776_v3 = vmul.f32 0.17677669, %v654_v2  ;;  %v703_v4 = vpop.f32.mrf.mxu1  ;;  %1593 = vrot.lane.b32.xlu2 %v5961_v13, %s5714_s2 }
 0x137   : > { %v808_v7 = vpack.c.bf16 %v703_v4, %v703_v4 }
 0x138   : > { %v792_v9 = vpack.c.bf16 %v776_v3, %v776_v3 }
 0x139   : > { %v988_v10 = vunpack.c.l.b16 %v808_v7 }
 0x13a   : > { %v983_v12 = vunpack.c.l.b16 %v792_v9 }
 0x13b   : > { %v5995_v16 = vpack.c.b16 %v988_v10, %v987_v6 }
 0x13c   : > { %v5997_v17 = vpack.c.b16 %v983_v12, %v982_v8  ;;  %v755_v8 = vpop.f32.mrf.mxu2 }
 0x13d   : > { %1665 = vrot.lane.b32.xlu0 %v5995_v16, %s5714_s2  ;;  %v657_v18 = vpop.f32.mrf.mxu0  ;;  %v994_v19 = vsel %vm839_vm0, %v5995_v16, 0  ;;  %v825_v59 = vpack.c.bf16 %v755_v8, %v755_v8 }
 0x13e   : > { %v706_v21 = vpop.f32.mrf.mxu1  ;;  %1003 = vmatpush.bf16.xpose.msrb.mxu3 %v994_v19  ;;  %1663 = vrot.lane.b32.xlu1 %v5997_v17, %s5714_s2  ;;  %v777_v23 = vmul.f32 0.17677669, %v657_v18 }
 0x13f   : > { %v809_v24 = vpack.c.bf16 %v706_v21, %v706_v21  ;;  %v1478_v21 = vunpack.c.l.b16 %v825_v59 }
 0x140   : > { %v793_v25 = vpack.c.bf16 %v777_v23, %v777_v23 }
 0x141   : > { %v1017_v29 = vunpack.c.l.b16 %v809_v24 }
 0x142   : > { %v1012_v32 = vunpack.c.l.b16 %v793_v25 }
 0x144   : > { %v757_v15 = vpop.f32.mrf.mxu2 }
 0x145   : > { %1591 = vrot.lane.b32.xlu0 %v5965_v20, %s5714_s2  ;;  %4951 = vmatmul.msk.bf16.vlgmr.msrb.gmra.mxu3 %vm839_vm0, %v5997_v17  ;;  %v659_v26 = vpop.f32.mrf.mxu0  ;;  %v826_v18 = vpack.c.bf16 %v757_v15, %v757_v15 }
 0x146   : > { %v778_v27 = vmul.f32 0.17677669, %v659_v26  ;;  %v708_v28 = vpop.f32.mrf.mxu1  ;;  %1617 = vrot.lane.b32.xlu1 %v5969_v30, %s5714_s2 }
 0x147   : > { %v810_v31 = vpack.c.bf16 %v708_v28, %v708_v28  ;;  %v1479_v23 = vunpack.c.l.b16 %v826_v18 }
 0x148   : > { %v794_v33 = vpack.c.bf16 %v778_v27, %v778_v27 }
 0x149   : > { %v1018_v34 = vunpack.c.l.b16 %v810_v31  ;;  %v6050_v24 = vpack.c.b16 %v1479_v23, %v1478_v21  ;;  %v823_v31 = vpack.c.bf16 %v750_v45, %v750_v45 }
 0x14a   : > { %v1013_v35 = vunpack.c.l.b16 %v794_v33  ;;  %v824_v33 = vpack.c.bf16 %v752_v53, %v752_v53 }
 0x14b   : > { %v6014_v36 = vpack.c.b16 %v1018_v34, %v1017_v29  ;;  %1492 = vmatpush.bf16.msrb.mxu0 %v6050_v24 }
 0x14c   : > { %v6016_v38 = vpack.c.b16 %v1013_v35, %v1012_v32  ;;  %v1450_v35 = vunpack.c.l.b16 %v823_v31 }
 0x14d   : > { %1615 = vrot.lane.b32.xlu0 %v5975_v39, %s5714_s2  ;;  %v662_v40 = vpop.f32.mrf.mxu0  ;;  %v1024_v41 = vsel %vm839_vm0, %v6014_v36, 0  ;;  %1689 = vrot.lane.b32.xlu2 %v6014_v36, %s5714_s2 }
 0x14e   : > { %v711_v42 = vpop.f32.mrf.mxu1  ;;  %1033 = vmatpush.bf16.xpose.msra.mxu3 %v1024_v41  ;;  %1687 = vrot.lane.b32.xlu1 %v6016_v38, %s5714_s2  ;;  %v779_v44 = vmul.f32 0.17677669, %v662_v40  ;;  %v1451_v40 = vunpack.c.l.b16 %v824_v33 }
 0x14f   : > { %v811_v46 = vpack.c.bf16 %v711_v42, %v711_v42 }
 0x150   : > { %v795_v47 = vpack.c.bf16 %v779_v44, %v779_v44 }
 0x151   : > { %v1047_v54 = vunpack.c.l.b16 %v811_v46  ;;  %v6065_v46 = vpack.c.b16 %v1451_v40, %v1450_v35 }
 0x152   : > { %v1042_v58 = vunpack.c.l.b16 %v795_v47 }
 0x155   : > { %4952 = vmatmul.msk.bf16.vlgmr.msra.gmra.mxu3 %vm839_vm0, %v6016_v38  ;;  %v664_v48 = vpop.f32.mrf.mxu0 }
 0x156   : > { %v780_v49 = vmul.f32 0.17677669, %v664_v48  ;;  %v713_v52 = vpop.f32.mrf.mxu1  ;;  %v819_v48 = vpack.c.bf16 %v5973_v37, %v5973_v37 }
 0x157   : > { %v812_v57 = vpack.c.bf16 %v713_v52, %v713_v52 }
 0x158   : > { %v796_v60 = vpack.c.bf16 %v780_v49, %v780_v49  ;;  %v6062_v42 = vpop.permute.xlu2 %1567  ;;  %v820_v49 = vpack.c.bf16 %v5979_v50, %v5979_v50 }
 0x159   : > { %v1048_v61 = vunpack.c.l.b16 %v812_v57 }
 0x15a   : > { %v1043_v62 = vunpack.c.l.b16 %v796_v60  ;;  %v1395_v60 = vunpack.c.l.b16 %v820_v49 }
 0x15b   : > { %v6028_v63 = vpack.c.b16 %v1048_v61, %v1047_v54 }
 0x15c   : > { %v6030_v2 = vpack.c.b16 %v1043_v62, %v1042_v58  ;;  %v1394_v58 = vunpack.c.l.b16 %v819_v48 }
 0x15d   : > { %v1054_v3 = vsel %vm839_vm0, %v6028_v63, 0  ;;  %1713 = vrot.lane.b32.xlu2 %v6028_v63, %s5714_s2 }
 0x15e   : > { %v725_v4 = vpop.f32.mrf.mxu1  ;;  %1063 = vmatpush.bf16.xpose.msrb.mxu3 %v1054_v3  ;;  %1711 = vrot.lane.b32.xlu0 %v6030_v2, %s5714_s2 }
 0x15f   : > { %v1546_v5 = vpop.permute.xlu0 %1545  ;;  %v813_v7 = vpack.c.bf16 %v725_v4, %v725_v4 }
 0x160   : > { %v1551_v6 = vsel %vm839_vm0, %v1546_v5, 0 }
 0x161   : > { %1560 = vmatpush.bf16.xpose.msra.mxu2 %v1551_v6  ;;  %v1310_v10 = vunpack.c.l.b16 %v813_v7  ;;  %v6078_v6 = vpack.c.b16 %v1395_v60, %v1394_v58 }
 0x165   : > { %4953 = vmatmul.msk.bf16.vlgmr.msrb.gmra.mxu3 %vm839_vm0, %v6030_v2 }
 0x166   : > { %v727_v9 = vpop.f32.mrf.mxu1  ;;  %2072 = vrot.lane.b32.xlu0 %v6005_v22, %s5714_s2 }
 0x167   : > { %v814_v11 = vpack.c.bf16 %v727_v9, %v727_v9 }
 0x169   : > { %v1311_v12 = vunpack.c.l.b16 %v814_v11 }
 0x16b   : > { %v6043_v14 = vpack.c.b16 %v1311_v12, %v1310_v10  ;;  %v760_v10 = vpop.f32.mrf.mxu2 }
 0x16c   : > { %v827_v35 = vpack.c.bf16 %v760_v10, %v760_v10 }
 0x16d   : > { %1972 = vrot.lane.b32.xlu1 %v6043_v14, %s5714_s2  ;;  %1324 = vmatpush.bf16.msra.mxu3 %v6043_v14 }
 0x16e   : > { %v730_v19 = vpop.f32.mrf.mxu1  ;;  %2248 = vrot.lane.b32.xlu0 %v5942_v51, %s5715_s19 }
 0x16f   : > { %v815_v25 = vpack.c.bf16 %v730_v19, %v730_v19 }
 0x171   : > { %v1338_v27 = vunpack.c.l.b16 %v815_v25 }
 0x173   : > { %v762_v31 = vpop.f32.mrf.mxu2 }
 0x174   : > { %v828_v40 = vpack.c.bf16 %v762_v31, %v762_v31 }
 0x175   : > { %2250 = vrot.lane.b32.xlu1 %v5935_v43, %s5715_s19 }
 0x176   : > { %v732_v26 = vpop.f32.mrf.mxu1 }
 0x177   : > { %v816_v28 = vpack.c.bf16 %v732_v26, %v732_v26 }
 0x178   : > { %v855_v29 = vpop.f32.mrf.mxu3 }
 0x179   : > { %v1339_v32 = vunpack.c.l.b16 %v816_v28  ;;  %v1071_v45 = vsel %vm1070_vm1, %v855_v29, -inf }
 0x17b   : > { %v6055_v34 = vpack.c.b16 %v1339_v32, %v1338_v27 }
 0x17d   : > { %1997 = vrot.lane.b32.xlu2 %v6055_v34, %s5714_s2  ;;  %2274 = vrot.lane.b32.xlu1 %v5948_v0, %s5715_s19 }
 0x17e   : > { %v735_v41 = vpop.f32.mrf.mxu1  ;;  %1352 = vmatpush.bf16.msrb.mxu3 %v6055_v34 }
 0x17f   : > { %v817_v54 = vpack.c.bf16 %v735_v41, %v735_v41 }
 0x180   : > { %v857_v44 = vpop.f32.mrf.mxu3 }
 0x181   : > { %v1072_v47 = vsel %vm1070_vm1, %v857_v44, -inf  ;;  %v1366_v53 = vunpack.c.l.b16 %v817_v54  ;;  %v1506_v54 = vunpack.c.l.b16 %v827_v35 }
 0x182   : > { %v1073_v52 = vmax.f32 %v1071_v45, %v1072_v47 }
 0x184   : > { %v1074_v57 = vrot.slane %v1073_v52, 4 }
 0x185   : > { %2097 = vrot.lane.b32.xlu2 %v6065_v46, %s5714_s2  ;;  %2272 = vrot.lane.b32.xlu1 %v5950_v1, %s5715_s19 }
 0x186   : > { %v1075_v61 = vmax.f32 %v1073_v52, %v1074_v57  ;;  %v737_v62 = vpop.f32.mrf.mxu1  ;;  %v1507_v57 = vunpack.c.l.b16 %v828_v40 }
 0x187   : > { %v818_v3 = vpack.c.bf16 %v737_v62, %v737_v62 }
 0x188   : > { %v1076_v4 = vrot.slane %v1075_v61, 2  ;;  %v885_v37 = vpop.f32.mrf.mxu3  ;;  %v6076_v5 = vpop.permute.xlu2 %1639 }
 0x189   : > { %v1367_v50 = vunpack.c.l.b16 %v818_v3  ;;  %v1080_v19 = vsel %vm1070_vm1, %v885_v37, -inf }
 0x18a   : > { %v1077_v7 = vmax.f32 %v1075_v61, %v1076_v4 }
 0x18b   : > { %v6080_v8 = vpack.c.b16 %v1367_v50, %v1366_v53  ;;  %v6108_v50 = vpack.c.b16 %v1507_v57, %v1506_v54 }
 0x18c   : > { %v1078_v9 = vrot.slane %v1077_v7, 1 }
 0x18d   : > { %1380 = vmatpush.bf16.msra.mxu1 %v6080_v8  ;;  %2346 = vrot.lane.b32.xlu2 %v5981_v55, %s5715_s19 }
 0x18e   : > { %v1079_v11 = vmax.f32 %v1077_v7, %v1078_v9  ;;  %2047 = vrot.lane.b32.xlu1 %v6078_v6, %s5714_s2  ;;  %2022 = vrot.lane.b32.xlu0 %v6080_v8, %s5714_s2 }
 0x190   : > { %v1143_v12 = vsub.f32 %v855_v29, %v1079_v11  ;;  %v1144_v15 = vsub.f32 %v857_v44, %v1079_v11  ;;  %v887_v59 = vpop.f32.mrf.mxu3  ;;  %v1594_v18 = vpop.permute.xlu2 %1593 }
 0x191   : > { %1408 = vmatpush.bf16.msrb.mxu1 %v6078_v6  ;;  %v1081_v21 = vsel %vm1070_vm1, %v887_v59, -inf  ;;  %v1599_v23 = vsel %vm839_vm0, %v1594_v18, 0 }
 0x192   : > { %v1159_v25 = vmul.f32 1.442695, %v1143_v12  ;;  %v1161_v26 = vmul.f32 1.442695, %v1144_v15  ;;  %v1082_v27 = vmax.f32 %v1080_v19, %v1081_v21  ;;  %1608 = vmatpush.bf16.xpose.msra.mxu0 %v1599_v23 }
 0x194   : > { %5235 = vpow2.f32 %v1159_v25  ;;  %v1083_v28 = vrot.slane %v1082_v27, 4 }
 0x195   : > { %5237 = vpow2.f32 %v1161_v26  ;;  %2344 = vrot.lane.b32.xlu2 %v5983_v56, %s5715_s19 }
 0x196   : > { %v1084_v29 = vmax.f32 %v1082_v27, %v1083_v28  ;;  %2298 = vrot.lane.b32.xlu1 %v5961_v13, %s5715_s19  ;;  %2370 = vrot.lane.b32.xlu0 %v5995_v16, %s5715_s19 }
 0x198   : > { %v1085_v32 = vrot.slane %v1084_v29, 2  ;;  %v915_v33 = vpop.f32.mrf.mxu3 }
 0x199   : > { %v1089_v4 = vsel %vm1070_vm1, %v915_v33, -inf }
 0x19a   : > { %v5236_v41 = vpop.eup %5235  ;;  %v1086_v44 = vmax.f32 %v1084_v29, %v1085_v32 }
 0x19b   : > { %v5238_v45 = vpop.eup %5237  ;;  %v1191_v47 = vsel %vm1070_vm1, %v5236_v41, 0.0 }
 0x19c   : > { %v1192_v48 = vsel %vm1070_vm1, %v5238_v45, 0.0  ;;  %v1087_v49 = vrot.slane %v1086_v44, 1 }
 0x19d   : > { %v1193_v52 = vadd.f32 %v1192_v48, %v1191_v47  ;;  %2122 = vrot.lane.b32.xlu2 %v6050_v24, %s5714_s2 }
 0x19e   : > { %v1088_v58 = vmax.f32 %v1086_v44, %v1087_v49  ;;  %2322 = vrot.lane.b32.xlu1 %v5969_v30, %s5715_s19  ;;  %2368 = vrot.lane.b32.xlu0 %v5997_v17, %s5715_s19 }
 0x19f   : > { %v1194_v60 = vrot.slane %v1193_v52, 4 }
 0x1a0   : > { %v1145_v61 = vsub.f32 %v885_v37, %v1088_v58  ;;  %v1146_v62 = vsub.f32 %v887_v59, %v1088_v58  ;;  %v917_v53 = vpop.f32.mrf.mxu3 }
 0x1a1   : > { %v1195_v3 = vadd.f32 %v1194_v60, %v1193_v52  ;;  %v1090_v7 = vsel %vm1070_vm1, %v917_v53, -inf }
 0x1a2   : > { %v1163_v9 = vmul.f32 1.442695, %v1145_v61  ;;  %v1165_v10 = vmul.f32 1.442695, %v1146_v62  ;;  %v1091_v11 = vmax.f32 %v1089_v4, %v1090_v7 }
 0x1a3   : > { %v1196_v12 = vrot.slane %v1195_v3, 2 }
 0x1a4   : > { %5239 = vpow2.f32 %v1163_v9  ;;  %v1092_v15 = vrot.slane %v1091_v11, 4 }
 0x1a5   : > { %v1197_v18 = vadd.f32 %v1196_v12, %v1195_v3  ;;  %5241 = vpow2.f32 %v1165_v10  ;;  %2147 = vrot.lane.b32.xlu2 %v6108_v50, %s5714_s2 }
 0x1a6   : > { %v1093_v37 = vmax.f32 %v1091_v11, %v1092_v15  ;;  %2392 = vrot.lane.b32.xlu1 %v6016_v38, %s5715_s19  ;;  %2296 = vrot.lane.b32.xlu0 %v5965_v20, %s5715_s19 }
 0x1a7   : > { %v1198_v59 = vrot.slane %v1197_v18, 1 }
 0x1a8   : > { %v1094_v19 = vrot.slane %v1093_v37, 2  ;;  %v6117_v21 = vpop.f32.mrf.mxu3 }
 0x1a9   : > { %v1199_v23 = vadd.f32 %v1198_v59, %v1197_v18  ;;  %v1098_v54 = vsel %vm1070_vm1, %v6117_v21, -inf }
 0x1aa   : > { %v6119_v25 = vpop.eup %5239  ;;  %v1095_v26 = vmax.f32 %v1093_v37, %v1094_v19 }
 0x1ab   : > { %v6121_v27 = vpop.eup %5241  ;;  %5243 = vrcp.f32 %v1199_v23  ;;  %v1200_v28 = vsel %vm1070_vm1, %v6119_v25, 0.0 }
 0x1ac   : > { %v1201_v29 = vsel %vm1070_vm1, %v6121_v27, 0.0  ;;  %v1096_v31 = vrot.slane %v1095_v26, 1 }
 0x1ad   : > { %v1202_v32 = vadd.f32 %v1201_v29, %v1200_v28  ;;  %2394 = vrot.lane.b32.xlu2 %v6014_v36, %s5715_s19 }
 0x1ae   : > { %v1097_v35 = vmax.f32 %v1095_v26, %v1096_v31  ;;  %2677 = vrot.lane.b32.xlu1 %v6043_v14, %s5715_s19  ;;  %2320 = vrot.lane.b32.xlu0 %v5975_v39, %s5715_s19 }
 0x1af   : > { %v1203_v40 = vrot.slane %v1202_v32, 4 }
 0x1b0   : > { %v1147_v44 = vsub.f32 %v915_v33, %v1097_v35  ;;  %v1148_v47 = vsub.f32 %v917_v53, %v1097_v35  ;;  %v947_v48 = vpop.f32.mrf.mxu3 }
 0x1b1   : > { %v5244_v49 = vpop.eup %5243  ;;  %v1204_v52 = vadd.f32 %v1203_v40, %v1202_v32  ;;  %v1099_v57 = vsel %vm1070_vm1, %v947_v48, -inf }
 0x1b2   : > { %v1272_v58 = vmul.f32 %v5244_v49, %v5238_v45  ;;  %v1167_v60 = vmul.f32 1.442695, %v1147_v44  ;;  %v1169_v61 = vmul.f32 1.442695, %v1148_v47  ;;  %v1100_v62 = vmax.f32 %v1098_v54, %v1099_v57 }
 0x1b3   : > { %v1205_v3 = vrot.slane %v1204_v52, 2  ;;  %v1271_v4 = vmul.f32 %v5244_v49, %v5236_v41 }
 0x1b4   : > { %v1288_v7 = vpack.c.bf16 %v1272_v58, %v1272_v58  ;;  %5245 = vpow2.f32 %v1167_v60  ;;  %v1101_v9 = vrot.slane %v1100_v62, 4 }
 0x1b5   : > { %v1206_v10 = vadd.f32 %v1205_v3, %v1204_v52  ;;  %5247 = vpow2.f32 %v1169_v61  ;;  %2418 = vrot.lane.b32.xlu2 %v6028_v63, %s5715_s19  ;;  %v1287_v33 = vpack.c.bf16 %v1271_v4, %v1271_v4 }
 0x1b6   : > { %v1306_v53 = vunpack.c.l.b16 %v1288_v7  ;;  %v1102_v11 = vmax.f32 %v1100_v62, %v1101_v9  ;;  %2955 = vrot.lane.b32.xlu1 %v5935_v43, %s5716_s24  ;;  %2416 = vrot.lane.b32.xlu0 %v6030_v2, %s5715_s19 }
 0x1b7   : > { %v1207_v45 = vrot.slane %v1206_v10, 1  ;;  %v1305_v41 = vunpack.c.l.b16 %v1287_v33 }
 0x1b8   : > { %v1103_v12 = vrot.slane %v1102_v11, 2  ;;  %v6142_v15 = vpop.f32.mrf.mxu3 }
 0x1b9   : > { %v1208_v18 = vadd.f32 %v1207_v45, %v1206_v10  ;;  %v1307_v37 = vpack.c.b16 %v1306_v53, %v1305_v41  ;;  %v1107_v52 = vsel %vm1070_vm1, %v6142_v15, -inf }
 0x1ba   : > { %v6144_v59 = vpop.eup %5245  ;;  %v1104_v19 = vmax.f32 %v1102_v11, %v1103_v12 }
 0x1bb   : > { %v6146_v23 = vpop.eup %5247  ;;  %5249 = vrcp.f32 %v1208_v18  ;;  %v1209_v26 = vsel %vm1070_vm1, %v6144_v59, 0.0  ;;  %4954 = vmatmul.msk.bf16.vlgmr.msra.gmra.mxu3 %vm1070_vm1, %v1307_v37 }
 0x1bc   : > { %v1210_v43 = vsel %vm1070_vm1, %v6146_v23, 0.0  ;;  %v1105_v28 = vrot.slane %v1104_v19, 1  ;;  %1464 = vmatpush.bf16.msra.mxu3 %v6065_v46 }
 0x1bd   : > { %v1211_v29 = vadd.f32 %v1210_v43, %v1209_v26  ;;  %2702 = vrot.lane.b32.xlu2 %v6055_v34, %s5715_s19 }
 0x1be   : > { %v1106_v31 = vmax.f32 %v1104_v19, %v1105_v28  ;;  %2979 = vrot.lane.b32.xlu1 %v5948_v0, %s5716_s24  ;;  %2777 = vrot.lane.b32.xlu0 %v6005_v22, %s5715_s19 }
 0x1bf   : > { %v1212_v32 = vrot.slane %v1211_v29, 4 }
 0x1c0   : > { %v1149_v35 = vsub.f32 %v6117_v21, %v1106_v31  ;;  %v1150_v40 = vsub.f32 %v947_v48, %v1106_v31  ;;  %v977_v44 = vpop.f32.mrf.mxu3 }
 0x1c1   : > { %v5250_v47 = vpop.eup %5249  ;;  %v1213_v49 = vadd.f32 %v1212_v32, %v1211_v29  ;;  %v1108_v54 = vsel %vm1070_vm1, %v977_v44, -inf }
 0x1c2   : > { %v1274_v57 = vmul.f32 %v5250_v47, %v6121_v27  ;;  %v1171_v58 = vmul.f32 1.442695, %v1149_v35  ;;  %v1173_v60 = vmul.f32 1.442695, %v1150_v40  ;;  %v1109_v0 = vmax.f32 %v1107_v52, %v1108_v54 }
 0x1c3   : > { %v1214_v61 = vrot.slane %v1213_v49, 2  ;;  %v1273_v62 = vmul.f32 %v5250_v47, %v6119_v25  ;;  %v1570_v25 = vpop.permute.xlu1 %1569 }
 0x1c4   : > { %v1290_v3 = vpack.c.bf16 %v1274_v57, %v1274_v57  ;;  %5251 = vpow2.f32 %v1171_v58  ;;  %v1110_v21 = vrot.slane %v1109_v0, 4  ;;  %v1575_v37 = vsel %vm839_vm0, %v1570_v25, 0 }
 0x1c5   : > { %v1215_v48 = vadd.f32 %v1214_v61, %v1213_v49  ;;  %5253 = vpow2.f32 %v1173_v60  ;;  %2802 = vrot.lane.b32.xlu2 %v6065_v46, %s5715_s19  ;;  %v1289_v4 = vpack.c.bf16 %v1273_v62, %v1273_v62 }
 0x1c6   : > { %v1334_v7 = vunpack.c.l.b16 %v1290_v3  ;;  %v1111_v9 = vmax.f32 %v1109_v0, %v1110_v21  ;;  %2752 = vrot.lane.b32.xlu1 %v6078_v6, %s5715_s19  ;;  %2953 = vrot.lane.b32.xlu0 %v5942_v51, %s5716_s24 }
 0x1c7   : > { %v1216_v27 = vrot.slane %v1215_v48, 1  ;;  %v1333_v10 = vunpack.c.l.b16 %v1289_v4 }
 0x1c8   : > { %v1112_v33 = vrot.slane %v1111_v9, 2  ;;  %v6172_v53 = vpop.f32.mrf.mxu3 }
 0x1c9   : > { %v1217_v11 = vadd.f32 %v1216_v27, %v1215_v48  ;;  %v1335_v45 = vpack.c.b16 %v1334_v7, %v1333_v10  ;;  %v1116_v31 = vsel %vm1070_vm1, %v6172_v53, -inf }
 0x1ca   : > { %v6174_v41 = vpop.eup %5251  ;;  %v1113_v12 = vmax.f32 %v1111_v9, %v1112_v33 }
 0x1cb   : > { %v6176_v18 = vpop.eup %5253  ;;  %5255 = vrcp.f32 %v1217_v11  ;;  %v1218_v19 = vsel %vm1070_vm1, %v6174_v41, 0.0  ;;  %4955 = vmatmul.msk.bf16.vlgmr.msrb.gmra.mxu3 %vm1070_vm1, %v1335_v45 }
 0x1cc   : > { %v1219_v51 = vsel %vm1070_vm1, %v6176_v18, 0.0  ;;  %v1114_v26 = vrot.slane %v1113_v12, 1  ;;  %1584 = vmatpush.bf16.xpose.msrb.mxu3 %v1575_v37 }
 0x1cd   : > { %v1220_v43 = vadd.f32 %v1219_v51, %v1218_v19  ;;  %2727 = vrot.lane.b32.xlu2 %v6080_v8, %s5715_s19 }
 0x1ce   : > { %v1115_v28 = vmax.f32 %v1113_v12, %v1114_v26  ;;  %2852 = vrot.lane.b32.xlu1 %v6108_v50, %s5715_s19  ;;  %2977 = vrot.lane.b32.xlu0 %v5950_v1, %s5716_s24 }
 0x1cf   : > { %v1221_v29 = vrot.slane %v1220_v43, 4 }
 0x1d0   : > { %v1151_v32 = vsub.f32 %v6142_v15, %v1115_v28  ;;  %v1152_v35 = vsub.f32 %v977_v44, %v1115_v28  ;;  %v1007_v40 = vpop.f32.mrf.mxu3  ;;  %v6198_v44 = vpop.permute.xlu1 %1641 }
 0x1d1   : > { %v5256_v47 = vpop.eup %5255  ;;  %v1222_v49 = vadd.f32 %v1221_v29, %v1220_v43  ;;  %v1117_v52 = vsel %vm1070_vm1, %v1007_v40, -inf }
 0x1d2   : > { %v1276_v54 = vmul.f32 %v5256_v47, %v6146_v23  ;;  %v1175_v57 = vmul.f32 1.442695, %v1151_v32  ;;  %v1177_v58 = vmul.f32 1.442695, %v1152_v35  ;;  %v1118_v60 = vmax.f32 %v1116_v31, %v1117_v52 }
 0x1d3   : > { %v1223_v0 = vrot.slane %v1222_v49, 2  ;;  %v1275_v1 = vmul.f32 %v5256_v47, %v6144_v59 }
 0x1d4   : > { %v1292_v61 = vpack.c.bf16 %v1276_v54, %v1276_v54  ;;  %5257 = vpow2.f32 %v1175_v57  ;;  %v1119_v62 = vrot.slane %v1118_v60, 4 }
 0x1d5   : > { %v1224_v3 = vadd.f32 %v1223_v0, %v1222_v49  ;;  %5259 = vpow2.f32 %v1177_v58  ;;  %2827 = vrot.lane.b32.xlu2 %v6050_v24, %s5715_s19  ;;  %v1291_v15 = vpack.c.bf16 %v1275_v1, %v1275_v1 }
 0x1d6   : > { %v1362_v21 = vunpack.c.l.b16 %v1292_v61  ;;  %v1120_v48 = vmax.f32 %v1118_v60, %v1119_v62  ;;  %3051 = vrot.lane.b32.xlu1 %v5981_v55, %s5716_s24  ;;  %3003 = vrot.lane.b32.xlu0 %v5961_v13, %s5716_s24 }
 0x1d7   : > { %v1225_v59 = vrot.slane %v1224_v3, 1  ;;  %v1361_v23 = vunpack.c.l.b16 %v1291_v15 }
 0x1d8   : > { %v1121_v4 = vrot.slane %v1120_v48, 2  ;;  %v6204_v7 = vpop.f32.mrf.mxu3  ;;  %v6218_v12 = vpop.permute.xlu1 %1663 }
 0x1d9   : > { %v1226_v9 = vadd.f32 %v1225_v59, %v1224_v3  ;;  %v1363_v27 = vpack.c.b16 %v1362_v21, %v1361_v23  ;;  %v1125_v43 = vsel %vm1070_vm1, %v6204_v7, -inf }
 0x1da   : > { %v6206_v10 = vpop.eup %5257  ;;  %v1122_v25 = vmax.f32 %v1120_v48, %v1121_v4 }
 0x1db   : > { %v6208_v33 = vpop.eup %5259  ;;  %5261 = vrcp.f32 %v1226_v9  ;;  %v1227_v11 = vsel %vm1070_vm1, %v6206_v10, 0.0  ;;  %4956 = vmatmul.msk.bf16.vlgmr.msra.gmra.mxu1 %vm1070_vm1, %v1363_v27 }
 0x1dc   : > { %v1228_v13 = vsel %vm1070_vm1, %v6208_v33, 0.0  ;;  %v1123_v55 = vrot.slane %v1122_v25, 1  ;;  %1520 = vmatpush.bf16.msra.mxu1 %v6108_v50 }
 0x1dd   : > { %v1229_v45 = vadd.f32 %v1228_v13, %v1227_v11  ;;  %3001 = vrot.lane.b32.xlu2 %v5965_v20, %s5716_s24 }
 0x1de   : > { %v1124_v37 = vmax.f32 %v1122_v25, %v1123_v55  ;;  %3075 = vrot.lane.b32.xlu1 %v5995_v16, %s5716_s24  ;;  %3027 = vrot.lane.b32.xlu0 %v5969_v30, %s5716_s24 }
 0x1df   : > { %v1230_v19 = vrot.slane %v1229_v45, 4 }
 0x1e0   : > { %v1153_v51 = vsub.f32 %v6172_v53, %v1124_v37  ;;  %v1154_v26 = vsub.f32 %v1007_v40, %v1124_v37  ;;  %v1037_v28 = vpop.f32.mrf.mxu3  ;;  %v1618_v0 = vpop.permute.xlu1 %1617 }
 0x1e1   : > { %v5262_v29 = vpop.eup %5261  ;;  %v1231_v31 = vadd.f32 %v1230_v19, %v1229_v45  ;;  %v1126_v20 = vsel %vm1070_vm1, %v1037_v28, -inf }
 0x1e2   : > { %v1277_v32 = vmul.f32 %v5262_v29, %v6174_v41  ;;  %v1278_v35 = vmul.f32 %v5262_v29, %v6176_v18  ;;  %v1179_v16 = vmul.f32 1.442695, %v1153_v51  ;;  %v1181_v47 = vmul.f32 1.442695, %v1154_v26 }
 0x1e3   : > { %v1232_v49 = vrot.slane %v1231_v31, 2  ;;  %v1127_v30 = vmax.f32 %v1125_v43, %v1126_v20 }
 0x1e4   : > { %v1293_v52 = vpack.c.bf16 %v1277_v32, %v1277_v32  ;;  %v1294_v54 = vpack.c.bf16 %v1278_v35, %v1278_v35  ;;  %5263 = vpow2.f32 %v1179_v16 }
 0x1e5   : > { %v1233_v53 = vadd.f32 %v1232_v49, %v1231_v31  ;;  %5265 = vpow2.f32 %v1181_v47  ;;  %v1128_v40 = vrot.slane %v1127_v30, 4  ;;  %3025 = vrot.lane.b32.xlu2 %v5975_v39, %s5716_s24  ;;  %v1623_v39 = vsel %vm839_vm0, %v1618_v0, 0  ;;  %v1690_v0 = vpop.permute.xlu2 %1689 }
 0x1e6   : > { %v1389_v57 = vunpack.c.l.b16 %v1293_v52  ;;  %v1390_v58 = vunpack.c.l.b16 %v1294_v54  ;;  %3097 = vrot.lane.b32.xlu1 %v6016_v38, %s5716_s24  ;;  %3049 = vrot.lane.b32.xlu0 %v5983_v56, %s5716_s24  ;;  %v6246_v56 = vpop.permute.xlu0 %1543  ;;  %v1647_v49 = vsel %vm839_vm0, %v6198_v44, 0 }
 0x1e7   : > { %v1234_v41 = vrot.slane %v1233_v53, 1  ;;  %v1129_v18 = vmax.f32 %v1127_v30, %v1128_v40 }
 0x1e8   : > { %v1391_v60 = vpack.c.b16 %v1390_v58, %v1389_v57  ;;  %v6236_v1 = vpop.f32.mrf.mxu3  ;;  %v6283_v44 = vpop.permute.xlu1 %1687 }
 0x1e9   : > { %v1130_v61 = vrot.slane %v1129_v18, 2  ;;  %v1235_v62 = vadd.f32 %v1234_v41, %v1233_v53  ;;  %v1134_v27 = vsel %vm1070_vm1, %v6236_v1, -inf }
 0x1ea   : > { %v6238_v3 = vpop.eup %5263 }
 0x1eb   : > { %v6240_v15 = vpop.eup %5265  ;;  %v1236_v38 = vsel %vm1070_vm1, %v6238_v3, 0.0  ;;  %v1131_v21 = vmax.f32 %v1129_v18, %v1130_v61  ;;  %4957 = vmatmul.msk.bf16.vlgmr.msrb.gmra.mxu1 %vm1070_vm1, %v1391_v60  ;;  %5267 = vrcp.f32 %v1235_v62 }
 0x1ec   : > { %v1237_v48 = vsel %vm1070_vm1, %v6240_v15, 0.0  ;;  %1632 = vmatpush.bf16.xpose.msrb.mxu1 %v1623_v39 }
 0x1ed   : > { %v1238_v59 = vadd.f32 %v1237_v48, %v1236_v38  ;;  %v1132_v23 = vrot.slane %v1131_v21, 1  ;;  %3073 = vrot.lane.b32.xlu2 %v5997_v17, %s5716_s24 }
 0x1ee   : > { %3382 = vrot.lane.b32.xlu1 %v6043_v14, %s5716_s24  ;;  %3099 = vrot.lane.b32.xlu0 %v6014_v36, %s5716_s24  ;;  %v6262_v43 = vpop.permute.xlu0 %1665 }
 0x1ef   : > { %v1239_v4 = vrot.slane %v1238_v59, 4  ;;  %v1133_v9 = vmax.f32 %v1131_v21, %v1132_v23 }
 0x1f0   : > { %v1067_v25 = vpop.f32.mrf.mxu3 }
 0x1f1   : > { %v5268_v11 = vpop.eup %5267  ;;  %v1240_v13 = vadd.f32 %v1239_v4, %v1238_v59  ;;  %v1155_v55 = vsub.f32 %v6204_v7, %v1133_v9  ;;  %v1156_v45 = vsub.f32 %v1037_v28, %v1133_v9  ;;  %v1135_v37 = vsel %vm1070_vm1, %v1067_v25, -inf  ;;  %v1714_v4 = vpop.permute.xlu2 %1713 }
 0x1f2   : > { %v1136_v17 = vmax.f32 %v1134_v27, %v1135_v37  ;;  %v1279_v19 = vmul.f32 %v5268_v11, %v6206_v10  ;;  %v1280_v14 = vmul.f32 %v5268_v11, %v6208_v33  ;;  %v1973_v27 = vpop.permute.xlu1 %1972 }
 0x1f3   : > { %v1241_v51 = vrot.slane %v1240_v13, 2  ;;  %v1183_v36 = vmul.f32 1.442695, %v1155_v55  ;;  %v1185_v26 = vmul.f32 1.442695, %v1156_v45 }
 0x1f4   : > { %v1137_v29 = vrot.slane %v1136_v17, 4  ;;  %v1295_v31 = vpack.c.bf16 %v1279_v19, %v1279_v19  ;;  %v1296_v20 = vpack.c.bf16 %v1280_v14, %v1280_v14 }
 0x1f5   : > { %v1242_v32 = vadd.f32 %v1241_v51, %v1240_v13  ;;  %5269 = vpow2.f32 %v1183_v36  ;;  %3123 = vrot.lane.b32.xlu2 %v6028_v63, %s5716_s24 }
 0x1f6   : > { %5271 = vpow2.f32 %v1185_v26  ;;  %v1138_v7 = vmax.f32 %v1136_v17, %v1137_v29  ;;  %3457 = vrot.lane.b32.xlu1 %v6078_v6, %s5716_s24  ;;  %3121 = vrot.lane.b32.xlu0 %v6030_v2, %s5716_s24  ;;  %v1417_v10 = vunpack.c.l.b16 %v1295_v31  ;;  %v1418_v33 = vunpack.c.l.b16 %v1296_v20  ;;  %v6277_v53 = vpop.permute.xlu0 %1591 }
 0x1f7   : > { %v1243_v28 = vrot.slane %v1242_v32, 1 }
 0x1f8   : > { %v1139_v35 = vrot.slane %v1138_v7, 2  ;;  %v1419_v16 = vpack.c.b16 %v1418_v33, %v1417_v10 }
 0x1f9   : > { %v1244_v47 = vadd.f32 %v1243_v28, %v1242_v32  ;;  %v1998_v19 = vpop.permute.xlu2 %1997 }
 0x1fa   : > { %v1140_v30 = vmax.f32 %v1138_v7, %v1139_v35  ;;  %4958 = vmatmul.msk.bf16.vlgmr.msrb.gmra.mxu2 %vm1070_vm1, %v1419_v16  ;;  %v6309_v28 = vpop.permute.xlu1 %2250 }
 0x1fb   : > { %v5270_v63 = vpop.eup %5269  ;;  %5273 = vrcp.f32 %v1244_v47  ;;  %1656 = vmatpush.bf16.xpose.msrb.mxu2 %v1647_v49 }
 0x1fc   : > { %v5272_v52 = vpop.eup %5271  ;;  %v1245_v6 = vsel %vm1070_vm1, %v5270_v63, 0.0  ;;  %v1141_v54 = vrot.slane %v1140_v30, 1 }
 0x1fd   : > { %v1246_v2 = vsel %vm1070_vm1, %v5272_v52, 0.0  ;;  %3407 = vrot.lane.b32.xlu2 %v6055_v34, %s5716_s24 }
 0x1fe   : > { %v1247_v40 = vadd.f32 %v1246_v2, %v1245_v6  ;;  %v1142_v57 = vmax.f32 %v1140_v30, %v1141_v54  ;;  %3532 = vrot.lane.b32.xlu1 %v6050_v24, %s5716_s24  ;;  %3432 = vrot.lane.b32.xlu0 %v6080_v8, %s5716_s24 }
 0x200   : > { %v1248_v58 = vrot.slane %v1247_v40, 4  ;;  %v1157_v41 = vsub.f32 %v6236_v1, %v1142_v57  ;;  %v1158_v18 = vsub.f32 %v1067_v25, %v1142_v57 }
 0x201   : > { %v5274_v60 = vpop.eup %5273  ;;  %v2098_v35 = vpop.permute.xlu2 %2097 }
 0x202   : > { %v1282_v34 = vmul.f32 %v5274_v60, %v6240_v15  ;;  %v1249_v61 = vadd.f32 %v1248_v58, %v1247_v40  ;;  %v1187_v62 = vmul.f32 1.442695, %v1157_v41  ;;  %v1189_v39 = vmul.f32 1.442695, %v1158_v18  ;;  %v6292_v15 = vpop.permute.xlu0 %1615 }
 0x203   : > { %v1281_v38 = vmul.f32 %v5274_v60, %v6238_v3  ;;  %v1719_v40 = vsel %vm839_vm0, %v1714_v4, 0 }
 0x204   : > { %v1298_v21 = vpack.c.bf16 %v1282_v34, %v1282_v34  ;;  %v1250_v24 = vrot.slane %v1249_v61, 2  ;;  %5275 = vpow2.f32 %v1187_v62 }
 0x205   : > { %5277 = vpow2.f32 %v1189_v39  ;;  %3482 = vrot.lane.b32.xlu2 %v6005_v22, %s5716_s24  ;;  %v1297_v8 = vpack.c.bf16 %v1281_v38, %v1281_v38  ;;  %v1671_v22 = vsel %vm839_vm0, %v6262_v43, 0 }
 0x206   : > { %v1446_v48 = vunpack.c.l.b16 %v1298_v21  ;;  %v1251_v1 = vadd.f32 %v1250_v24, %v1249_v61  ;;  %3507 = vrot.lane.b32.xlu0 %v6065_v46, %s5716_s24 }
 0x207   : > { %v1445_v59 = vunpack.c.l.b16 %v1297_v8 }
 0x208   : > { %v1252_v23 = vrot.slane %v1251_v1, 1 }
 0x209   : > { %v1447_v9 = vpack.c.b16 %v1446_v48, %v1445_v59  ;;  %v6315_v2 = vpop.permute.xlu2 %2346 }
 0x20a   : > { %v5276_v3 = vpop.eup %5275  ;;  %4962 = vmatmul.msk.bf16.vlgmr.msra.gmra.mxu2 %vm839_vm0, %v6246_v56  ;;  %v1253_v25 = vadd.f32 %v1252_v23, %v1251_v1  ;;  %v1712_v56 = vpop.permute.xlu0 %1711 }
 0x20b   : > { %v5278_v11 = vpop.eup %5277  ;;  %v1254_v13 = vsel %vm1070_vm1, %v5276_v3, 0.0  ;;  %4959 = vmatmul.msk.bf16.vlgmr.msra.gmra.mxu3 %vm1070_vm1, %v1447_v9  ;;  %1985 = vmatpush.bf16.msra.mxu2 %v1973_v27 }
 0x20c   : > { %v1255_v46 = vsel %vm1070_vm1, %v5278_v11, 0.0  ;;  %1680 = vmatpush.bf16.xpose.msra.mxu3 %v1671_v22  ;;  %5279 = vrcp.f32 %v1253_v25 }
 0x20d   : > { %v1256_v55 = vadd.f32 %v1255_v46, %v1254_v13  ;;  %3557 = vrot.lane.b32.xlu2 %v6108_v50, %s5716_s24  ;;  %v1695_v50 = vsel %vm839_vm0, %v1690_v0, 0 }
 0x20f   : > { %v1257_v45 = vrot.slane %v1256_v55, 4 }
 0x211   : > { %v1258_v37 = vadd.f32 %v1257_v45, %v1256_v55  ;;  %v6325_v41 = vpop.permute.xlu2 %2344 }
 0x212   : > { %v5280_v17 = vpop.eup %5279  ;;  %v2073_v33 = vpop.permute.xlu0 %2072 }
 0x213   : > { %v1259_v14 = vrot.slane %v1258_v37, 2  ;;  %v1283_v51 = vmul.f32 %v5280_v17, %v5270_v63  ;;  %v1284_v36 = vmul.f32 %v5280_v17, %v5272_v52  ;;  %v6313_v52 = vpop.permute.xlu1 %2274 }
 0x215   : > { %v1260_v26 = vadd.f32 %v1259_v14, %v1258_v37  ;;  %v1299_v43 = vpack.c.bf16 %v1283_v51, %v1283_v51  ;;  %v1300_v29 = vpack.c.bf16 %v1284_v36, %v1284_v36 }
 0x217   : > { %v1261_v31 = vrot.slane %v1260_v26, 1  ;;  %v1473_v20 = vunpack.c.l.b16 %v1299_v43  ;;  %v1474_v32 = vunpack.c.l.b16 %v1300_v29 }
 0x219   : > { %v1262_v7 = vadd.f32 %v1261_v31, %v1260_v26  ;;  %v1475_v10 = vpack.c.b16 %v1474_v32, %v1473_v20  ;;  %v2123_v60 = vpop.permute.xlu2 %2122 }
 0x21a   : > { %4966 = vmatmul.msk.bf16.vlgmr.msrb.gmra.mxu2 %vm839_vm0, %v6076_v5  ;;  %v6311_v30 = vpop.permute.xlu0 %2248 }
 0x21b   : > { %5281 = vrcp.f32 %v1262_v7  ;;  %4960 = vmatmul.msk.bf16.vlgmr.msrb.gmra.mxu0 %vm1070_vm1, %v1475_v10  ;;  %4963 = vmatmul.msk.bf16.vlgmr.msrb.gmra.mxu3 %vm839_vm0, %v6062_v42  ;;  %v6323_v58 = vpop.permute.xlu1 %2272 }
 0x21c   : > { %1704 = vmatpush.bf16.xpose.msrb.mxu0 %v1695_v50  ;;  %2085 = vmatpush.bf16.msrb.mxu2 %v2073_v33 }
 0x21d   : > { %2010 = vmatpush.bf16.msrb.mxu3 %v1998_v19 }
 0x221   : > { %v5282_v16 = vpop.eup %5281  ;;  %v2148_v0 = vpop.permute.xlu2 %2147 }
 0x222   : > { %v1285_v47 = vmul.f32 %v5282_v16, %v5276_v3  ;;  %v1286_v49 = vmul.f32 %v5282_v16, %v5278_v11  ;;  %v2023_v57 = vpop.permute.xlu0 %2022 }
 0x223   : > { %v2048_v18 = vpop.permute.xlu1 %2047 }
 0x224   : > { %v1301_v5 = vpack.c.bf16 %v1285_v47, %v1285_v47  ;;  %v1302_v63 = vpack.c.bf16 %v1286_v49, %v1286_v49 }
 0x226   : > { %v1501_v6 = vunpack.c.l.b16 %v1301_v5  ;;  %v1502_v54 = vunpack.c.l.b16 %v1302_v63 }
 0x228   : > { %v1503_v42 = vpack.c.b16 %v1502_v54, %v1501_v6 }
 0x22a   : > { %4961 = vmatmul.msk.bf16.vlgmr.msra.gmra.mxu1 %vm1070_vm1, %v1503_v42 }
 0x22b   : > { %4964 = vmatmul.msk.bf16.vlgmr.msra.gmra.mxu0 %vm839_vm0, %v6277_v53  ;;  %4967 = vmatmul.msk.bf16.vlgmr.msra.gmra.mxu3 %vm839_vm0, %v6218_v12 }
 0x22c   : > { %1728 = vmatpush.bf16.xpose.msra.mxu1 %v1719_v40  ;;  %2110 = vmatpush.bf16.msra.mxu3 %v2098_v35 }
 0x22d   : > { %2035 = vmatpush.bf16.msra.mxu0 %v2023_v57 }
 0x23a   : > { %4965 = vmatmul.msk.bf16.vlgmr.msrb.gmra.mxu1 %vm839_vm0, %v6292_v15 }
 0x23b   : > { %4968 = vmatmul.msk.bf16.vlgmr.msrb.gmra.mxu0 %vm839_vm0, %v6283_v44  ;;  %2060 = vmatpush.bf16.msrb.mxu1 %v2048_v18 }
 0x23c   : > { %2135 = vmatpush.bf16.msrb.mxu0 %v2123_v60 }
 0x23e   : > { %v1326_v53 = vpop.f32.mrf.mxu3 }
 0x23f   : > { %1527 = vst.msk [vmem:[#allocation2] sm:$0xff] %vm839_vm0, %v1326_v53 }
 0x246   : > { %v1328_v12 = vpop.f32.mrf.mxu3 }
 0x247   : > { %1528 = vst.msk [vmem:[#allocation2 + $0x8] sm:$0xff] %vm839_vm0, %v1328_v12 }
 0x24a   : > { %4969 = vmatmul.msk.bf16.vlgmr.msra.gmra.mxu1 %vm839_vm0, %v1712_v56 }
 0x24b   : > { %2160 = vmatpush.bf16.msra.mxu1 %v2148_v0 }
 0x24e   : > { %v1354_v34 = vpop.f32.mrf.mxu3 }
 0x24f   : > { %1529 = vst.msk [vmem:[#allocation2 + $0x10] sm:$0xff] %vm839_vm0, %v1354_v34 }
 0x256   : > { %v1356_v61 = vpop.f32.mrf.mxu3 }
 0x257   : > { %1530 = vst.msk [vmem:[#allocation2 + $0x18] sm:$0xff] %vm839_vm0, %v1356_v61 }
 0x258   : > { %v1382_v62 = vpop.f32.mrf.mxu1 }
 0x259   : > { %1531 = vst.msk [vmem:[#allocation2 + $0x20] sm:$0xff] %vm839_vm0, %v1382_v62 }
 0x260   : > { %v1384_v44 = vpop.f32.mrf.mxu1 }
 0x261   : > { %1532 = vst.msk [vmem:[#allocation2 + $0x28] sm:$0xff] %vm839_vm0, %v1384_v44 }
 0x268   : > { %v1410_v39 = vpop.f32.mrf.mxu1 }
 0x269   : > { %1533 = vst.msk [vmem:[#allocation2 + $0x30] sm:$0xff] %vm839_vm0, %v1410_v39 }
 0x270   : > { %v1412_v38 = vpop.f32.mrf.mxu1 }
 0x271   : > { %1534 = vst.msk [vmem:[#allocation2 + $0x38] sm:$0xff] %vm839_vm0, %v1412_v38 }
 0x27d   : > { %v1438_v21 = vpop.f32.mrf.mxu2 }
 0x27e   : > { %1535 = vst.msk [vmem:[#allocation2 + $0x40] sm:$0xff] %vm839_vm0, %v1438_v21 }
 0x285   : > { %v1440_v24 = vpop.f32.mrf.mxu2 }
 0x286   : > { %1536 = vst.msk [vmem:[#allocation2 + $0x48] sm:$0xff] %vm839_vm0, %v1440_v24 }
 0x28d   : > { %v1562_v8 = vpop.f32.mrf.mxu2 }
 0x28e   : > { %v1466_v48 = vpop.f32.mrf.mxu3  ;;  %v1735_v59 = vsel %vm1070_vm1, %v1562_v8, -inf }
 0x28f   : > { %1537 = vst.msk [vmem:[#allocation2 + $0x50] sm:$0xff] %vm839_vm0, %v1466_v48 }
 0x295   : > { %v1564_v1 = vpop.f32.mrf.mxu2 }
 0x296   : > { %v1468_v15 = vpop.f32.mrf.mxu3  ;;  %v1736_v23 = vsel %vm1070_vm1, %v1564_v1, -inf }
 0x297   : > { %1538 = vst.msk [vmem:[#allocation2 + $0x58] sm:$0xff] %vm839_vm0, %v1468_v15  ;;  %v1737_v4 = vmax.f32 %v1735_v59, %v1736_v23 }
 0x298   : > { %v1494_v9 = vpop.f32.mrf.mxu0 }
 0x299   : > { %v1738_v3 = vrot.slane %v1737_v4, 4  ;;  %1539 = vst.msk [vmem:[#allocation2 + $0x60] sm:$0xff] %vm839_vm0, %v1494_v9 }
 0x29b   : > { %v1739_v27 = vmax.f32 %v1737_v4, %v1738_v3 }
 0x29d   : > { %v1740_v25 = vrot.slane %v1739_v27, 2  ;;  %v1658_v11 = vpop.f32.mrf.mxu2 }
 0x29e   : > { %v1586_v22 = vpop.f32.mrf.mxu3  ;;  %v1771_v14 = vsel %vm1070_vm1, %v1658_v11, -inf }
 0x29f   : > { %v1741_v13 = vmax.f32 %v1739_v27, %v1740_v25  ;;  %v1744_v19 = vsel %vm1070_vm1, %v1586_v22, -inf }
 0x2a0   : > { %v1496_v46 = vpop.f32.mrf.mxu0 }
 0x2a1   : > { %v1742_v55 = vrot.slane %v1741_v13, 1  ;;  %1540 = vst.msk [vmem:[#allocation2 + $0x68] sm:$0xff] %vm839_vm0, %v1496_v46 }
 0x2a3   : > { %v1743_v45 = vmax.f32 %v1741_v13, %v1742_v55 }
 0x2a5   : > { %v1807_v56 = vsub.f32 %v1562_v8, %v1743_v45  ;;  %v1808_v37 = vsub.f32 %v1564_v1, %v1743_v45  ;;  %v1660_v17 = vpop.f32.mrf.mxu2 }
 0x2a6   : > { %v1588_v51 = vpop.f32.mrf.mxu3  ;;  %v1772_v36 = vsel %vm1070_vm1, %v1660_v17, -inf }
 0x2a7   : > { %v1823_v26 = vmul.f32 1.442695, %v1807_v56  ;;  %v1825_v43 = vmul.f32 1.442695, %v1808_v37  ;;  %v1745_v29 = vsel %vm1070_vm1, %v1588_v51, -inf  ;;  %v1773_v31 = vmax.f32 %v1771_v14, %v1772_v36  ;;  %v1522_v20 = vpop.f32.mrf.mxu1 }
 0x2a8   : > { %v1746_v32 = vmax.f32 %v1744_v19, %v1745_v29  ;;  %1541 = vst.msk [vmem:[#allocation2 + $0x70] sm:$0xff] %vm839_vm0, %v1522_v20  ;;  %v6353_v7 = vpop.f32.mrf.mxu0 }
 0x2a9   : > { %5283 = vpow2.f32 %v1823_v26  ;;  %v1774_v10 = vrot.slane %v1773_v31, 4  ;;  %v1753_v53 = vsel %vm1070_vm1, %v6353_v7, -inf }
 0x2aa   : > { %5285 = vpow2.f32 %v1825_v43  ;;  %v1747_v33 = vrot.slane %v1746_v32, 4 }
 0x2ab   : > { %v1775_v50 = vmax.f32 %v1773_v31, %v1774_v10 }
 0x2ac   : > { %v1748_v35 = vmax.f32 %v1746_v32, %v1747_v33 }
 0x2ad   : > { %v1776_v16 = vrot.slane %v1775_v50, 2 }
 0x2ae   : > { %v1749_v47 = vrot.slane %v1748_v35, 2  ;;  %v6355_v49 = vpop.f32.mrf.mxu3 }
 0x2af   : > { %v6357_v5 = vpop.eup %5283  ;;  %v1777_v63 = vmax.f32 %v1775_v50, %v1776_v16  ;;  %v1524_v6 = vpop.f32.mrf.mxu1  ;;  %v1780_v9 = vsel %vm1070_vm1, %v6355_v49, -inf }
 0x2b0   : > { %v6359_v54 = vpop.eup %5285  ;;  %v1855_v42 = vsel %vm1070_vm1, %v6357_v5, 0.0  ;;  %v1750_v40 = vmax.f32 %v1748_v35, %v1749_v47  ;;  %1542 = vst.msk [vmem:[#allocation2 + $0x78] sm:$0xff] %vm839_vm0, %v1524_v6  ;;  %v1612_v57 = vpop.f32.mrf.mxu0 }
 0x2b1   : > { %v1856_v18 = vsel %vm1070_vm1, %v6359_v54, 0.0  ;;  %v1778_v60 = vrot.slane %v1777_v63, 1  ;;  %v1754_v12 = vsel %vm1070_vm1, %v1612_v57, -inf }
 0x2b2   : > { %v1857_v0 = vadd.f32 %v1856_v18, %v1855_v42  ;;  %v1751_v34 = vrot.slane %v1750_v40, 1  ;;  %v1755_v61 = vmax.f32 %v1753_v53, %v1754_v12 }
 0x2b3   : > { %v1779_v62 = vmax.f32 %v1777_v63, %v1778_v60 }
 0x2b4   : > { %v1858_v44 = vrot.slane %v1857_v0, 4  ;;  %v1752_v39 = vmax.f32 %v1750_v40, %v1751_v34  ;;  %v1756_v38 = vrot.slane %v1755_v61, 4 }
 0x2b5   : > { %v1815_v21 = vsub.f32 %v1658_v11, %v1779_v62  ;;  %v1816_v24 = vsub.f32 %v1660_v17, %v1779_v62 }
 0x2b6   : > { %v1859_v8 = vadd.f32 %v1858_v44, %v1857_v0  ;;  %v1809_v48 = vsub.f32 %v1586_v22, %v1752_v39  ;;  %v1810_v1 = vsub.f32 %v1588_v51, %v1752_v39  ;;  %v1757_v59 = vmax.f32 %v1755_v61, %v1756_v38  ;;  %v6369_v15 = vpop.f32.mrf.mxu3 }
 0x2b7   : > { %v1839_v23 = vmul.f32 1.442695, %v1815_v21  ;;  %v1841_v4 = vmul.f32 1.442695, %v1816_v24  ;;  %v1781_v3 = vsel %vm1070_vm1, %v6369_v15, -inf  ;;  %v6375_v27 = vpop.f32.mrf.mxu1 }
 0x2b8   : > { %v1860_v25 = vrot.slane %v1859_v8, 2  ;;  %v1827_v13 = vmul.f32 1.442695, %v1809_v48  ;;  %v1829_v11 = vmul.f32 1.442695, %v1810_v1  ;;  %v1758_v46 = vrot.slane %v1757_v59, 2  ;;  %v6377_v55 = vpop.f32.mrf.mxu0 }
 0x2b9   : > { %5287 = vpow2.f32 %v1839_v23  ;;  %v1782_v22 = vmax.f32 %v1780_v9, %v1781_v3  ;;  %v1762_v29 = vsel %vm1070_vm1, %v6375_v27, -inf  ;;  %v1789_v31 = vsel %vm1070_vm1, %v6377_v55, -inf }
 0x2ba   : > { %v1861_v45 = vadd.f32 %v1860_v25, %v1859_v8  ;;  %5289 = vpow2.f32 %v1827_v13  ;;  %v1759_v56 = vmax.f32 %v1757_v59, %v1758_v46 }
 0x2bb   : > { %5291 = vpow2.f32 %v1829_v11  ;;  %v1783_v37 = vrot.slane %v1782_v22, 4 }
 0x2bc   : > { %v1862_v17 = vrot.slane %v1861_v45, 1  ;;  %5293 = vpow2.f32 %v1841_v4  ;;  %v1760_v19 = vrot.slane %v1759_v56, 1 }
 0x2bd   : > { %v1784_v14 = vmax.f32 %v1782_v22, %v1783_v37 }
 0x2be   : > { %v1863_v51 = vadd.f32 %v1862_v17, %v1861_v45  ;;  %v1761_v36 = vmax.f32 %v1759_v56, %v1760_v19 }
 0x2bf   : > { %v6379_v26 = vpop.eup %5287  ;;  %v1785_v43 = vrot.slane %v1784_v14, 2  ;;  %v6385_v20 = vpop.f32.mrf.mxu1 }
 0x2c0   : > { %v6387_v32 = vpop.eup %5289  ;;  %5295 = vrcp.f32 %v1863_v51  ;;  %v1891_v10 = vsel %vm1070_vm1, %v6379_v26, 0.0  ;;  %v1811_v33 = vsub.f32 %v6353_v7, %v1761_v36  ;;  %v1812_v50 = vsub.f32 %v1612_v57, %v1761_v36  ;;  %v6392_v35 = vpop.f32.mrf.mxu0 }
 0x2c1   : > { %v6394_v16 = vpop.eup %5291  ;;  %v1864_v47 = vsel %vm1070_vm1, %v6387_v32, 0.0  ;;  %v1786_v63 = vmax.f32 %v1784_v14, %v1785_v43  ;;  %v1763_v6 = vsel %vm1070_vm1, %v6385_v20, -inf  ;;  %v1790_v42 = vsel %vm1070_vm1, %v6392_v35, -inf }
 0x2c2   : > { %v6402_v40 = vpop.eup %5293  ;;  %v1865_v7 = vsel %vm1070_vm1, %v6394_v16, 0.0  ;;  %v1831_v57 = vmul.f32 1.442695, %v1811_v33  ;;  %v1833_v18 = vmul.f32 1.442695, %v1812_v50  ;;  %v1764_v60 = vmax.f32 %v1762_v29, %v1763_v6 }
 0x2c3   : > { %v1866_v53 = vadd.f32 %v1865_v7, %v1864_v47  ;;  %v1892_v12 = vsel %vm1070_vm1, %v6402_v40, 0.0  ;;  %v1787_v0 = vrot.slane %v1786_v63, 1  ;;  %v1791_v34 = vmax.f32 %v1789_v31, %v1790_v42 }
 0x2c4   : > { %v1893_v61 = vadd.f32 %v1892_v12, %v1891_v10  ;;  %5297 = vpow2.f32 %v1831_v57  ;;  %v1765_v62 = vrot.slane %v1764_v60, 4 }
 0x2c5   : > { %v1867_v44 = vrot.slane %v1866_v53, 4  ;;  %5299 = vpow2.f32 %v1833_v18  ;;  %v1788_v39 = vmax.f32 %v1786_v63, %v1787_v0  ;;  %v1792_v38 = vrot.slane %v1791_v34, 4 }
 0x2c6   : > { %v5296_v21 = vpop.eup %5295  ;;  %v1894_v24 = vrot.slane %v1893_v61, 4  ;;  %v1766_v8 = vmax.f32 %v1764_v60, %v1765_v62 }
 0x2c7   : > { %v1936_v48 = vmul.f32 %v5296_v21, %v6359_v54  ;;  %v1868_v1 = vadd.f32 %v1867_v44, %v1866_v53  ;;  %v1817_v59 = vsub.f32 %v6355_v49, %v1788_v39  ;;  %v1818_v23 = vsub.f32 %v6369_v15, %v1788_v39  ;;  %v6411_v4 = vpop.f32.mrf.mxu1 }
 0x2c8   : > { %v1895_v9 = vadd.f32 %v1894_v24, %v1893_v61  ;;  %v1767_v3 = vrot.slane %v1766_v8, 2  ;;  %v1793_v25 = vmax.f32 %v1791_v34, %v1792_v38  ;;  %v1935_v54 = vmul.f32 %v5296_v21, %v6357_v5  ;;  %v6434_v34 = vpop.permute.xlu0 %2370 }
 0x2c9   : > { %v1952_v13 = vpack.c.bf16 %v1936_v48, %v1936_v48  ;;  %v1869_v11 = vrot.slane %v1868_v1, 2  ;;  %v1843_v46 = vmul.f32 1.442695, %v1817_v59  ;;  %v1845_v22 = vmul.f32 1.442695, %v1818_v23  ;;  %v6445_v23 = vpop.permute.xlu1 %2298 }
 0x2ca   : > { %v6413_v45 = vpop.eup %5297  ;;  %v1896_v56 = vrot.slane %v1895_v9, 2  ;;  %v1768_v37 = vmax.f32 %v1766_v8, %v1767_v3  ;;  %v1794_v17 = vrot.slane %v1793_v25, 2  ;;  %v1951_v33 = vpack.c.bf16 %v1935_v54, %v1935_v54 }
 0x2cb   : > { %v6416_v19 = vpop.eup %5299  ;;  %v1970_v49 = vunpack.c.l.b16 %v1952_v13  ;;  %v1870_v15 = vadd.f32 %v1869_v11, %v1868_v1  ;;  %v1873_v14 = vsel %vm1070_vm1, %v6413_v45, 0.0  ;;  %5301 = vpow2.f32 %v1843_v46 }
 0x2cc   : > { %v1897_v51 = vadd.f32 %v1896_v56, %v1895_v9  ;;  %v1874_v36 = vsel %vm1070_vm1, %v6416_v19, 0.0  ;;  %5303 = vpow2.f32 %v1845_v22  ;;  %v1769_v43 = vrot.slane %v1768_v37, 1 }
 0x2cd   : > { %v1871_v29 = vrot.slane %v1870_v15, 1  ;;  %v1875_v31 = vadd.f32 %v1874_v36, %v1873_v14  ;;  %v1795_v10 = vmax.f32 %v1793_v25, %v1794_v17  ;;  %v2256_v5 = vsel %vm839_vm0, %v6309_v28, 0 }
 0x2ce   : > { %v1898_v50 = vrot.slane %v1897_v51, 1  ;;  %v1770_v47 = vmax.f32 %v1768_v37, %v1769_v43  ;;  %v1798_v63 = vsel %vm1070_vm1, %v6411_v4, -inf  ;;  %v1969_v57 = vunpack.c.l.b16 %v1951_v33 }
 0x2cf   : > { %v1872_v6 = vadd.f32 %v1871_v29, %v1870_v15  ;;  %v1876_v42 = vrot.slane %v1875_v31, 4  ;;  %v1796_v7 = vrot.slane %v1795_v10, 1  ;;  %v6426_v18 = vpop.f32.mrf.mxu1 }
 0x2d0   : > { %v1899_v60 = vadd.f32 %v1898_v50, %v1897_v51  ;;  %v1813_v53 = vsub.f32 %v6375_v27, %v1770_v47  ;;  %v1814_v12 = vsub.f32 %v6385_v20, %v1770_v47  ;;  %v1799_v0 = vsel %vm1070_vm1, %v6426_v18, -inf }
 0x2d1   : > { %v6432_v28 = vpop.eup %5301  ;;  %5305 = vrcp.f32 %v1872_v6  ;;  %v1877_v61 = vadd.f32 %v1876_v42, %v1875_v31  ;;  %v1797_v62 = vmax.f32 %v1795_v10, %v1796_v7  ;;  %v1971_v44 = vpack.c.b16 %v1970_v49, %v1969_v57  ;;  %v6455_v31 = vpop.permute.xlu0 %2368 }
 0x2d2   : > { %v6436_v39 = vpop.eup %5303  ;;  %5307 = vrcp.f32 %v1899_v60  ;;  %v1900_v38 = vsel %vm1070_vm1, %v6432_v28, 0.0  ;;  %v1835_v27 = vmul.f32 1.442695, %v1813_v53  ;;  %v1837_v21 = vmul.f32 1.442695, %v1814_v12  ;;  %v6467_v12 = vpop.permute.xlu1 %2322 }
 0x2d3   : > { %v1878_v20 = vrot.slane %v1877_v61, 2  ;;  %v1901_v24 = vsel %vm1070_vm1, %v6436_v39, 0.0  ;;  %v1819_v8 = vsub.f32 %v6377_v55, %v1797_v62  ;;  %v1820_v48 = vsub.f32 %v6392_v35, %v1797_v62  ;;  %4970 = vmatmul.msk.bf16.vlgmr.msra.gmra.mxu2 %vm1070_vm1, %v1971_v44 }
 0x2d4   : > { %v1902_v1 = vadd.f32 %v1901_v24, %v1900_v38  ;;  %5309 = vpow2.f32 %v1835_v27  ;;  %2265 = vmatpush.bf16.xpose.msra.mxu2 %v2256_v5  ;;  %v1800_v59 = vmax.f32 %v1798_v63, %v1799_v0  ;;  %v2280_v38 = vsel %vm839_vm0, %v6313_v52, 0 }
 0x2d5   : > { %v1879_v9 = vadd.f32 %v1878_v20, %v1877_v61  ;;  %5311 = vpow2.f32 %v1837_v21  ;;  %v1847_v3 = vmul.f32 1.442695, %v1819_v8  ;;  %v1849_v25 = vmul.f32 1.442695, %v1820_v48 }
 0x2d6   : > { %v1903_v13 = vrot.slane %v1902_v1, 4  ;;  %v1801_v11 = vrot.slane %v1800_v59, 4 }
 0x2d7   : > { %v5306_v46 = vpop.eup %5305  ;;  %v1880_v22 = vrot.slane %v1879_v9, 1  ;;  %5313 = vpow2.f32 %v1847_v3  ;;  %v2352_v3 = vsel %vm839_vm0, %v6315_v2, 0 }
 0x2d8   : > { %v5308_v55 = vpop.eup %5307  ;;  %v1937_v35 = vmul.f32 %v5306_v46, %v6387_v32  ;;  %v1938_v56 = vmul.f32 %v5306_v46, %v6394_v16  ;;  %v1904_v37 = vadd.f32 %v1903_v13, %v1902_v1  ;;  %5315 = vpow2.f32 %v1849_v25 }
 0x2d9   : > { %v1944_v17 = vmul.f32 %v5308_v55, %v6402_v40  ;;  %v1881_v54 = vadd.f32 %v1880_v22, %v1879_v9  ;;  %v1802_v49 = vmax.f32 %v1800_v59, %v1801_v11  ;;  %v1943_v15 = vmul.f32 %v5308_v55, %v6379_v26  ;;  %v6481_v55 = vpop.permute.xlu2 %2394 }
 0x2da   : > { %v6451_v14 = vpop.eup %5309  ;;  %v1953_v51 = vpack.c.bf16 %v1937_v35, %v1937_v35  ;;  %v1954_v36 = vpack.c.bf16 %v1938_v56, %v1938_v56  ;;  %v1905_v43 = vrot.slane %v1904_v37, 2 }
 0x2db   : > { %v6453_v29 = vpop.eup %5311  ;;  %v1960_v32 = vpack.c.bf16 %v1944_v17, %v1944_v17  ;;  %5317 = vrcp.f32 %v1881_v54  ;;  %v1882_v16 = vsel %vm1070_vm1, %v6451_v14, 0.0  ;;  %v1803_v10 = vrot.slane %v1802_v49, 2 }
 0x2dc   : > { %v1994_v40 = vunpack.c.l.b16 %v1953_v51  ;;  %v1995_v33 = vunpack.c.l.b16 %v1954_v36  ;;  %v1906_v5 = vadd.f32 %v1905_v43, %v1904_v37  ;;  %v1883_v26 = vsel %vm1070_vm1, %v6453_v29, 0.0 }
 0x2dd   : > { %v6461_v50 = vpop.eup %5313  ;;  %v2070_v47 = vunpack.c.l.b16 %v1960_v32  ;;  %v1884_v63 = vadd.f32 %v1883_v26, %v1882_v16  ;;  %v1804_v6 = vmax.f32 %v1802_v49, %v1803_v10  ;;  %v1959_v42 = vpack.c.bf16 %v1943_v15, %v1943_v15  ;;  %v6485_v15 = vpop.permute.xlu1 %2392 }
 0x2de   : > { %v6463_v7 = vpop.eup %5315  ;;  %v1996_v57 = vpack.c.b16 %v1995_v33, %v1994_v40  ;;  %v1907_v60 = vrot.slane %v1906_v5, 1  ;;  %v1909_v53 = vsel %vm1070_vm1, %v6461_v50, 0.0  ;;  %v2304_v32 = vsel %vm839_vm0, %v6445_v23, 0 }
 0x2df   : > { %v1885_v0 = vrot.slane %v1884_v63, 4  ;;  %v1910_v61 = vsel %vm1070_vm1, %v6463_v7, 0.0  ;;  %v1805_v62 = vrot.slane %v1804_v6, 1  ;;  %v2069_v44 = vunpack.c.l.b16 %v1959_v42 }
 0x2e0   : > { %v1908_v27 = vadd.f32 %v1907_v60, %v1906_v5  ;;  %v1911_v21 = vadd.f32 %v1910_v61, %v1909_v53  ;;  %4971 = vmatmul.msk.bf16.vlgmr.msrb.gmra.mxu3 %vm1070_vm1, %v1996_v57  ;;  %v2376_v53 = vsel %vm839_vm0, %v6434_v34, 0 }
 0x2e1   : > { %v5318_v20 = vpop.eup %5317  ;;  %v1886_v24 = vadd.f32 %v1885_v0, %v1884_v63  ;;  %v1806_v8 = vmax.f32 %v1804_v6, %v1805_v62  ;;  %v2071_v48 = vpack.c.b16 %v2070_v47, %v2069_v44  ;;  %2289 = vmatpush.bf16.xpose.msrb.mxu3 %v2280_v38 }
 0x2e2   : > { %v1940_v1 = vmul.f32 %v5318_v20, %v6416_v19  ;;  %5319 = vrcp.f32 %v1908_v27  ;;  %v1912_v59 = vrot.slane %v1911_v21, 4  ;;  %v1939_v9 = vmul.f32 %v5318_v20, %v6413_v45  ;;  %v6483_v19 = vpop.permute.xlu0 %2296 }
 0x2e3   : > { %v1887_v25 = vrot.slane %v1886_v24, 2  ;;  %v1821_v52 = vsub.f32 %v6411_v4, %v1806_v8  ;;  %v1822_v13 = vsub.f32 %v6426_v18, %v1806_v8  ;;  %4974 = vmatmul.msk.bf16.vlgmr.msrb.gmra.mxu2 %vm1070_vm1, %v2071_v48 }
 0x2e4   : > { %v1956_v11 = vpack.c.bf16 %v1940_v1, %v1940_v1  ;;  %v1913_v46 = vadd.f32 %v1912_v59, %v1911_v21  ;;  %2361 = vmatpush.bf16.xpose.msrb.mxu2 %v2352_v3  ;;  %v1955_v22 = vpack.c.bf16 %v1939_v9, %v1939_v9 }
 0x2e5   : > { %v1888_v35 = vadd.f32 %v1887_v25, %v1886_v24  ;;  %v1851_v45 = vmul.f32 1.442695, %v1821_v52  ;;  %v1853_v56 = vmul.f32 1.442695, %v1822_v13  ;;  %v2678_v44 = vpop.permute.xlu1 %2677  ;;  %v2328_v13 = vsel %vm839_vm0, %v6467_v12, 0 }
 0x2e6   : > { %v2020_v37 = vunpack.c.l.b16 %v1956_v11  ;;  %v1914_v2 = vrot.slane %v1913_v46, 2  ;;  %v2019_v17 = vunpack.c.l.b16 %v1955_v22 }
 0x2e7   : > { %v1889_v54 = vrot.slane %v1888_v35, 1  ;;  %5321 = vpow2.f32 %v1851_v45 }
 0x2e8   : > { %v5320_v4 = vpop.eup %5319  ;;  %v1915_v18 = vadd.f32 %v1914_v2, %v1913_v46  ;;  %5323 = vpow2.f32 %v1853_v56  ;;  %v2021_v49 = vpack.c.b16 %v2020_v37, %v2019_v17  ;;  %v2400_v46 = vsel %vm839_vm0, %v6481_v55, 0 }
 0x2e9   : > { %v1945_v51 = vmul.f32 %v5320_v4, %v6432_v28  ;;  %v1946_v36 = vmul.f32 %v5320_v4, %v6436_v39  ;;  %v1890_v43 = vadd.f32 %v1889_v54, %v1888_v35  ;;  %v2419_v39 = vpop.permute.xlu2 %2418 }
 0x2ea   : > { %v1916_v16 = vrot.slane %v1915_v18, 1  ;;  %4972 = vmatmul.msk.bf16.vlgmr.msra.gmra.mxu0 %vm1070_vm1, %v2021_v49  ;;  %v6493_v6 = vpop.permute.xlu0 %2320 }
 0x2eb   : > { %v1961_v10 = vpack.c.bf16 %v1945_v51, %v1945_v51  ;;  %v1962_v40 = vpack.c.bf16 %v1946_v36, %v1946_v36  ;;  %5325 = vrcp.f32 %v1890_v43  ;;  %2313 = vmatpush.bf16.xpose.msra.mxu0 %v2304_v32 }
 0x2ec   : > { %v1917_v33 = vadd.f32 %v1916_v16, %v1915_v18  ;;  %v2424_v18 = vsel %vm839_vm0, %v2419_v39, 0 }
 0x2ed   : > { %v5322_v5 = vpop.eup %5321  ;;  %v2094_v26 = vunpack.c.l.b16 %v1961_v10  ;;  %v2095_v47 = vunpack.c.l.b16 %v1962_v40  ;;  %v6515_v55 = vpop.permute.xlu1 %2955 }
 0x2ee   : > { %v5324_v63 = vpop.eup %5323  ;;  %5327 = vrcp.f32 %v1917_v33  ;;  %v1918_v28 = vsel %vm1070_vm1, %v5322_v5, 0.0 }
 0x2ef   : > { %v2096_v42 = vpack.c.b16 %v2095_v47, %v2094_v26  ;;  %v1919_v23 = vsel %vm1070_vm1, %v5324_v63, 0.0 }
 0x2f0   : > { %v1920_v57 = vadd.f32 %v1919_v23, %v1918_v28 }
 0x2f1   : > { %v5326_v60 = vpop.eup %5325  ;;  %4975 = vmatmul.msk.bf16.vlgmr.msra.gmra.mxu3 %vm1070_vm1, %v2096_v42  ;;  %v2703_v3 = vpop.permute.xlu2 %2702 }
 0x2f2   : > { %v1941_v0 = vmul.f32 %v5326_v60, %v6451_v14  ;;  %v1942_v61 = vmul.f32 %v5326_v60, %v6453_v29  ;;  %v1921_v62 = vrot.slane %v1920_v57, 4  ;;  %2385 = vmatpush.bf16.xpose.msra.mxu3 %v2376_v53  ;;  %v2417_v25 = vpop.permute.xlu0 %2416 }
 0x2f3   : > { %4978 = vmatmul.msk.bf16.vlgmr.msra.gmra.mxu2 %vm839_vm0, %v6311_v30 }
 0x2f4   : > { %v5328_v38 = vpop.eup %5327  ;;  %v1957_v27 = vpack.c.bf16 %v1941_v0, %v1941_v0  ;;  %v1958_v21 = vpack.c.bf16 %v1942_v61, %v1942_v61  ;;  %v1922_v20 = vadd.f32 %v1921_v62, %v1920_v57  ;;  %2690 = vmatpush.bf16.msra.mxu2 %v2678_v44 }
 0x2f5   : > { %v1947_v24 = vmul.f32 %v5328_v38, %v6461_v50  ;;  %v1948_v34 = vmul.f32 %v5328_v38, %v6463_v7 }
 0x2f6   : > { %v2044_v8 = vunpack.c.l.b16 %v1957_v27  ;;  %v2045_v48 = vunpack.c.l.b16 %v1958_v21  ;;  %v1923_v14 = vrot.slane %v1922_v20, 2 }
 0x2f7   : > { %v1963_v1 = vpack.c.bf16 %v1947_v24, %v1947_v24  ;;  %v1964_v29 = vpack.c.bf16 %v1948_v34, %v1948_v34 }
 0x2f8   : > { %v2046_v59 = vpack.c.b16 %v2045_v48, %v2044_v8  ;;  %v1924_v9 = vadd.f32 %v1923_v14, %v1922_v20 }
 0x2f9   : > { %v2119_v52 = vunpack.c.l.b16 %v1963_v1  ;;  %v2120_v30 = vunpack.c.l.b16 %v1964_v29  ;;  %v2803_v22 = vpop.permute.xlu2 %2802 }
 0x2fa   : > { %v1925_v11 = vrot.slane %v1924_v9, 1  ;;  %4973 = vmatmul.msk.bf16.vlgmr.msrb.gmra.mxu1 %vm1070_vm1, %v2046_v59  ;;  %v2778_v35 = vpop.permute.xlu0 %2777 }
 0x2fb   : > { %v2121_v50 = vpack.c.b16 %v2120_v30, %v2119_v52  ;;  %2337 = vmatpush.bf16.xpose.msrb.mxu1 %v2328_v13 }
 0x2fc   : > { %v1926_v7 = vadd.f32 %v1925_v11, %v1924_v9 }
 0x2fd   : > { %4976 = vmatmul.msk.bf16.vlgmr.msrb.gmra.mxu0 %vm1070_vm1, %v2121_v50 }
 0x2fe   : > { %5329 = vrcp.f32 %v1926_v7  ;;  %2409 = vmatpush.bf16.xpose.msrb.mxu0 %v2400_v46 }
 0x301   : > { %4979 = vmatmul.msk.bf16.vlgmr.msrb.gmra.mxu3 %vm839_vm0, %v6323_v58  ;;  %v2728_v58 = vpop.permute.xlu2 %2727 }
 0x302   : > { %2715 = vmatpush.bf16.msrb.mxu3 %v2703_v3  ;;  %v6537_v33 = vpop.permute.xlu0 %2953 }
 0x303   : > { %4982 = vmatmul.msk.bf16.vlgmr.msrb.gmra.mxu2 %vm839_vm0, %v6325_v41  ;;  %v6523_v41 = vpop.permute.xlu1 %2979 }
 0x304   : > { %v5330_v12 = vpop.eup %5329  ;;  %2790 = vmatpush.bf16.msrb.mxu2 %v2778_v35 }
 0x305   : > { %v1949_v45 = vmul.f32 %v5330_v12, %v5322_v5  ;;  %v1950_v56 = vmul.f32 %v5330_v12, %v5324_v63 }
 0x307   : > { %v1965_v37 = vpack.c.bf16 %v1949_v45, %v1949_v45  ;;  %v1966_v2 = vpack.c.bf16 %v1950_v56, %v1950_v56 }
 0x309   : > { %v2144_v17 = vunpack.c.l.b16 %v1965_v37  ;;  %v2145_v54 = vunpack.c.l.b16 %v1966_v2  ;;  %v2828_v49 = vpop.permute.xlu2 %2827 }
 0x30a   : > { %v6542_v39 = vpop.permute.xlu0 %2977 }
 0x30b   : > { %v2146_v4 = vpack.c.b16 %v2145_v54, %v2144_v17  ;;  %v2753_v51 = vpop.permute.xlu1 %2752 }
 0x30d   : > { %4977 = vmatmul.msk.bf16.vlgmr.msra.gmra.mxu1 %vm1070_vm1, %v2146_v4  ;;  %4980 = vmatmul.msk.bf16.vlgmr.msra.gmra.mxu0 %vm839_vm0, %v6483_v19 }
 0x30e   : > { %2433 = vmatpush.bf16.xpose.msra.mxu1 %v2424_v18  ;;  %2740 = vmatpush.bf16.msra.mxu0 %v2728_v58 }
 0x311   : > { %4983 = vmatmul.msk.bf16.vlgmr.msra.gmra.mxu3 %vm839_vm0, %v6455_v31  ;;  %v6544_v42 = vpop.permute.xlu2 %3001 }
 0x312   : > { %2815 = vmatpush.bf16.msra.mxu3 %v2803_v22  ;;  %v6554_v21 = vpop.permute.xlu0 %3003 }
 0x313   : > { %v2853_v36 = vpop.permute.xlu1 %2852 }
 0x319   : > { %v6557_v24 = vpop.permute.xlu2 %3025 }
 0x31a   : > { %v6568_v22 = vpop.permute.xlu0 %3027 }
 0x31d   : > { %4981 = vmatmul.msk.bf16.vlgmr.msrb.gmra.mxu1 %vm839_vm0, %v6493_v6  ;;  %4984 = vmatmul.msk.bf16.vlgmr.msrb.gmra.mxu0 %vm839_vm0, %v6485_v15 }
 0x31e   : > { %2765 = vmatpush.bf16.msrb.mxu1 %v2753_v51  ;;  %2840 = vmatpush.bf16.msrb.mxu0 %v2828_v49 }
 0x321   : > { %v6572_v37 = vpop.permute.xlu2 %3073 }
 0x32d   : > { %4985 = vmatmul.msk.bf16.vlgmr.msra.gmra.mxu1 %vm839_vm0, %v2417_v25 }
 0x32e   : > { %2865 = vmatpush.bf16.msra.mxu1 %v2853_v36 }
 0x356   : > { %v1987_v19 = vpop.f32.mrf.mxu2 }
 0x357   : > { %2183 = vrot.lane.b32.xlu0 %v1987_v19, %s5716_s24  ;;  %v6580_v19 = vpop.permute.xlu1 %3051 }
 0x35e   : > { %v1989_v31 = vpop.f32.mrf.mxu2 }
 0x35f   : > { %2185 = vrot.lane.b32.xlu1 %v1989_v31, %s5716_s24 }
 0x363   : > { %v2012_v43 = vpop.f32.mrf.mxu3 }
 0x364   : > { %2187 = vrot.lane.b32.xlu0 %v2012_v43, %s5716_s24 }
 0x366   : > { %v2087_v32 = vpop.f32.mrf.mxu2 }
 0x367   : > { %2199 = vrot.lane.b32.xlu2 %v2087_v32, %s5716_s24  ;;  %v2037_v16 = vpop.f32.mrf.mxu0 }
 0x36b   : > { %v2014_v15 = vpop.f32.mrf.mxu3 }
 0x36c   : > { %2191 = vrot.lane.b32.xlu0 %v2037_v16, %s5716_s24  ;;  %2189 = vrot.lane.b32.xlu1 %v2014_v15, %s5716_s24 }
 0x36e   : > { %v2089_v10 = vpop.f32.mrf.mxu2 }
 0x36f   : > { %2201 = vrot.lane.b32.xlu2 %v2089_v10, %s5716_s24  ;;  %v2039_v40 = vpop.f32.mrf.mxu0 }
 0x374   : > { %v2112_v5 = vpop.f32.mrf.mxu3  ;;  %2193 = vrot.lane.b32.xlu1 %v2039_v40, %s5716_s24 }
 0x376   : > { %v2267_v26 = vpop.f32.mrf.mxu2 }
 0x377   : > { %2203 = vrot.lane.b32.xlu2 %v2112_v5, %s5716_s24  ;;  %v2062_v47 = vpop.f32.mrf.mxu1  ;;  %v2440_v23 = vsel %vm1070_vm1, %v2267_v26, -inf }
 0x378   : > { %2195 = vrot.lane.b32.xlu0 %v2062_v47, %s5716_s24 }
 0x37a   : > { %v2137_v63 = vpop.f32.mrf.mxu0 }
 0x37c   : > { %v2114_v28 = vpop.f32.mrf.mxu3 }
 0x37e   : > { %v2269_v6 = vpop.f32.mrf.mxu2 }
 0x37f   : > { %v2441_v57 = vsel %vm1070_vm1, %v2269_v6, -inf  ;;  %v2064_v60 = vpop.f32.mrf.mxu1 }
 0x380   : > { %v2442_v53 = vmax.f32 %v2440_v23, %v2441_v57  ;;  %2207 = vrot.lane.b32.xlu0 %v2137_v63, %s5716_s24  ;;  %2197 = vrot.lane.b32.xlu1 %v2064_v60, %s5716_s24 }
 0x382   : > { %v2443_v0 = vrot.slane %v2442_v53, 4  ;;  %v2139_v61 = vpop.f32.mrf.mxu0 }
 0x384   : > { %v2444_v62 = vmax.f32 %v2442_v53, %v2443_v0  ;;  %v6550_v44 = vpop.f32.mrf.mxu3 }
 0x385   : > { %v2449_v29 = vsel %vm1070_vm1, %v6550_v44, -inf }
 0x386   : > { %v2445_v38 = vrot.slane %v2444_v62, 2  ;;  %v6552_v27 = vpop.f32.mrf.mxu2 }
 0x387   : > { %v2476_v30 = vsel %vm1070_vm1, %v6552_v27, -inf }
 0x388   : > { %v2446_v20 = vmax.f32 %v2444_v62, %v2445_v38  ;;  %2205 = vrot.lane.b32.xlu0 %v2114_v28, %s5716_s24  ;;  %v6600_v62 = vpop.permute.xlu2 %3123 }
 0x38a   : > { %v2447_v34 = vrot.slane %v2446_v20, 1  ;;  %v2162_v8 = vpop.f32.mrf.mxu1  ;;  %v6559_v48 = vpop.f32.mrf.mxu0 }
 0x38b   : > { %v2458_v2 = vsel %vm1070_vm1, %v6559_v48, -inf }
 0x38c   : > { %v2448_v14 = vmax.f32 %v2446_v20, %v2447_v34  ;;  %v2293_v1 = vpop.f32.mrf.mxu3 }
 0x38d   : > { %v2450_v59 = vsel %vm1070_vm1, %v2293_v1, -inf }
 0x38e   : > { %v2512_v9 = vsub.f32 %v2267_v26, %v2448_v14  ;;  %v2513_v3 = vsub.f32 %v2269_v6, %v2448_v14  ;;  %v2451_v25 = vmax.f32 %v2449_v29, %v2450_v59  ;;  %v2365_v52 = vpop.f32.mrf.mxu2  ;;  %v6595_v6 = vpop.permute.xlu0 %3049 }
 0x38f   : > { %v2477_v13 = vsel %vm1070_vm1, %v2365_v52, -inf }
 0x390   : > { %v2528_v11 = vmul.f32 1.442695, %v2512_v9  ;;  %v2530_v50 = vmul.f32 1.442695, %v2513_v3  ;;  %v2452_v7 = vrot.slane %v2451_v25, 4  ;;  %v2478_v46 = vmax.f32 %v2476_v30, %v2477_v13  ;;  %2209 = vrot.lane.b32.xlu0 %v2139_v61, %s5716_s24  ;;  %v6608_v30 = vpop.permute.xlu1 %3075 }
 0x392   : > { %5331 = vpow2.f32 %v2528_v11  ;;  %v2453_v35 = vmax.f32 %v2451_v25, %v2452_v7  ;;  %v2479_v12 = vrot.slane %v2478_v46, 4  ;;  %v2164_v45 = vpop.f32.mrf.mxu1  ;;  %v6570_v56 = vpop.f32.mrf.mxu0 }
 0x393   : > { %5333 = vpow2.f32 %v2530_v50  ;;  %v2459_v17 = vsel %vm1070_vm1, %v6570_v56, -inf }
 0x394   : > { %v2454_v54 = vrot.slane %v2453_v35, 2  ;;  %v2480_v4 = vmax.f32 %v2478_v46, %v2479_v12  ;;  %v2460_v18 = vmax.f32 %v2458_v2, %v2459_v17  ;;  %v6578_v58 = vpop.f32.mrf.mxu3 }
 0x395   : > { %v2485_v20 = vsel %vm1070_vm1, %v6578_v58, -inf }
 0x396   : > { %v2455_v49 = vmax.f32 %v2453_v35, %v2454_v54  ;;  %v2481_v51 = vrot.slane %v2480_v4, 2  ;;  %v2461_v36 = vrot.slane %v2460_v18, 4 }
 0x398   : > { %v6582_v31 = vpop.eup %5331  ;;  %v2456_v43 = vrot.slane %v2455_v49, 1  ;;  %v2482_v32 = vmax.f32 %v2480_v4, %v2481_v51  ;;  %v2462_v16 = vmax.f32 %v2460_v18, %v2461_v36  ;;  %2211 = vrot.lane.b32.xlu0 %v2162_v8, %s5716_s24  ;;  %v6624_v4 = vpop.permute.xlu0 %3099 }
 0x399   : > { %v6585_v15 = vpop.eup %5333  ;;  %v2560_v10 = vsel %vm1070_vm1, %v6582_v31, 0.0 }
 0x39a   : > { %v2561_v40 = vsel %vm1070_vm1, %v6585_v15, 0.0  ;;  %v2457_v5 = vmax.f32 %v2455_v49, %v2456_v43  ;;  %v2483_v26 = vrot.slane %v2482_v32, 1  ;;  %v2463_v47 = vrot.slane %v2462_v16, 2  ;;  %v6591_v63 = vpop.f32.mrf.mxu1  ;;  %v6593_v28 = vpop.f32.mrf.mxu0 }
 0x39b   : > { %v2562_v23 = vadd.f32 %v2561_v40, %v2560_v10  ;;  %v2467_v7 = vsel %vm1070_vm1, %v6591_v63, -inf }
 0x39c   : > { %v2514_v57 = vsub.f32 %v6550_v44, %v2457_v5  ;;  %v2515_v60 = vsub.f32 %v2293_v1, %v2457_v5  ;;  %v2484_v53 = vmax.f32 %v2482_v32, %v2483_v26  ;;  %v2464_v0 = vmax.f32 %v2462_v16, %v2463_v47  ;;  %v6598_v61 = vpop.f32.mrf.mxu3  ;;  %v6630_v16 = vpop.permute.xlu2 %3407 }
 0x39d   : > { %v2563_v38 = vrot.slane %v2562_v23, 4  ;;  %v2486_v34 = vsel %vm1070_vm1, %v6598_v61, -inf }
 0x39e   : > { %v2532_v8 = vmul.f32 1.442695, %v2514_v57  ;;  %v2534_v14 = vmul.f32 1.442695, %v2515_v60  ;;  %v2520_v29 = vsub.f32 %v6552_v27, %v2484_v53  ;;  %v2521_v59 = vsub.f32 %v2365_v52, %v2484_v53 }
 0x39f   : > { %v2564_v44 = vadd.f32 %v2563_v38, %v2562_v23  ;;  %v2465_v1 = vrot.slane %v2464_v0, 1  ;;  %v2487_v9 = vmax.f32 %v2485_v20, %v2486_v34 }
 0x3a0   : > { %5335 = vpow2.f32 %v2532_v8  ;;  %v2544_v3 = vmul.f32 1.442695, %v2520_v29  ;;  %v2546_v25 = vmul.f32 1.442695, %v2521_v59  ;;  %2213 = vrot.lane.b32.xlu0 %v2164_v45, %s5716_s24  ;;  %v2494_v45 = vsel %vm1070_vm1, %v6593_v28, -inf  ;;  %s7504_s24 = scalar_lea.vmem [#allocation11], %s4845_s4 }
 0x3a1   : > { %v2565_v13 = vrot.slane %v2564_v44, 2  ;;  %5337 = vpow2.f32 %v2534_v14  ;;  %v2466_v11 = vmax.f32 %v2464_v0, %v2465_v1  ;;  %v2488_v50 = vrot.slane %v2487_v9, 4  ;;  %v6646_v1 = vpop.permute.xlu1 %3097  ;;  %s5123_s4 = sshll.u32 %s5796_s17, 7  ;;  %s4729_s25 = sshll.u32 %s7504_s24, 4  ;;  %s4730_s25 = int_to_ptr.vmem [resolvable:$true] %s4729_s25 }
 0x3a2   : > { %5339 = vpow2.f32 %v2544_v3  ;;  %v6612_v27 = vpop.f32.mrf.mxu1  ;;  %v6614_v52 = vpop.f32.mrf.mxu0  ;;  %s4728_s18 = scalar_lea.hbm %s7635_s10, %s5123_s4 }
 0x3a3   : > { %v2566_v46 = vadd.f32 %v2565_v13, %v2564_v44  ;;  %5341 = vpow2.f32 %v2546_v25  ;;  %v2516_v35 = vsub.f32 %v6559_v48, %v2466_v11  ;;  %v2517_v12 = vsub.f32 %v6570_v56, %v2466_v11  ;;  %s4731_s17 = sshll.u32 %s4728_s18, 4  ;;  %s4732_s17 = int_to_ptr.hbm [resolvable:$true] %s4731_s17 }
 0x3a4   : > { %v2489_v2 = vmax.f32 %v2487_v9, %v2488_v50  ;;  %v2468_v17 = vsel %vm1070_vm1, %v6612_v27, -inf  ;;  %v2495_v54 = vsel %vm1070_vm1, %v6614_v52, -inf  ;;  %s5643_s29 = sshra.s32 %s4732_s17, 4  ;;  %s5644_s29 = int_to_ptr.hbm [resolvable:$true] %s5643_s29 }
 0x3a5   : > { %v2567_v18 = vrot.slane %v2566_v46, 1  ;;  %v2536_v49 = vmul.f32 1.442695, %v2516_v35  ;;  %v2538_v51 = vmul.f32 1.442695, %v2517_v12  ;;  %v2469_v36 = vmax.f32 %v2467_v7, %v2468_v17  ;;  %s5645_s27 = scalar_lea.hbm %s5644_s29, 128  ;;  %p5650_p11 = scmp.lt.s32.totalorder %s5644_s29, %s7635_s10 }
 0x3a6   : > { %v6626_v43 = vpop.eup %5335  ;;  %v2490_v48 = vrot.slane %v2489_v2, 2  ;;  %v2496_v56 = vmax.f32 %v2494_v45, %v2495_v54  ;;  %v6658_v54 = vpop.permute.xlu0 %3121  ;;  %p5646_p1 = scmp.ne.s32.totalorder %s5644_s29, %s5645_s27 }
 0x3a7   : > { %v6628_v32 = vpop.eup %5337  ;;  %v2568_v10 = vadd.f32 %v2567_v18, %v2566_v46  ;;  %v2569_v40 = vsel %vm1070_vm1, %v6626_v43, 0.0  ;;  %5343 = vpow2.f32 %v2536_v49  ;;  %v2470_v5 = vrot.slane %v2469_v36, 4 }
 0x3a8   : > { %v6634_v26 = vpop.eup %5339  ;;  %v2570_v47 = vsel %vm1070_vm1, %v6628_v32, 0.0  ;;  %5345 = vpow2.f32 %v2538_v51  ;;  %v2491_v23 = vmax.f32 %v2489_v2, %v2490_v48  ;;  %v2497_v57 = vrot.slane %v2496_v56, 4  ;;  %p5647_p4 = pnand %p5646_p1, %p5858_p7 }
 0x3a9   : > { %v6638_v60 = vpop.eup %5341  ;;  %5347 = vrcp.f32 %v2568_v10  ;;  %v2571_v53 = vadd.f32 %v2570_v47, %v2569_v40  ;;  %v2596_v0 = vsel %vm1070_vm1, %v6634_v26, 0.0  ;;  %v2471_v38 = vmax.f32 %v2469_v36, %v2470_v5  ;;  %v6664_v5 = vpop.permute.xlu2 %3482 }
 0x3aa   : > { %v2597_v20 = vsel %vm1070_vm1, %v6638_v60, 0.0  ;;  %v2492_v34 = vrot.slane %v2491_v23, 1  ;;  %v2498_v8 = vmax.f32 %v2496_v56, %v2497_v57  ;;  %v6644_v14 = vpop.f32.mrf.mxu1  ;;  %p5648_p8 = pneg %p5647_p4 }
 0x3ab   : > { %v2572_v29 = vrot.slane %v2571_v53, 4  ;;  %v2598_v59 = vadd.f32 %v2597_v20, %v2596_v0  ;;  %v2472_v44 = vrot.slane %v2471_v38, 2  ;;  %v2503_v7 = vsel %vm1070_vm1, %v6644_v14, -inf }
 0x3ac   : > { %v2493_v9 = vmax.f32 %v2491_v23, %v2492_v34  ;;  %v2499_v3 = vrot.slane %v2498_v8, 2 }
 0x3ad   : > { %v6648_v25 = vpop.eup %5343  ;;  %v2573_v13 = vadd.f32 %v2572_v29, %v2571_v53  ;;  %v2599_v11 = vrot.slane %v2598_v59, 4  ;;  %v2473_v50 = vmax.f32 %v2471_v38, %v2472_v44 }
 0x3ae   : > { %v6652_v46 = vpop.eup %5345  ;;  %v2578_v35 = vsel %vm1070_vm1, %v6648_v25, 0.0  ;;  %v2522_v12 = vsub.f32 %v6578_v58, %v2493_v9  ;;  %v2523_v45 = vsub.f32 %v6598_v61, %v2493_v9  ;;  %v2500_v2 = vmax.f32 %v2498_v8, %v2499_v3 }
 0x3af   : > { %v5348_v17 = vpop.eup %5347  ;;  %v2574_v18 = vrot.slane %v2573_v13, 2  ;;  %v2600_v49 = vadd.f32 %v2599_v11, %v2598_v59  ;;  %v2579_v51 = vsel %vm1070_vm1, %v6652_v46, 0.0  ;;  %v2474_v36 = vrot.slane %v2473_v50, 1  ;;  %v6670_v11 = vpop.permute.xlu1 %3382 }
 0x3b0   : > { %v2640_v48 = vmul.f32 %v5348_v17, %v6582_v31  ;;  %v2641_v56 = vmul.f32 %v5348_v17, %v6585_v15  ;;  %v2580_v10 = vadd.f32 %v2579_v51, %v2578_v35  ;;  %v2548_v40 = vmul.f32 1.442695, %v2522_v12 }
 0x3b1   : > { %v2575_v58 = vadd.f32 %v2574_v18, %v2573_v13  ;;  %v2601_v61 = vrot.slane %v2600_v49, 2  ;;  %v2550_v47 = vmul.f32 1.442695, %v2523_v45  ;;  %v2475_v23 = vmax.f32 %v2473_v50, %v2474_v36 }
 0x3b2   : > { %v2656_v57 = vpack.c.bf16 %v2640_v48, %v2640_v48  ;;  %v2657_v53 = vpack.c.bf16 %v2641_v56, %v2641_v56  ;;  %v2581_v0 = vrot.slane %v2580_v10, 4  ;;  %5349 = vpow2.f32 %v2548_v40  ;;  %v6667_v31 = vpop.f32.mrf.mxu1  ;;  %v6683_v56 = vpop.permute.xlu2 %3557 }
 0x3b3   : > { %v2576_v38 = vrot.slane %v2575_v58, 1  ;;  %v2602_v20 = vadd.f32 %v2601_v61, %v2600_v49  ;;  %5351 = vpow2.f32 %v2550_v47  ;;  %v2518_v34 = vsub.f32 %v6591_v63, %v2475_v23  ;;  %v6674_v63 = vpop.permute.xlu0 %3432 }
 0x3b4   : > { %v2674_v15 = vunpack.c.l.b16 %v2656_v57  ;;  %v2675_v8 = vunpack.c.l.b16 %v2657_v53  ;;  %v2582_v29 = vadd.f32 %v2581_v0, %v2580_v10  ;;  %v2519_v59 = vsub.f32 %v6612_v27, %v2475_v23 }
 0x3b5   : > { %v2577_v44 = vadd.f32 %v2576_v38, %v2575_v58  ;;  %v2603_v9 = vrot.slane %v2602_v20, 1  ;;  %v2540_v3 = vmul.f32 1.442695, %v2518_v34  ;;  %v2501_v13 = vrot.slane %v2500_v2, 1 }
 0x3b6   : > { %v2676_v50 = vpack.c.b16 %v2675_v8, %v2674_v15  ;;  %v2583_v35 = vrot.slane %v2582_v29, 2  ;;  %v2542_v12 = vmul.f32 1.442695, %v2519_v59  ;;  %v2504_v45 = vsel %vm1070_vm1, %v6667_v31, -inf }
 0x3b7   : > { %5353 = vrcp.f32 %v2577_v44  ;;  %v2604_v17 = vadd.f32 %v2603_v9, %v2602_v20  ;;  %v2502_v18 = vmax.f32 %v2500_v2, %v2501_v13  ;;  %v2505_v49 = vmax.f32 %v2503_v7, %v2504_v45  ;;  %v6699_v44 = vpop.permute.xlu1 %3457 }
 0x3b8   : > { %v6676_v51 = vpop.eup %5349  ;;  %v2961_v27 = vsel %vm839_vm0, %v6515_v55, 0  ;;  %v2584_v36 = vadd.f32 %v2583_v35, %v2582_v29  ;;  %5355 = vpow2.f32 %v2540_v3  ;;  %4986 = vmatmul.msk.bf16.vlgmr.msra.gmra.mxu2 %vm1070_vm1, %v2676_v50 }
 0x3b9   : > { %v6681_v48 = vpop.eup %5351  ;;  %5357 = vrcp.f32 %v2604_v17  ;;  %v2605_v10 = vsel %vm1070_vm1, %v6676_v51, 0.0  ;;  %v2524_v2 = vsub.f32 %v6593_v28, %v2502_v18  ;;  %v2525_v7 = vsub.f32 %v6614_v52, %v2502_v18  ;;  %2970 = vmatpush.bf16.xpose.msra.mxu2 %v2961_v27 }
 0x3ba   : > { %v2585_v40 = vrot.slane %v2584_v36, 1  ;;  %v2606_v55 = vsel %vm1070_vm1, %v6681_v48, 0.0  ;;  %5359 = vpow2.f32 %v2542_v12  ;;  %v2506_v58 = vrot.slane %v2505_v49, 4 }
 0x3bb   : > { %v2607_v61 = vadd.f32 %v2606_v55, %v2605_v10  ;;  %v2552_v47 = vmul.f32 1.442695, %v2524_v2  ;;  %v2554_v23 = vmul.f32 1.442695, %v2525_v7 }
 0x3bc   : > { %v2586_v57 = vadd.f32 %v2585_v40, %v2584_v36  ;;  %v2507_v53 = vmax.f32 %v2505_v49, %v2506_v58 }
 0x3bd   : > { %v5354_v0 = vpop.eup %5353  ;;  %v2608_v38 = vrot.slane %v2607_v61, 4  ;;  %5361 = vpow2.f32 %v2552_v47 }
 0x3be   : > { %v6691_v20 = vpop.eup %5355  ;;  %v2642_v28 = vmul.f32 %v5354_v0, %v6626_v43  ;;  %v2643_v52 = vmul.f32 %v5354_v0, %v6628_v32  ;;  %5363 = vrcp.f32 %v2586_v57  ;;  %v2508_v34 = vrot.slane %v2507_v53, 2  ;;  %v6703_v32 = vpop.permute.xlu0 %3507 }
 0x3bf   : > { %v5358_v15 = vpop.eup %5357  ;;  %v2609_v8 = vadd.f32 %v2608_v38, %v2607_v61  ;;  %v2587_v29 = vsel %vm1070_vm1, %v6691_v20, 0.0  ;;  %5365 = vpow2.f32 %v2554_v23  ;;  %v2985_v0 = vsel %vm839_vm0, %v6523_v41, 0 }
 0x3c0   : > { %v6697_v59 = vpop.eup %5359  ;;  %v2658_v9 = vpack.c.bf16 %v2642_v28, %v2642_v28  ;;  %v2659_v3 = vpack.c.bf16 %v2643_v52, %v2643_v52  ;;  %v2648_v13 = vmul.f32 %v5358_v15, %v6634_v26  ;;  %v2649_v43 = vmul.f32 %v5358_v15, %v6638_v60 }
 0x3c1   : > { %v2610_v50 = vrot.slane %v2609_v8, 2  ;;  %v2588_v35 = vsel %vm1070_vm1, %v6697_v59, 0.0  ;;  %v2509_v12 = vmax.f32 %v2507_v53, %v2508_v34  ;;  %v2200_v45 = vpop.permute.xlu2 %2199 }
 0x3c2   : > { %v2699_v17 = vunpack.c.l.b16 %v2658_v9  ;;  %v2700_v18 = vunpack.c.l.b16 %v2659_v3  ;;  %v2664_v49 = vpack.c.bf16 %v2648_v13, %v2648_v13  ;;  %v2665_v27 = vpack.c.bf16 %v2649_v43, %v2649_v43  ;;  %2240 = vst.msk [vmem:[#allocation2 + $0x40] sm:$0xff] %vm2231_vm2, %v2200_v45 }
 0x3c3   : > { %v6708_v36 = vpop.eup %5361  ;;  %v2611_v10 = vadd.f32 %v2610_v50, %v2609_v8  ;;  %v2589_v26 = vadd.f32 %v2588_v35, %v2587_v29  ;;  %v2510_v2 = vrot.slane %v2509_v12, 1 }
 0x3c4   : > { %v5364_v60 = vpop.eup %5363  ;;  %v2701_v7 = vpack.c.b16 %v2700_v18, %v2699_v17  ;;  %v2774_v40 = vunpack.c.l.b16 %v2664_v49  ;;  %v2775_v55 = vunpack.c.l.b16 %v2665_v27  ;;  %v2614_v58 = vsel %vm1070_vm1, %v6708_v36, 0.0 }
 0x3c5   : > { %v6712_v61 = vpop.eup %5365  ;;  %v2644_v47 = vmul.f32 %v5364_v60, %v6648_v25  ;;  %v2645_v23 = vmul.f32 %v5364_v60, %v6652_v46  ;;  %v2612_v57 = vrot.slane %v2611_v10, 1  ;;  %v2590_v53 = vrot.slane %v2589_v26, 4  ;;  %v6723_v46 = vpop.permute.xlu1 %3532 }
 0x3c6   : > { %v2776_v38 = vpack.c.b16 %v2775_v55, %v2774_v40  ;;  %v2615_v28 = vsel %vm1070_vm1, %v6712_v61, 0.0  ;;  %v2511_v52 = vmax.f32 %v2509_v12, %v2510_v2  ;;  %4987 = vmatmul.msk.bf16.vlgmr.msrb.gmra.mxu3 %vm1070_vm1, %v2701_v7  ;;  %v3057_v25 = vsel %vm839_vm0, %v6580_v19, 0 }
 0x3c7   : > { %v2660_v34 = vpack.c.bf16 %v2644_v47, %v2644_v47  ;;  %v2661_v15 = vpack.c.bf16 %v2645_v23, %v2645_v23  ;;  %v2613_v8 = vadd.f32 %v2612_v57, %v2611_v10  ;;  %v2591_v29 = vadd.f32 %v2590_v53, %v2589_v26  ;;  %2994 = vmatpush.bf16.xpose.msrb.mxu3 %v2985_v0 }
 0x3c8   : > { %v2616_v9 = vadd.f32 %v2615_v28, %v2614_v58  ;;  %v2526_v41 = vsub.f32 %v6644_v14, %v2511_v52  ;;  %v2527_v3 = vsub.f32 %v6667_v31, %v2511_v52  ;;  %4990 = vmatmul.msk.bf16.vlgmr.msrb.gmra.mxu2 %vm1070_vm1, %v2776_v38  ;;  %v3009_v31 = vsel %vm839_vm0, %v6554_v21, 0 }
 0x3c9   : > { %v2724_v13 = vunpack.c.l.b16 %v2660_v34  ;;  %v2725_v43 = vunpack.c.l.b16 %v2661_v15  ;;  %5367 = vrcp.f32 %v2613_v8  ;;  %v2592_v50 = vrot.slane %v2591_v29, 2  ;;  %3066 = vmatpush.bf16.xpose.msrb.mxu2 %v3057_v25  ;;  %v2202_v35 = vpop.permute.xlu2 %2201  ;;  %v2184_v12 = vpop.permute.xlu0 %2183 }
 0x3ca   : > { %v2617_v45 = vrot.slane %v2616_v9, 4  ;;  %v2556_v17 = vmul.f32 1.442695, %v2526_v41  ;;  %v2558_v18 = vmul.f32 1.442695, %v2527_v3  ;;  %2241 = vst.msk [vmem:[#allocation2 + $0x48] sm:$0xff] %vm2231_vm2, %v2202_v35 }
 0x3cb   : > { %v2726_v19 = vpack.c.b16 %v2725_v43, %v2724_v13  ;;  %v2593_v49 = vadd.f32 %v2592_v50, %v2591_v29  ;;  %2232 = vst.msk [vmem:[#allocation2] sm:$0xff] %vm2231_vm2, %v2184_v12  ;;  %v3081_v25 = vsel %vm839_vm0, %v6608_v30, 0 }
 0x3cc   : > { %v2618_v14 = vadd.f32 %v2617_v45, %v2616_v9  ;;  %5369 = vpow2.f32 %v2556_v17 }
 0x3cd   : > { %v2594_v27 = vrot.slane %v2593_v49, 1  ;;  %5371 = vpow2.f32 %v2558_v18  ;;  %4988 = vmatmul.msk.bf16.vlgmr.msra.gmra.mxu0 %vm1070_vm1, %v2726_v19 }
 0x3ce   : > { %v2619_v10 = vrot.slane %v2618_v14, 2  ;;  %3018 = vmatpush.bf16.xpose.msra.mxu0 %v3009_v31 }
 0x3cf   : > { %v5368_v26 = vpop.eup %5367  ;;  %v2595_v2 = vadd.f32 %v2594_v27, %v2593_v49 }
 0x3d0   : > { %v2650_v60 = vmul.f32 %v5368_v26, %v6676_v51  ;;  %v2651_v7 = vmul.f32 %v5368_v26, %v6681_v48  ;;  %v2620_v40 = vadd.f32 %v2619_v10, %v2618_v14  ;;  %v3105_v10 = vsel %vm839_vm0, %v6624_v4, 0 }
 0x3d1   : > { %5373 = vrcp.f32 %v2595_v2  ;;  %v2186_v55 = vpop.permute.xlu1 %2185  ;;  %v2204_v58 = vpop.permute.xlu2 %2203 }
 0x3d2   : > { %v5370_v47 = vpop.eup %5369  ;;  %v2666_v23 = vpack.c.bf16 %v2650_v60, %v2650_v60  ;;  %v2667_v57 = vpack.c.bf16 %v2651_v7, %v2651_v7  ;;  %v2621_v21 = vrot.slane %v2620_v40, 1  ;;  %2233 = vst.msk [vmem:[#allocation2 + $0x8] sm:$0xff] %vm2231_vm2, %v2186_v55 }
 0x3d3   : > { %v5372_v53 = vpop.eup %5371  ;;  %v2623_v0 = vsel %vm1070_vm1, %v5370_v47, 0.0  ;;  %2242 = vst.msk [vmem:[#allocation2 + $0x50] sm:$0xff] %vm2231_vm2, %v2204_v58 }
 0x3d4   : > { %v2799_v38 = vunpack.c.l.b16 %v2666_v23  ;;  %v2800_v28 = vunpack.c.l.b16 %v2667_v57  ;;  %v2622_v51 = vadd.f32 %v2621_v21, %v2620_v40  ;;  %v2624_v48 = vsel %vm1070_vm1, %v5372_v53, 0.0 }
 0x3d5   : > { %v2625_v52 = vadd.f32 %v2624_v48, %v2623_v0 }
 0x3d6   : > { %v2801_v34 = vpack.c.b16 %v2800_v28, %v2799_v38  ;;  %5375 = vrcp.f32 %v2622_v51  ;;  %v2188_v15 = vpop.permute.xlu0 %2187 }
 0x3d7   : > { %v5374_v8 = vpop.eup %5373  ;;  %v2626_v29 = vrot.slane %v2625_v52, 4  ;;  %2234 = vst.msk [vmem:[#allocation2 + $0x10] sm:$0xff] %vm2231_vm2, %v2188_v15 }
 0x3d8   : > { %v2646_v9 = vmul.f32 %v5374_v8, %v6691_v20  ;;  %v2647_v41 = vmul.f32 %v5374_v8, %v6697_v59  ;;  %4991 = vmatmul.msk.bf16.vlgmr.msra.gmra.mxu3 %vm1070_vm1, %v2801_v34  ;;  %4994 = vmatmul.msk.bf16.vlgmr.msra.gmra.mxu2 %vm839_vm0, %v6537_v33 }
 0x3d9   : > { %v2627_v3 = vadd.f32 %v2626_v29, %v2625_v52  ;;  %3090 = vmatpush.bf16.xpose.msra.mxu3 %v3081_v25  ;;  %3395 = vmatpush.bf16.msra.mxu2 %v6670_v11  ;;  %v3033_v11 = vsel %vm839_vm0, %v6568_v22, 0 }
 0x3da   : > { %v2662_v13 = vpack.c.bf16 %v2646_v9, %v2646_v9  ;;  %v2663_v43 = vpack.c.bf16 %v2647_v41, %v2647_v41 }
 0x3db   : > { %v2628_v50 = vrot.slane %v2627_v3, 2 }
 0x3dc   : > { %v5376_v35 = vpop.eup %5375  ;;  %v2749_v12 = vunpack.c.l.b16 %v2662_v13  ;;  %v2750_v45 = vunpack.c.l.b16 %v2663_v43 }
 0x3dd   : > { %v2652_v30 = vmul.f32 %v5376_v35, %v6708_v36  ;;  %v2653_v20 = vmul.f32 %v5376_v35, %v6712_v61  ;;  %v2629_v59 = vadd.f32 %v2628_v50, %v2627_v3 }
 0x3de   : > { %v2751_v17 = vpack.c.b16 %v2750_v45, %v2749_v12  ;;  %v2192_v18 = vpop.permute.xlu0 %2191  ;;  %v2190_v19 = vpop.permute.xlu1 %2189 }
 0x3df   : > { %v2668_v49 = vpack.c.bf16 %v2652_v30, %v2652_v30  ;;  %v2669_v33 = vpack.c.bf16 %v2653_v20, %v2653_v20  ;;  %v2630_v14 = vrot.slane %v2629_v59, 1  ;;  %2236 = vst.msk [vmem:[#allocation2 + $0x20] sm:$0xff] %vm2231_vm2, %v2192_v18 }
 0x3e0   : > { %4989 = vmatmul.msk.bf16.vlgmr.msrb.gmra.mxu1 %vm1070_vm1, %v2751_v17  ;;  %2235 = vst.msk [vmem:[#allocation2 + $0x18] sm:$0xff] %vm2231_vm2, %v2190_v19 }
 0x3e1   : > { %v2824_v31 = vunpack.c.l.b16 %v2668_v49  ;;  %v2825_v36 = vunpack.c.l.b16 %v2669_v33  ;;  %v2631_v27 = vadd.f32 %v2630_v14, %v2629_v59  ;;  %3042 = vmatpush.bf16.xpose.msrb.mxu1 %v3033_v11 }
 0x3e3   : > { %v2826_v61 = vpack.c.b16 %v2825_v36, %v2824_v31  ;;  %5377 = vrcp.f32 %v2631_v27 }
 0x3e5   : > { %4992 = vmatmul.msk.bf16.vlgmr.msrb.gmra.mxu0 %vm1070_vm1, %v2826_v61 }
 0x3e6   : > { %3114 = vmatpush.bf16.xpose.msrb.mxu0 %v3105_v10  ;;  %v2194_v26 = vpop.permute.xlu1 %2193 }
 0x3e7   : > { %2237 = vst.msk [vmem:[#allocation2 + $0x28] sm:$0xff] %vm2231_vm2, %v2194_v26 }
 0x3e8   : > { %4995 = vmatmul.msk.bf16.vlgmr.msrb.gmra.mxu3 %vm839_vm0, %v6542_v39  ;;  %4998 = vmatmul.msk.bf16.vlgmr.msrb.gmra.mxu2 %vm839_vm0, %v6595_v6  ;;  %v3129_v39 = vsel %vm839_vm0, %v6600_v62, 0 }
 0x3e9   : > { %v5378_v22 = vpop.eup %5377  ;;  %3420 = vmatpush.bf16.msrb.mxu3 %v6630_v16  ;;  %3495 = vmatpush.bf16.msrb.mxu2 %v6664_v5 }
 0x3ea   : > { %v2654_v2 = vmul.f32 %v5378_v22, %v5370_v47  ;;  %v2655_v60 = vmul.f32 %v5378_v22, %v5372_v53  ;;  %v2196_v4 = vpop.permute.xlu0 %2195 }
 0x3eb   : > { %2238 = vst.msk [vmem:[#allocation2 + $0x30] sm:$0xff] %vm2231_vm2, %v2196_v4 }
 0x3ec   : > { %v2670_v7 = vpack.c.bf16 %v2654_v2, %v2654_v2  ;;  %v2671_v40 = vpack.c.bf16 %v2655_v60, %v2655_v60 }
 0x3ee   : > { %v2849_v55 = vunpack.c.l.b16 %v2670_v7  ;;  %v2850_v58 = vunpack.c.l.b16 %v2671_v40 }
 0x3f0   : > { %v2851_v23 = vpack.c.b16 %v2850_v58, %v2849_v55 }
 0x3f2   : > { %4993 = vmatmul.msk.bf16.vlgmr.msra.gmra.mxu1 %vm1070_vm1, %v2851_v23  ;;  %v2208_v6 = vpop.permute.xlu0 %2207  ;;  %v2198_v57 = vpop.permute.xlu1 %2197 }
 0x3f3   : > { %3138 = vmatpush.bf16.xpose.msra.mxu1 %v3129_v39  ;;  %2244 = vst.msk [vmem:[#allocation2 + $0x60] sm:$0xff] %vm2231_vm2, %v2208_v6 }
 0x3f4   : > { %2239 = vst.msk [vmem:[#allocation2 + $0x38] sm:$0xff] %vm2231_vm2, %v2198_v57 }
 0x3f5   : > { %4996 = vmatmul.msk.bf16.vlgmr.msra.gmra.mxu0 %vm839_vm0, %v6544_v42 }
 0x3f6   : > { %3445 = vmatpush.bf16.msra.mxu0 %v6674_v63 }
 0x3f8   : > { %4999 = vmatmul.msk.bf16.vlgmr.msra.gmra.mxu3 %vm839_vm0, %v6572_v37 }
 0x3f9   : > { %3520 = vmatpush.bf16.msra.mxu3 %v6703_v32 }
 0x3fa   : > { %v2206_v62 = vpop.permute.xlu0 %2205 }
 0x3fb   : > { %2243 = vst.msk [vmem:[#allocation2 + $0x58] sm:$0xff] %vm2231_vm2, %v2206_v62 }
 0x402   : > { %4997 = vmatmul.msk.bf16.vlgmr.msrb.gmra.mxu1 %vm839_vm0, %v6557_v24  ;;  %v2210_v16 = vpop.permute.xlu0 %2209 }
 0x403   : > { %3470 = vmatpush.bf16.msrb.mxu1 %v6699_v44  ;;  %2245 = vst.msk [vmem:[#allocation2 + $0x68] sm:$0xff] %vm2231_vm2, %v2210_v16 }
 0x405   : > { %5000 = vmatmul.msk.bf16.vlgmr.msrb.gmra.mxu0 %vm839_vm0, %v6646_v1 }
 0x406   : > { %3545 = vmatpush.bf16.msrb.mxu0 %v6723_v46 }
 0x40a   : > { %v2212_v42 = vpop.permute.xlu0 %2211 }
 0x40b   : > { %2246 = vst.msk [vmem:[#allocation2 + $0x70] sm:$0xff] %vm2231_vm2, %v2212_v42 }
 0x412   : > { %5001 = vmatmul.msk.bf16.vlgmr.msra.gmra.mxu1 %vm839_vm0, %v6658_v54  ;;  %v2214_v37 = vpop.permute.xlu0 %2213 }
 0x413   : > { %3570 = vmatpush.bf16.msra.mxu1 %v6683_v56  ;;  %2247 = vst.msk [vmem:[#allocation2 + $0x78] sm:$0xff] %vm2231_vm2, %v2214_v37 }
 0x43b   : > { %v2692_v24 = vpop.f32.mrf.mxu2 }
 0x43c   : > { %2888 = vrot.lane.b32.xlu2 %v2692_v24, %s5715_s19 }
 0x443   : > { %v2694_v5 = vpop.f32.mrf.mxu2 }
 0x444   : > { %2890 = vrot.lane.b32.xlu0 %v2694_v5, %s5715_s19 }
 0x449   : > { %v2717_v1 = vpop.f32.mrf.mxu3 }
 0x44a   : > { %v2742_v63 = vpop.f32.mrf.mxu0 }
 0x44b   : > { %2896 = vrot.lane.b32.xlu2 %v2742_v63, %s5715_s19  ;;  %v2792_v44 = vpop.f32.mrf.mxu2 }
 0x451   : > { %v2719_v32 = vpop.f32.mrf.mxu3 }
 0x452   : > { %v2744_v46 = vpop.f32.mrf.mxu0 }
 0x453   : > { %2892 = vrot.lane.b32.xlu2 %v2717_v1, %s5715_s19  ;;  %2898 = vrot.lane.b32.xlu0 %v2744_v46, %s5715_s19  ;;  %v2794_v54 = vpop.f32.mrf.mxu2 }
 0x45b   : > { %2904 = vrot.lane.b32.xlu2 %v2792_v44, %s5715_s19  ;;  %2894 = vrot.lane.b32.xlu0 %v2719_v32, %s5715_s19  ;;  %v2817_v56 = vpop.f32.mrf.mxu3  ;;  %v2972_v47 = vpop.f32.mrf.mxu2 }
 0x45c   : > { %2908 = vrot.lane.b32.xlu1 %v2817_v56, %s5715_s19  ;;  %v3145_v28 = vsel %vm1070_vm1, %v2972_v47, -inf }
 0x45d   : > { %v2767_v21 = vpop.f32.mrf.mxu1 }
 0x462   : > { %v2842_v53 = vpop.f32.mrf.mxu0 }
 0x463   : > { %2906 = vrot.lane.b32.xlu2 %v2794_v54, %s5715_s19  ;;  %2912 = vrot.lane.b32.xlu0 %v2842_v53, %s5715_s19  ;;  %v2819_v0 = vpop.f32.mrf.mxu3  ;;  %v2974_v38 = vpop.f32.mrf.mxu2 }
 0x464   : > { %v3146_v51 = vsel %vm1070_vm1, %v2974_v38, -inf }
 0x465   : > { %v2769_v48 = vpop.f32.mrf.mxu1  ;;  %v3147_v52 = vmax.f32 %v3145_v28, %v3146_v51 }
 0x467   : > { %v3148_v34 = vrot.slane %v3147_v52, 4 }
 0x469   : > { %v3149_v15 = vmax.f32 %v3147_v52, %v3148_v34 }
 0x46a   : > { %v2844_v8 = vpop.f32.mrf.mxu0 }
 0x46b   : > { %v3150_v29 = vrot.slane %v3149_v15, 2  ;;  %2900 = vrot.lane.b32.xlu2 %v2767_v21, %s5715_s19  ;;  %2902 = vrot.lane.b32.xlu0 %v2769_v48, %s5715_s19  ;;  %v2996_v25 = vpop.f32.mrf.mxu3  ;;  %v3068_v9 = vpop.f32.mrf.mxu2 }
 0x46c   : > { %v3154_v20 = vsel %vm1070_vm1, %v2996_v25, -inf  ;;  %v3181_v59 = vsel %vm1070_vm1, %v3068_v9, -inf }
 0x46d   : > { %v3151_v41 = vmax.f32 %v3149_v15, %v3150_v29 }
 0x46f   : > { %v3152_v3 = vrot.slane %v3151_v41, 1  ;;  %v6804_v13 = vpop.f32.mrf.mxu1 }
 0x471   : > { %v3153_v43 = vmax.f32 %v3151_v41, %v3152_v3 }
 0x472   : > { %v6806_v50 = vpop.f32.mrf.mxu0 }
 0x473   : > { %v3217_v35 = vsub.f32 %v2972_v47, %v3153_v43  ;;  %v3218_v12 = vsub.f32 %v2974_v38, %v3153_v43  ;;  %2910 = vrot.lane.b32.xlu2 %v2819_v0, %s5715_s19  ;;  %2914 = vrot.lane.b32.xlu0 %v2844_v8, %s5715_s19  ;;  %v2998_v45 = vpop.f32.mrf.mxu3  ;;  %v3070_v30 = vpop.f32.mrf.mxu2  ;;  %v3163_v26 = vsel %vm1070_vm1, %v6806_v50, -inf }
 0x474   : > { %v3155_v17 = vsel %vm1070_vm1, %v2998_v45, -inf  ;;  %v3182_v18 = vsel %vm1070_vm1, %v3070_v30, -inf }
 0x475   : > { %v3233_v19 = vmul.f32 1.442695, %v3217_v35  ;;  %v3235_v49 = vmul.f32 1.442695, %v3218_v12  ;;  %v3156_v33 = vmax.f32 %v3154_v20, %v3155_v17  ;;  %v3183_v14 = vmax.f32 %v3181_v59, %v3182_v18 }
 0x477   : > { %5379 = vpow2.f32 %v3233_v19  ;;  %v6814_v11 = vpop.f32.mrf.mxu1  ;;  %v3157_v31 = vrot.slane %v3156_v33, 4  ;;  %v3184_v36 = vrot.slane %v3183_v14, 4 }
 0x478   : > { %5381 = vpow2.f32 %v3235_v49 }
 0x479   : > { %v3158_v27 = vmax.f32 %v3156_v33, %v3157_v31  ;;  %v3185_v61 = vmax.f32 %v3183_v14, %v3184_v36 }
 0x47a   : > { %v3022_v10 = vpop.f32.mrf.mxu0 }
 0x47b   : > { %v3164_v22 = vsel %vm1070_vm1, %v3022_v10, -inf  ;;  %v3159_v2 = vrot.slane %v3158_v27, 2  ;;  %v3186_v60 = vrot.slane %v3185_v61, 2  ;;  %v6819_v4 = vpop.f32.mrf.mxu3 }
 0x47c   : > { %v3165_v7 = vmax.f32 %v3163_v26, %v3164_v22  ;;  %v3190_v38 = vsel %vm1070_vm1, %v6819_v4, -inf }
 0x47d   : > { %v6821_v40 = vpop.eup %5379  ;;  %v3160_v55 = vmax.f32 %v3158_v27, %v3159_v2  ;;  %v3187_v58 = vmax.f32 %v3185_v61, %v3186_v60 }
 0x47e   : > { %v6823_v23 = vpop.eup %5381  ;;  %v3265_v39 = vsel %vm1070_vm1, %v6821_v40, 0.0  ;;  %v3166_v6 = vrot.slane %v3165_v7, 4 }
 0x47f   : > { %v3266_v57 = vsel %vm1070_vm1, %v6823_v23, 0.0  ;;  %v3161_v62 = vrot.slane %v3160_v55, 1  ;;  %v3188_v16 = vrot.slane %v3187_v58, 1  ;;  %v6829_v42 = vpop.f32.mrf.mxu1 }
 0x480   : > { %v3267_v37 = vadd.f32 %v3266_v57, %v3265_v39  ;;  %v3167_v24 = vmax.f32 %v3165_v7, %v3166_v6 }
 0x481   : > { %v3162_v5 = vmax.f32 %v3160_v55, %v3161_v62  ;;  %v3189_v1 = vmax.f32 %v3187_v58, %v3188_v16 }
 0x482   : > { %v3268_v63 = vrot.slane %v3267_v37, 4  ;;  %v3168_v44 = vrot.slane %v3167_v24, 2  ;;  %v6831_v32 = vpop.f32.mrf.mxu0 }
 0x483   : > { %v3219_v46 = vsub.f32 %v2996_v25, %v3162_v5  ;;  %v3220_v54 = vsub.f32 %v2998_v45, %v3162_v5  ;;  %v3225_v56 = vsub.f32 %v3068_v9, %v3189_v1  ;;  %v3226_v47 = vsub.f32 %v3070_v30, %v3189_v1  ;;  %v6833_v21 = vpop.f32.mrf.mxu3 }
 0x484   : > { %v3269_v53 = vadd.f32 %v3268_v63, %v3267_v37  ;;  %v3169_v0 = vmax.f32 %v3167_v24, %v3168_v44  ;;  %v3191_v28 = vsel %vm1070_vm1, %v6833_v21, -inf  ;;  %v3172_v25 = vsel %vm1070_vm1, %v6829_v42, -inf }
 0x485   : > { %v3237_v51 = vmul.f32 1.442695, %v3219_v46  ;;  %v3239_v48 = vmul.f32 1.442695, %v3220_v54  ;;  %v3249_v52 = vmul.f32 1.442695, %v3225_v56  ;;  %v3192_v34 = vmax.f32 %v3190_v38, %v3191_v28 }
 0x486   : > { %v3270_v15 = vrot.slane %v3269_v53, 2  ;;  %v3170_v8 = vrot.slane %v3169_v0, 1  ;;  %v3251_v29 = vmul.f32 1.442695, %v3226_v47  ;;  %v3199_v18 = vsel %vm1070_vm1, %v6831_v32, -inf }
 0x487   : > { %5383 = vpow2.f32 %v3237_v51  ;;  %v6841_v9 = vpop.f32.mrf.mxu1  ;;  %v3193_v41 = vrot.slane %v3192_v34, 4 }
 0x488   : > { %v3271_v3 = vadd.f32 %v3270_v15, %v3269_v53  ;;  %v3171_v43 = vmax.f32 %v3169_v0, %v3170_v8  ;;  %5385 = vpow2.f32 %v3239_v48  ;;  %v3173_v35 = vsel %vm1070_vm1, %v6841_v9, -inf }
 0x489   : > { %5387 = vpow2.f32 %v3249_v52  ;;  %v3174_v12 = vmax.f32 %v3172_v25, %v3173_v35  ;;  %v3194_v45 = vmax.f32 %v3192_v34, %v3193_v41 }
 0x48a   : > { %v3272_v30 = vrot.slane %v3271_v3, 1  ;;  %v3221_v20 = vsub.f32 %v6806_v50, %v3171_v43  ;;  %v3222_v59 = vsub.f32 %v3022_v10, %v3171_v43  ;;  %5389 = vpow2.f32 %v3251_v29  ;;  %v6846_v17 = vpop.f32.mrf.mxu0 }
 0x48b   : > { %v3175_v19 = vrot.slane %v3174_v12, 4  ;;  %v3200_v49 = vsel %vm1070_vm1, %v6846_v17, -inf  ;;  %v3195_v33 = vrot.slane %v3194_v45, 2 }
 0x48c   : > { %v3273_v14 = vadd.f32 %v3272_v30, %v3271_v3  ;;  %v3241_v31 = vmul.f32 1.442695, %v3221_v20  ;;  %v3243_v36 = vmul.f32 1.442695, %v3222_v59  ;;  %v3201_v27 = vmax.f32 %v3199_v18, %v3200_v49 }
 0x48d   : > { %v6852_v61 = vpop.eup %5383  ;;  %v3176_v26 = vmax.f32 %v3174_v12, %v3175_v19  ;;  %v3196_v50 = vmax.f32 %v3194_v45, %v3195_v33 }
 0x48e   : > { %v6854_v10 = vpop.eup %5385  ;;  %5391 = vrcp.f32 %v3273_v14  ;;  %v3274_v22 = vsel %vm1070_vm1, %v6852_v61, 0.0  ;;  %v3202_v2 = vrot.slane %v3201_v27, 4 }
 0x48f   : > { %v6858_v60 = vpop.eup %5387  ;;  %5393 = vpow2.f32 %v3241_v31  ;;  %v3275_v7 = vsel %vm1070_vm1, %v6854_v10, 0.0  ;;  %v3177_v55 = vrot.slane %v3176_v26, 2  ;;  %v3197_v58 = vrot.slane %v3196_v50, 1  ;;  %v6866_v16 = vpop.f32.mrf.mxu1 }
 0x490   : > { %v6862_v39 = vpop.eup %5389  ;;  %5395 = vpow2.f32 %v3243_v36  ;;  %v3276_v6 = vadd.f32 %v3275_v7, %v3274_v22  ;;  %v3301_v57 = vsel %vm1070_vm1, %v6858_v60, 0.0  ;;  %v3203_v62 = vmax.f32 %v3201_v27, %v3202_v2 }
 0x491   : > { %v3302_v37 = vsel %vm1070_vm1, %v6862_v39, 0.0  ;;  %v3178_v24 = vmax.f32 %v3176_v26, %v3177_v55  ;;  %v3198_v5 = vmax.f32 %v3196_v50, %v3197_v58  ;;  %v3208_v56 = vsel %vm1070_vm1, %v6866_v16, -inf }
 0x492   : > { %v3277_v1 = vrot.slane %v3276_v6, 4  ;;  %v3303_v63 = vadd.f32 %v3302_v37, %v3301_v57  ;;  %v3204_v44 = vrot.slane %v3203_v62, 2 }
 0x493   : > { %v3179_v46 = vrot.slane %v3178_v24, 1  ;;  %v3227_v54 = vsub.f32 %v6819_v4, %v3198_v5  ;;  %v3228_v28 = vsub.f32 %v6833_v21, %v3198_v5 }
 0x494   : > { %v5392_v47 = vpop.eup %5391  ;;  %v3278_v53 = vadd.f32 %v3277_v1, %v3276_v6  ;;  %v3304_v0 = vrot.slane %v3303_v63, 4  ;;  %v3205_v38 = vmax.f32 %v3203_v62, %v3204_v44 }
 0x495   : > { %v6874_v51 = vpop.eup %5393  ;;  %v3345_v48 = vmul.f32 %v5392_v47, %v6821_v40  ;;  %v3346_v52 = vmul.f32 %v5392_v47, %v6823_v23  ;;  %v3180_v34 = vmax.f32 %v3178_v24, %v3179_v46  ;;  %v3253_v15 = vmul.f32 1.442695, %v3227_v54 }
 0x496   : > { %v6878_v8 = vpop.eup %5395  ;;  %v3283_v4 = vsel %vm1070_vm1, %v6874_v51, 0.0  ;;  %v3279_v29 = vrot.slane %v3278_v53, 2  ;;  %v3305_v25 = vadd.f32 %v3304_v0, %v3303_v63  ;;  %v3206_v41 = vrot.slane %v3205_v38, 1  ;;  %v2889_v3 = vpop.permute.xlu2 %2888 }
 0x497   : > { %v3361_v43 = vpack.c.bf16 %v3345_v48, %v3345_v48  ;;  %v3362_v35 = vpack.c.bf16 %v3346_v52, %v3346_v52  ;;  %v3284_v21 = vsel %vm1070_vm1, %v6878_v8, 0.0  ;;  %v3223_v40 = vsub.f32 %v6829_v42, %v3180_v34  ;;  %2937 = vst.msk [vmem:[#allocation2] sm:$0xff] %vm2936_vm3, %v2889_v3  ;;  %v6889_v26 = vpop.f32.mrf.mxu1 }
 0x498   : > { %v3285_v23 = vadd.f32 %v3284_v21, %v3283_v4  ;;  %v3280_v12 = vadd.f32 %v3279_v29, %v3278_v53  ;;  %v3306_v45 = vrot.slane %v3305_v25, 2  ;;  %v3224_v30 = vsub.f32 %v6841_v9, %v3180_v34 }
 0x499   : > { %v3379_v20 = vunpack.c.l.b16 %v3361_v43  ;;  %v3380_v59 = vunpack.c.l.b16 %v3362_v35  ;;  %v3245_v18 = vmul.f32 1.442695, %v3223_v40  ;;  %v3207_v19 = vmax.f32 %v3205_v38, %v3206_v41 }
 0x49a   : > { %v3286_v49 = vrot.slane %v3285_v23, 4  ;;  %v3281_v33 = vrot.slane %v3280_v12, 1  ;;  %v3307_v14 = vadd.f32 %v3306_v45, %v3305_v25  ;;  %v3247_v31 = vmul.f32 1.442695, %v3224_v30 }
 0x49b   : > { %v3381_v36 = vpack.c.b16 %v3380_v59, %v3379_v20  ;;  %5397 = vpow2.f32 %v3245_v18  ;;  %v3229_v27 = vsub.f32 %v6831_v32, %v3207_v19  ;;  %v3230_v42 = vsub.f32 %v6846_v17, %v3207_v19 }
 0x49c   : > { %v3287_v50 = vadd.f32 %v3286_v49, %v3285_v23  ;;  %v3282_v22 = vadd.f32 %v3281_v33, %v3280_v12  ;;  %v3308_v2 = vrot.slane %v3307_v14, 1  ;;  %5399 = vpow2.f32 %v3247_v31 }
 0x49d   : > { %v3257_v9 = vmul.f32 1.442695, %v3229_v27  ;;  %v3259_v7 = vmul.f32 1.442695, %v3230_v42  ;;  %5401 = vpow2.f32 %v3253_v15  ;;  %v3255_v55 = vmul.f32 1.442695, %v3228_v28  ;;  %5002 = vmatmul.msk.bf16.vlgmr.msra.gmra.mxu2 %vm1070_vm1, %v3381_v36 }
 0x49e   : > { %v3288_v58 = vrot.slane %v3287_v50, 2  ;;  %5403 = vrcp.f32 %v3282_v22  ;;  %v3309_v6 = vadd.f32 %v3308_v2, %v3307_v14  ;;  %v3209_v32 = vsel %vm1070_vm1, %v6889_v26, -inf }
 0x49f   : > { %5405 = vpow2.f32 %v3257_v9  ;;  %v3210_v17 = vmax.f32 %v3208_v56, %v3209_v32 }
 0x4a0   : > { %v3289_v57 = vadd.f32 %v3288_v58, %v3287_v50  ;;  %5407 = vrcp.f32 %v3309_v6 }
 0x4a1   : > { %v6894_v62 = vpop.eup %5397  ;;  %5409 = vpow2.f32 %v3259_v7  ;;  %v3211_v37 = vrot.slane %v3210_v17, 4 }
 0x4a2   : > { %v6896_v24 = vpop.eup %5399  ;;  %v3290_v5 = vrot.slane %v3289_v57, 1  ;;  %v3292_v1 = vsel %vm1070_vm1, %v6894_v62, 0.0  ;;  %5411 = vpow2.f32 %v3255_v55 }
 0x4a3   : > { %v6900_v63 = vpop.eup %5401  ;;  %v3293_v44 = vsel %vm1070_vm1, %v6896_v24, 0.0  ;;  %v3212_v46 = vmax.f32 %v3210_v17, %v3211_v37 }
 0x4a4   : > { %v5404_v54 = vpop.eup %5403  ;;  %v3291_v56 = vadd.f32 %v3290_v5, %v3289_v57  ;;  %v3294_v47 = vadd.f32 %v3293_v44, %v3292_v1  ;;  %v3310_v35 = vsel %vm1070_vm1, %v6900_v63, 0.0 }
 0x4a5   : > { %v6904_v53 = vpop.eup %5405  ;;  %v3347_v0 = vmul.f32 %v5404_v54, %v6852_v61  ;;  %v3348_v38 = vmul.f32 %v5404_v54, %v6854_v10  ;;  %v3213_v28 = vrot.slane %v3212_v46, 2  ;;  %v2897_v48 = vpop.permute.xlu2 %2896 }
 0x4a6   : > { %v5408_v52 = vpop.eup %5407  ;;  %5413 = vrcp.f32 %v3291_v56  ;;  %v3295_v34 = vrot.slane %v3294_v47, 4  ;;  %v3319_v15 = vsel %vm1070_vm1, %v6904_v53, 0.0  ;;  %2941 = vst.msk [vmem:[#allocation2 + $0x20] sm:$0xff] %vm2936_vm3, %v2897_v48 }
 0x4a7   : > { %v6911_v4 = vpop.eup %5409  ;;  %v3363_v29 = vpack.c.bf16 %v3347_v0, %v3347_v0  ;;  %v3364_v25 = vpack.c.bf16 %v3348_v38, %v3348_v38  ;;  %v3353_v41 = vmul.f32 %v5408_v52, %v6858_v60  ;;  %v3354_v61 = vmul.f32 %v5408_v52, %v6862_v39 }
 0x4a8   : > { %v6915_v3 = vpop.eup %5411  ;;  %v3296_v10 = vadd.f32 %v3295_v34, %v3294_v47  ;;  %v3320_v43 = vsel %vm1070_vm1, %v6911_v4, 0.0  ;;  %v3214_v21 = vmax.f32 %v3212_v46, %v3213_v28 }
 0x4a9   : > { %v3404_v40 = vunpack.c.l.b16 %v3363_v29  ;;  %v3405_v23 = vunpack.c.l.b16 %v3364_v25  ;;  %v3369_v12 = vpack.c.bf16 %v3353_v41, %v3353_v41  ;;  %v3370_v45 = vpack.c.bf16 %v3354_v61, %v3354_v61 }
 0x4aa   : > { %v3297_v30 = vrot.slane %v3296_v10, 2  ;;  %v3321_v20 = vadd.f32 %v3320_v43, %v3319_v15  ;;  %v3311_v60 = vsel %vm1070_vm1, %v6915_v3, 0.0  ;;  %v3215_v39 = vrot.slane %v3214_v21, 1 }
 0x4ab   : > { %v3406_v59 = vpack.c.b16 %v3405_v23, %v3404_v40  ;;  %v3479_v18 = vunpack.c.l.b16 %v3369_v12  ;;  %v3480_v19 = vunpack.c.l.b16 %v3370_v45  ;;  %v3312_v49 = vadd.f32 %v3311_v60, %v3310_v35 }
 0x4ac   : > { %v5414_v33 = vpop.eup %5413  ;;  %v3298_v14 = vadd.f32 %v3297_v30, %v3296_v10  ;;  %v3322_v31 = vrot.slane %v3321_v20, 4  ;;  %v3216_v36 = vmax.f32 %v3214_v21, %v3215_v39 }
 0x4ad   : > { %v3349_v27 = vmul.f32 %v5414_v33, %v6874_v51  ;;  %v3350_v42 = vmul.f32 %v5414_v33, %v6878_v8  ;;  %v3481_v50 = vpack.c.b16 %v3480_v19, %v3479_v18  ;;  %v3313_v22 = vrot.slane %v3312_v49, 4  ;;  %v2893_v2 = vpop.permute.xlu2 %2892  ;;  %5003 = vmatmul.msk.bf16.vlgmr.msrb.gmra.mxu3 %vm1070_vm1, %v3406_v59 }
 0x4ae   : > { %v3299_v9 = vrot.slane %v3298_v14, 1  ;;  %v3323_v7 = vadd.f32 %v3322_v31, %v3321_v20  ;;  %v3231_v55 = vsub.f32 %v6866_v16, %v3216_v36  ;;  %v3232_v58 = vsub.f32 %v6889_v26, %v3216_v36  ;;  %2939 = vst.msk [vmem:[#allocation2 + $0x10] sm:$0xff] %vm2936_vm3, %v2893_v2 }
 0x4af   : > { %v3365_v6 = vpack.c.bf16 %v3349_v27, %v3349_v27  ;;  %v3366_v32 = vpack.c.bf16 %v3350_v42, %v3350_v42  ;;  %v3314_v17 = vadd.f32 %v3313_v22, %v3312_v49  ;;  %5006 = vmatmul.msk.bf16.vlgmr.msrb.gmra.mxu2 %vm1070_vm1, %v3481_v50 }
 0x4b0   : > { %v3300_v51 = vadd.f32 %v3299_v9, %v3298_v14  ;;  %v3324_v8 = vrot.slane %v3323_v7, 2  ;;  %v3261_v57 = vmul.f32 1.442695, %v3231_v55  ;;  %v3263_v37 = vmul.f32 1.442695, %v3232_v58 }
 0x4b1   : > { %v3429_v5 = vunpack.c.l.b16 %v3365_v6  ;;  %v3430_v1 = vunpack.c.l.b16 %v3366_v32  ;;  %v3315_v44 = vrot.slane %v3314_v17, 2 }
 0x4b2   : > { %5415 = vrcp.f32 %v3300_v51  ;;  %v3325_v46 = vadd.f32 %v3324_v8, %v3323_v7 }
 0x4b3   : > { %v3431_v54 = vpack.c.b16 %v3430_v1, %v3429_v5  ;;  %v3316_v16 = vadd.f32 %v3315_v44, %v3314_v17  ;;  %5417 = vpow2.f32 %v3261_v57 }
 0x4b4   : > { %v3326_v26 = vrot.slane %v3325_v46, 1  ;;  %5419 = vpow2.f32 %v3263_v37 }
 0x4b5   : > { %v3317_v56 = vrot.slane %v3316_v16, 1  ;;  %5004 = vmatmul.msk.bf16.vlgmr.msra.gmra.mxu0 %vm1070_vm1, %v3431_v54  ;;  %v2905_v47 = vpop.permute.xlu2 %2904 }
 0x4b6   : > { %v3327_v0 = vadd.f32 %v3326_v26, %v3325_v46  ;;  %2945 = vst.msk [vmem:[#allocation2 + $0x40] sm:$0xff] %vm2936_vm3, %v2905_v47  ;;  %v2891_v38 = vpop.permute.xlu0 %2890 }
 0x4b7   : > { %v3318_v28 = vadd.f32 %v3317_v56, %v3316_v16  ;;  %2938 = vst.msk [vmem:[#allocation2 + $0x8] sm:$0xff] %vm2936_vm3, %v2891_v38 }
 0x4b8   : > { %v5416_v48 = vpop.eup %5415  ;;  %5421 = vrcp.f32 %v3327_v0 }
 0x4b9   : > { %v5418_v52 = vpop.eup %5417  ;;  %v3351_v34 = vmul.f32 %v5416_v48, %v6894_v62  ;;  %v3352_v15 = vmul.f32 %v5416_v48, %v6896_v24  ;;  %5423 = vrcp.f32 %v3318_v28 }
 0x4ba   : > { %v5420_v29 = vpop.eup %5419  ;;  %v3328_v25 = vsel %vm1070_vm1, %v5418_v52, 0.0 }
 0x4bb   : > { %v3367_v41 = vpack.c.bf16 %v3351_v34, %v3351_v34  ;;  %v3368_v61 = vpack.c.bf16 %v3352_v15, %v3352_v15  ;;  %v3329_v10 = vsel %vm1070_vm1, %v5420_v29, 0.0 }
 0x4bc   : > { %v3330_v43 = vadd.f32 %v3329_v10, %v3328_v25 }
 0x4bd   : > { %v3454_v35 = vunpack.c.l.b16 %v3367_v41  ;;  %v3455_v21 = vunpack.c.l.b16 %v3368_v61  ;;  %v2907_v40 = vpop.permute.xlu2 %2906  ;;  %v5493_v41 = vld [vmem:[%s5892_s22 + $0x8] sm:$0xff] }
 0x4be   : > { %v5422_v23 = vpop.eup %5421  ;;  %v3331_v12 = vrot.slane %v3330_v43, 4  ;;  %2946 = vst.msk [vmem:[#allocation2 + $0x48] sm:$0xff] %vm2936_vm3, %v2907_v40 }
 0x4bf   : > { %v5424_v45 = vpop.eup %5423  ;;  %v3456_v62 = vpack.c.b16 %v3455_v21, %v3454_v35  ;;  %v3357_v24 = vmul.f32 %v5422_v23, %v6904_v53  ;;  %v3358_v30 = vmul.f32 %v5422_v23, %v6911_v4  ;;  %v5494_v21 = vld [vmem:[%s5892_s22] sm:$0xff] }
 0x4c0   : > { %v3355_v20 = vmul.f32 %v5424_v45, %v6900_v63  ;;  %v3356_v60 = vmul.f32 %v5424_v45, %v6915_v3  ;;  %v3332_v39 = vadd.f32 %v3331_v12, %v3330_v43 }
 0x4c1   : > { %v3373_v59 = vpack.c.bf16 %v3357_v24, %v3357_v24  ;;  %v3374_v18 = vpack.c.bf16 %v3358_v30, %v3358_v30  ;;  %5005 = vmatmul.msk.bf16.vlgmr.msrb.gmra.mxu1 %vm1070_vm1, %v3456_v62 }
 0x4c2   : > { %v3371_v19 = vpack.c.bf16 %v3355_v20, %v3355_v20  ;;  %v3372_v49 = vpack.c.bf16 %v3356_v60, %v3356_v60  ;;  %v3333_v33 = vrot.slane %v3332_v39, 2  ;;  %v5495_v20 = vld [vmem:[%s5892_s22 + $0x20] sm:$0xff] }
 0x4c3   : > { %v3529_v14 = vunpack.c.l.b16 %v3373_v59  ;;  %v3530_v31 = vunpack.c.l.b16 %v3374_v18 }
 0x4c4   : > { %v3504_v36 = vunpack.c.l.b16 %v3371_v19  ;;  %v3505_v27 = vunpack.c.l.b16 %v3372_v49  ;;  %v3334_v42 = vadd.f32 %v3333_v33, %v3332_v39  ;;  %v5496_v19 = vld [vmem:[%s5892_s22 + $0x10] sm:$0xff] }
 0x4c5   : > { %v3531_v53 = vpack.c.b16 %v3530_v31, %v3529_v14  ;;  %v2899_v50 = vpop.permute.xlu0 %2898  ;;  %v2901_v4 = vpop.permute.xlu2 %2900  ;;  %v5497_v31 = vld [vmem:[%s5892_s22 + $0x38] sm:$0xff] }
 0x4c6   : > { %v3506_v22 = vpack.c.b16 %v3505_v27, %v3504_v36  ;;  %v3335_v63 = vrot.slane %v3334_v42, 1  ;;  %2942 = vst.msk [vmem:[#allocation2 + $0x28] sm:$0xff] %vm2936_vm3, %v2899_v50  ;;  %v5498_v50 = vld [vmem:[%s5892_s22 + $0x28] sm:$0xff] }
 0x4c7   : > { %5008 = vmatmul.msk.bf16.vlgmr.msrb.gmra.mxu0 %vm1070_vm1, %v3531_v53  ;;  %2943 = vst.msk [vmem:[#allocation2 + $0x30] sm:$0xff] %vm2936_vm3, %v2901_v4 }
 0x4c8   : > { %v3336_v3 = vadd.f32 %v3335_v63, %v3334_v42  ;;  %5007 = vmatmul.msk.bf16.vlgmr.msra.gmra.mxu3 %vm1070_vm1, %v3506_v22  ;;  %v5499_v63 = vld [vmem:[%s5892_s22 + $0x18] sm:$0xff] }
 0x4ca   : > { %5425 = vrcp.f32 %v3336_v3 }
 0x4cd   : > { %v2895_v2 = vpop.permute.xlu0 %2894  ;;  %v2911_v9 = vpop.permute.xlu2 %2910 }
 0x4ce   : > { %2940 = vst.msk [vmem:[#allocation2 + $0x18] sm:$0xff] %vm2936_vm3, %v2895_v2  ;;  %v2909_v7 = vpop.permute.xlu1 %2908 }
 0x4cf   : > { %2948 = vst.msk [vmem:[#allocation2 + $0x58] sm:$0xff] %vm2936_vm3, %v2911_v9  ;;  %v5500_v9 = vld [vmem:[%s5892_s22 + $0x30] sm:$0xff] }
 0x4d0   : > { %v5426_v55 = vpop.eup %5425  ;;  %2947 = vst.msk [vmem:[#allocation2 + $0x50] sm:$0xff] %vm2936_vm3, %v2909_v7 }
 0x4d1   : > { %v3359_v58 = vmul.f32 %v5426_v55, %v5418_v52  ;;  %v3360_v6 = vmul.f32 %v5426_v55, %v5420_v29  ;;  %v5717_v55 = vmov 128.0  }
 0x4d2   : > { %5427 = vrcp.f32 %v5717_v55  ;;  %v5112_v55 = vld [vmem:[#allocation8 + $0x30] sm:$0xff] }
 0x4d3   : > { %v3375_v32 = vpack.c.bf16 %v3359_v58, %v3359_v58  ;;  %v3376_v17 = vpack.c.bf16 %v3360_v6, %v3360_v6 }
 0x4d5   : > { %v3554_v51 = vunpack.c.l.b16 %v3375_v32  ;;  %v3555_v8 = vunpack.c.l.b16 %v3376_v17  ;;  %v2913_v57 = vpop.permute.xlu0 %2912 }
 0x4d6   : > { %2949 = vst.msk [vmem:[#allocation2 + $0x60] sm:$0xff] %vm2936_vm3, %v2913_v57 }
 0x4d7   : > { %v3556_v37 = vpack.c.b16 %v3555_v8, %v3554_v51 }
 0x4d8   : > { %v5428_v58 = vpop.eup %5427 }
 0x4d9   : > { %5009 = vmatmul.msk.bf16.vlgmr.msra.gmra.mxu1 %vm1070_vm1, %v3556_v37  ;;  %v3725_v32 = vmul.f32 128.0, %v5428_v58  ;;  %vm3729_vm5 = vweird.f32 %v5428_v58 }
 0x4dd   : > { %v2903_v5 = vpop.permute.xlu0 %2902 }
 0x4de   : > { %2944 = vst.msk [vmem:[#allocation2 + $0x38] sm:$0xff] %vm2936_vm3, %v2903_v5 }
 0x4e5   : > { %v2915_v1 = vpop.permute.xlu0 %2914 }
 0x4e6   : > { %2950 = vst.msk [vmem:[#allocation2 + $0x68] sm:$0xff] %vm2936_vm3, %v2915_v1 }
 0x520   : > { %v3397_v44 = vpop.f32.mrf.mxu2 }
 0x521   : > { %3593 = vrot.lane.b32.xlu1 %v3397_v44, %s5714_s2 }
 0x528   : > { %v3399_v46 = vpop.f32.mrf.mxu2 }
 0x529   : > { %3595 = vrot.lane.b32.xlu2 %v3399_v46, %s5714_s2 }
 0x530   : > { %v3422_v16 = vpop.f32.mrf.mxu3 }
 0x532   : > { %v3447_v54 = vpop.f32.mrf.mxu0  ;;  %v3497_v0 = vpop.f32.mrf.mxu2 }
 0x533   : > { %3601 = vrot.lane.b32.xlu1 %v3447_v54, %s5714_s2 }
 0x538   : > { %v3424_v47 = vpop.f32.mrf.mxu3 }
 0x53a   : > { %v3449_v26 = vpop.f32.mrf.mxu0  ;;  %v3499_v48 = vpop.f32.mrf.mxu2 }
 0x53b   : > { %3597 = vrot.lane.b32.xlu1 %v3422_v16, %s5714_s2  ;;  %3603 = vrot.lane.b32.xlu2 %v3449_v26, %s5714_s2 }
 0x53e   : > { %v3472_v56 = vpop.f32.mrf.mxu1 }
 0x543   : > { %3609 = vrot.lane.b32.xlu2 %v3497_v0, %s5714_s2  ;;  %3605 = vrot.lane.b32.xlu1 %v3472_v56, %s5714_s2  ;;  %v5501_v0 = vld [vmem:[%s5892_s22 + $0x40] sm:$0xff] }
 0x544   : > { %v3547_v38 = vpop.f32.mrf.mxu0 }
 0x546   : > { %v3474_v34 = vpop.f32.mrf.mxu1 }
 0x54b   : > { %v3522_v28 = vpop.f32.mrf.mxu3  ;;  %3599 = vrot.lane.b32.xlu2 %v3424_v47, %s5714_s2  ;;  %3617 = vrot.lane.b32.xlu1 %v3547_v38, %s5714_s2 }
 0x54c   : > { %v3549_v15 = vpop.f32.mrf.mxu0 }
 0x553   : > { %v3524_v52 = vpop.f32.mrf.mxu3  ;;  %3611 = vrot.lane.b32.xlu2 %v3499_v48, %s5714_s2 }
 0x554   : > { %3615 = vrot.lane.b32.xlu0 %v3524_v52, %s5714_s2 }
 0x556   : > { %v3572_v6 = vpop.f32.mrf.mxu1 }
 0x55b   : > { %3607 = vrot.lane.b32.xlu2 %v3474_v34, %s5714_s2 }
 0x55e   : > { %v3574_v51 = vpop.f32.mrf.mxu1 }
 0x563   : > { %3613 = vrot.lane.b32.xlu2 %v3522_v28, %s5714_s2 }
 0x56b   : > { %3619 = vrot.lane.b32.xlu2 %v3549_v15, %s5714_s2 }
 0x583   : > { %v3596_v29 = vpop.permute.xlu2 %3595 }
 0x584   : > { %3643 = vst.msk [vmem:[#allocation2 + $0x8] sm:$0xff] %vm3641_vm4, %v3596_v29 }
 0x58b   : > { %v3659_v25 = vld [vmem:[#allocation2 + $0x8] sm:$0xff] }
 0x58c   : > { %v6970_v61 = vadd.f32 %v5493_v41, %v3659_v25 }
 0x58e   : > { %3694 = vadd.xlane.f32.xlu1 %v6970_v61 }
 0x593   : > { %v3594_v10 = vpop.permute.xlu1 %3593 }
 0x594   : > { %3642 = vst.msk [vmem:[#allocation2] sm:$0xff] %vm3641_vm4, %v3594_v10 }
 0x595   : > { %v3604_v43 = vpop.permute.xlu2 %3603 }
 0x596   : > { %3647 = vst.msk [vmem:[#allocation2 + $0x28] sm:$0xff] %vm3641_vm4, %v3604_v43 }
 0x59b   : > { %v3658_v35 = vld [vmem:[#allocation2] sm:$0xff] }
 0x59c   : > { %v6976_v40 = vadd.f32 %v5494_v21, %v3658_v35 }
 0x59d   : > { %v3610_v23 = vpop.permute.xlu2 %3609  ;;  %v3663_v53 = vld [vmem:[#allocation2 + $0x28] sm:$0xff] }
 0x59e   : > { %3650 = vst.msk [vmem:[#allocation2 + $0x40] sm:$0xff] %vm3641_vm4, %v3610_v23  ;;  %3692 = vadd.xlane.f32.xlu0 %v6976_v40  ;;  %v7007_v4 = vadd.f32 %v5498_v50, %v3663_v53  ;;  %v5505_v50 = vld [vmem:[%s5892_s22 + $0x58] sm:$0xff] }
 0x5a5   : > { %v3602_v12 = vpop.permute.xlu1 %3601  ;;  %v3600_v45 = vpop.permute.xlu2 %3599  ;;  %v3666_v47 = vld [vmem:[#allocation2 + $0x40] sm:$0xff] }
 0x5a6   : > { %3646 = vst.msk [vmem:[#allocation2 + $0x20] sm:$0xff] %vm3641_vm4, %v3602_v12  ;;  %v7030_v38 = vadd.f32 %v5501_v0, %v3666_v47 }
 0x5a7   : > { %3645 = vst.msk [vmem:[#allocation2 + $0x18] sm:$0xff] %vm3641_vm4, %v3600_v45  ;;  %2918 = vrot.lane.b32.xlu1 %v6814_v11, %s5715_s19  ;;  %v5502_v45 = vld [vmem:[%s5892_s22 + $0x48] sm:$0xff] }
 0x5ad   : > { %v3598_v62 = vpop.permute.xlu1 %3597  ;;  %v3612_v24 = vpop.permute.xlu2 %3611  ;;  %v3662_v30 = vld [vmem:[#allocation2 + $0x20] sm:$0xff] }
 0x5ae   : > { %3644 = vst.msk [vmem:[#allocation2 + $0x10] sm:$0xff] %vm3641_vm4, %v3598_v62  ;;  %v6986_v60 = vadd.f32 %v5495_v20, %v3662_v30  ;;  %v3661_v22 = vld [vmem:[#allocation2 + $0x18] sm:$0xff] }
 0x5af   : > { %3651 = vst.msk [vmem:[#allocation2 + $0x48] sm:$0xff] %vm3641_vm4, %v3612_v24  ;;  %v3677_v3 = vadd.f32 %v5499_v63, %v3661_v22 }
 0x5b0   : > { %3700 = vadd.xlane.f32.xlu2 %v6986_v60 }
 0x5b5   : > { %v3606_v39 = vpop.permute.xlu1 %3605  ;;  %v3608_v59 = vpop.permute.xlu2 %3607  ;;  %v3660_v18 = vld [vmem:[#allocation2 + $0x10] sm:$0xff] }
 0x5b6   : > { %3648 = vst.msk [vmem:[#allocation2 + $0x30] sm:$0xff] %vm3641_vm4, %v3606_v39  ;;  %v6992_v11 = vadd.f32 %v5496_v19, %v3660_v18  ;;  %v3667_v21 = vld [vmem:[#allocation2 + $0x48] sm:$0xff] }
 0x5b7   : > { %3649 = vst.msk [vmem:[#allocation2 + $0x38] sm:$0xff] %vm3641_vm4, %v3608_v59  ;;  %v7051_v62 = vadd.f32 %v5502_v45, %v3667_v21 }
 0x5b8   : > { %3696 = vadd.xlane.f32.xlu0 %v6992_v11 }
 0x5bd   : > { %v3618_v49 = vpop.permute.xlu1 %3617  ;;  %v3614_v33 = vpop.permute.xlu2 %3613  ;;  %v3664_v2 = vld [vmem:[#allocation2 + $0x30] sm:$0xff] }
 0x5be   : > { %3654 = vst.msk [vmem:[#allocation2 + $0x60] sm:$0xff] %vm3641_vm4, %v3618_v49  ;;  %v3665_v14 = vld [vmem:[#allocation2 + $0x38] sm:$0xff]  ;;  %v3680_v7 = vadd.f32 %v5500_v9, %v3664_v2 }
 0x5bf   : > { %3652 = vst.msk [vmem:[#allocation2 + $0x50] sm:$0xff] %vm3641_vm4, %v3614_v33  ;;  %v6999_v36 = vadd.f32 %v5497_v31, %v3665_v14  ;;  %v5503_v31 = vld [vmem:[%s5892_s22 + $0x50] sm:$0xff]  ;;  %v5113_v9 = vld [vmem:[#allocation8 + $0x38] sm:$0xff] }
 0x5c0   : > { %4133 = vmatpush.bf16.msra.mxu2 %v5113_v9 }
 0x5c1   : > { %3706 = vadd.xlane.f32.xlu2 %v6999_v36 }
 0x5c4   : > { %4134 = vmatpush.bf16.msra.mxu2 %v5112_v55 }
 0x5c5   : > { %v3620_v27 = vpop.permute.xlu2 %3619  ;;  %v3670_v63 = vld [vmem:[#allocation2 + $0x60] sm:$0xff] }
 0x5c6   : > { %v3616_v42 = vpop.permute.xlu0 %3615  ;;  %3655 = vst.msk [vmem:[#allocation2 + $0x68] sm:$0xff] %vm3641_vm4, %v3620_v27  ;;  %v3668_v33 = vld [vmem:[#allocation2 + $0x50] sm:$0xff]  ;;  %v5504_v27 = vld [vmem:[%s5892_s22 + $0x68] sm:$0xff] }
 0x5c7   : > { %3653 = vst.msk [vmem:[#allocation2 + $0x58] sm:$0xff] %vm3641_vm4, %v3616_v42 }
 0x5cc   : > { %2916 = vrot.lane.b32.xlu0 %v6804_v13, %s5715_s19  ;;  %v3726_v13 = vsub.f32 1.0, %v3725_v32  ;;  %v5111_v32 = vld [vmem:[#allocation8 + $0x28] sm:$0xff] }
 0x5cd   : > { %v3671_v14 = vld [vmem:[#allocation2 + $0x68] sm:$0xff]  ;;  %4135 = vmatpush.bf16.msra.mxu2 %v5111_v32 }
 0x5ce   : > { %v3727_v17 = vmul.f32 %v5428_v58, %v3726_v13  ;;  %v7076_v42 = vadd.f32 %v5504_v27, %v3671_v14  ;;  %v3669_v53 = vld [vmem:[#allocation2 + $0x58] sm:$0xff] }
 0x5d0   : > { %v3728_v8 = vadd.f32 %v5428_v58, %v3727_v17  ;;  %v5110_v17 = vld [vmem:[#allocation8 + $0x20] sm:$0xff] }
 0x5d1   : > { %3702 = vadd.xlane.f32.xlu1 %v7007_v4  ;;  %4136 = vmatpush.bf16.msra.mxu2 %v5110_v17 }
 0x5d2   : > { %v7013_v57 = vsel %vm3729_vm5, %v5428_v58, %v3728_v8 }
 0x5d9   : > { %3698 = vadd.xlane.f32.xlu1 %v3677_v3 }
 0x5e1   : > { %3704 = vadd.xlane.f32.xlu1 %v3680_v7 }
 0x5fa   : > { %3623 = vrot.lane.b32.xlu1 %v3574_v51, %s5714_s2 }
 0x601   : > { %v3695_v37 = vpop.xlane.xlu1 %3694 }
 0x602   : > { %v3732_v5 = vmul.f32 %v7013_v57, %v3695_v37  ;;  %v5109_v37 = vld [vmem:[#allocation8 + $0x18] sm:$0xff] }
 0x603   : > { %4137 = vmatpush.bf16.msra.mxu2 %v5109_v37 }
 0x604   : > { %v7017_v1 = vsub.f32 %v6970_v61, %v3732_v5 }
 0x606   : > { %v3764_v44 = vmul.f32 %v7017_v1, %v7017_v1 }
 0x608   : > { %3781 = vadd.xlane.f32.xlu2 %v3764_v44 }
 0x611   : > { %v3693_v46 = vpop.xlane.xlu0 %3692 }
 0x612   : > { %v3731_v54 = vmul.f32 %v7013_v57, %v3693_v46 }
 0x614   : > { %v7023_v16 = vsub.f32 %v6976_v40, %v3731_v54  ;;  %v5108_v54 = vld [vmem:[#allocation8 + $0x10] sm:$0xff] }
 0x615   : > { %4138 = vmatpush.bf16.msra.mxu2 %v5108_v54 }
 0x616   : > { %v3763_v26 = vmul.f32 %v7023_v16, %v7023_v16 }
 0x618   : > { %3779 = vadd.xlane.f32.xlu0 %v3763_v26 }
 0x619   : > { %v2919_v56 = vpop.permute.xlu1 %2918 }
 0x61a   : > { %2952 = vst.msk [vmem:[#allocation2 + $0x78] sm:$0xff] %vm2936_vm3, %v2919_v56  ;;  %v5507_v56 = vld [vmem:[%s5892_s22 + $0x70] sm:$0xff] }
 0x620   : > { %3621 = vrot.lane.b32.xlu2 %v3572_v6, %s5714_s2 }
 0x623   : > { %v3701_v28 = vpop.xlane.xlu2 %3700 }
 0x624   : > { %v3735_v48 = vmul.f32 %v7013_v57, %v3701_v28  ;;  %3708 = vadd.xlane.f32.xlu1 %v7030_v38 }
 0x626   : > { %v7035_v52 = vsub.f32 %v6986_v60, %v3735_v48  ;;  %v5107_v48 = vld [vmem:[#allocation8 + $0x8] sm:$0xff] }
 0x627   : > { %4139 = vmatpush.bf16.msra.mxu2 %v5107_v48 }
 0x628   : > { %v3767_v34 = vmul.f32 %v7035_v52, %v7035_v52 }
 0x62a   : > { %3787 = vadd.xlane.f32.xlu0 %v3767_v34 }
 0x62b   : > { %v3697_v15 = vpop.xlane.xlu0 %3696 }
 0x62c   : > { %v3733_v25 = vmul.f32 %v7013_v57, %v3697_v15  ;;  %v5106_v15 = vld [vmem:[#allocation8] sm:$0xff] }
 0x62d   : > { %4140 = vmatpush.bf16.msra.mxu2 %v5106_v15 }
 0x62e   : > { %v7042_v41 = vsub.f32 %v6992_v11, %v3733_v25 }
 0x630   : > { %v3765_v10 = vmul.f32 %v7042_v41, %v7042_v41 }
 0x634   : > { %v3707_v43 = vpop.xlane.xlu2 %3706 }
 0x635   : > { %v3738_v23 = vmul.f32 %v7013_v57, %v3707_v43 }
 0x637   : > { %v7058_v20 = vsub.f32 %v6999_v36, %v3738_v23  ;;  %v7073_v36 = vadd.f32 %v5503_v31, %v3668_v33  ;;  %v5508_v31 = vld [vmem:[%s5892_s22 + $0x78] sm:$0xff] }
 0x639   : > { %v3770_v19 = vmul.f32 %v7058_v20, %v7058_v20 }
 0x63e   : > { %v2917_v29 = vpop.permute.xlu0 %2916 }
 0x63f   : > { %2951 = vst.msk [vmem:[#allocation2 + $0x70] sm:$0xff] %vm2936_vm3, %v2917_v29 }
 0x644   : > { %v3703_v61 = vpop.xlane.xlu1 %3702 }
 0x645   : > { %v3736_v24 = vmul.f32 %v7013_v57, %v3703_v61 }
 0x647   : > { %v7061_v39 = vsub.f32 %v7007_v4, %v3736_v24  ;;  %v7081_v4 = vadd.f32 %v5505_v50, %v3669_v53 }
 0x649   : > { %3783 = vadd.xlane.f32.xlu2 %v3765_v10  ;;  %v3768_v11 = vmul.f32 %v7061_v39, %v7061_v39 }
 0x64c   : > { %v3699_v35 = vpop.xlane.xlu1 %3698 }
 0x64d   : > { %v3734_v40 = vmul.f32 %v7013_v57, %v3699_v35 }
 0x64f   : > { %v7048_v12 = vsub.f32 %v3677_v3, %v3734_v40  ;;  %v5506_v3 = vld [vmem:[%s5892_s22 + $0x60] sm:$0xff]  ;;  %s5649_s22 = scalar_lea.hbm %s7635_s10, 256 }
 0x650   : > { %v7086_v2 = vadd.f32 %v5506_v3, %v3670_v63  ;;  %p5651_p9 = scmp.lt.s32.totalorder %s5649_s22, %s5645_s27 }
 0x651   : > { %3710 = vadd.xlane.f32.xlu2 %v7051_v62  ;;  %v3766_v30 = vmul.f32 %v7048_v12, %v7048_v12 }
 0x652   : > { %p5652_p2 = por %p5651_p9, %p5650_p11 }
 0x653   : > { %3785 = vadd.xlane.f32.xlu0 %v3766_v30  ;;  %v7105_v30 = vld [vmem:[%s7631_s6] ss:$0 sm:$0xff] }
 0x654   : > { %v3705_v60 = vpop.xlane.xlu1 %3704  ;;  %p5653_p10 = pnand %p5652_p2, %p5648_p8 }
 0x655   : > { %v3737_v59 = vmul.f32 %v7013_v57, %v3705_v60 }
 0x657   : > { %v7064_v18 = vsub.f32 %v3680_v7, %v3737_v59 }
 0x659   : > { %3793 = vadd.xlane.f32.xlu2 %v3770_v19  ;;  %v3769_v49 = vmul.f32 %v7064_v18, %v7064_v18 }
 0x65b   : > { %3789 = vadd.xlane.f32.xlu0 %v3768_v11  ;;  %3791 = vadd.xlane.f32.xlu1 %v3769_v49  ;;  %v7111_v11 = vld [vmem:[%s7632_s7] ss:$0 sm:$0xff] }
 0x663   : > { %3712 = vadd.xlane.f32.xlu0 %v7073_v36  ;;  %3718 = vadd.xlane.f32.xlu1 %v7076_v42 }
 0x66b   : > { %3714 = vadd.xlane.f32.xlu0 %v7081_v4 }
 0x66c   : > { %v3624_v22 = vpop.permute.xlu1 %3623 }
 0x66d   : > { %3657 = vst.msk [vmem:[#allocation2 + $0x78] sm:$0xff] %vm3641_vm4, %v3624_v22 }
 0x673   : > { %3716 = vadd.xlane.f32.xlu0 %v7086_v2 }
 0x674   : > { %v3673_v19 = vld [vmem:[#allocation2 + $0x78] sm:$0xff] }
 0x675   : > { %v7117_v27 = vadd.f32 %v5508_v31, %v3673_v19 }
 0x67b   : > { %v3782_v7 = vpop.xlane.xlu2 %3781 }
 0x67c   : > { %v3812_v58 = vmul.f32 %v3782_v7, %v7013_v57 }
 0x67e   : > { %v3828_v6 = vadd.f32 1e-05, %v3812_v58 }
 0x680   : > { %5429 = vrsqrt.f32 %v3828_v6  ;;  %vm3859_vm7 = vweird.f32 %v3828_v6 }
 0x683   : > { %v3622_v13 = vpop.permute.xlu2 %3621 }
 0x684   : > { %3656 = vst.msk [vmem:[#allocation2 + $0x70] sm:$0xff] %vm3641_vm4, %v3622_v13 }
 0x686   : > { %v5430_v51 = vpop.eup %5429 }
 0x687   : > { %v3854_v8 = vmul.f32 %v5430_v51, %v3828_v6  ;;  %vm3860_vm6 = vweird.f32 %v5430_v51 }
 0x688   : > { %vm3861_vm8 = vmor %vm3859_vm7, %vm3860_vm6 }
 0x689   : > { %v3855_v5 = vmul.f32 %v5430_v51, %v3854_v8 }
 0x68b   : > { %v3780_v44 = vpop.xlane.xlu0 %3779  ;;  %v3672_v46 = vld [vmem:[#allocation2 + $0x70] sm:$0xff]  ;;  %v3856_v28 = vmul.f32 0.5, %v3855_v5 }
 0x68c   : > { %v3811_v26 = vmul.f32 %v3780_v44, %v7013_v57  ;;  %v7093_v47 = vadd.f32 %v5507_v56, %v3672_v46 }
 0x68d   : > { %v3857_v34 = vsub.f32 1.5, %v3856_v28 }
 0x68e   : > { %v3827_v0 = vadd.f32 1e-05, %v3811_v26  ;;  %3720 = vadd.xlane.f32.xlu1 %v7093_v47 }
 0x68f   : > { %v3858_v25 = vmul.f32 %v5430_v51, %v3857_v34 }
 0x690   : > { %5431 = vrsqrt.f32 %v3827_v0  ;;  %vm3849_vm10 = vweird.f32 %v3827_v0 }
 0x691   : > { %v3862_v40 = vsel %vm3861_vm8, %v5430_v51, %v3858_v25 }
 0x692   : > { %v4004_v60 = vmul.f32 %v3862_v40, %v7017_v1 }
 0x694   : > { %v4023_v49 = vmul.f32 %v7105_v30, %v4004_v60 }
 0x696   : > { %v5432_v29 = vpop.eup %5431  ;;  %v7120_v1 = vadd.f32 %v7111_v11, %v4023_v49 }
 0x697   : > { %v3844_v61 = vmul.f32 %v5432_v29, %v3827_v0  ;;  %v3709_v10 = vpop.xlane.xlu1 %3708  ;;  %vm3850_vm9 = vweird.f32 %v5432_v29 }
 0x698   : > { %v3739_v43 = vmul.f32 %v7013_v57, %v3709_v10  ;;  %vm3851_vm11 = vmor %vm3849_vm10, %vm3850_vm9 }
 0x699   : > { %v3845_v35 = vmul.f32 %v5432_v29, %v3844_v61 }
 0x69a   : > { %v7098_v21 = vsub.f32 %v7030_v38, %v3739_v43 }
 0x69b   : > { %v3846_v23 = vmul.f32 0.5, %v3845_v35 }
 0x69c   : > { %v3771_v45 = vmul.f32 %v7098_v21, %v7098_v21 }
 0x69d   : > { %v3847_v24 = vsub.f32 1.5, %v3846_v23  ;;  %v3788_v63 = vpop.xlane.xlu0 %3787 }
 0x69e   : > { %3795 = vadd.xlane.f32.xlu2 %v3771_v45  ;;  %v3815_v9 = vmul.f32 %v3788_v63, %v7013_v57 }
 0x69f   : > { %v3848_v59 = vmul.f32 %v5432_v29, %v3847_v24 }
 0x6a0   : > { %v7130_v55 = vadd.f32 1e-05, %v3815_v9 }
 0x6a1   : > { %v3852_v38 = vsel %vm3851_vm11, %v5432_v29, %v3848_v59 }
 0x6a2   : > { %v4003_v33 = vmul.f32 %v3852_v38, %v7023_v16  ;;  %vm3889_vm6 = vweird.f32 %v7130_v55 }
 0x6a4   : > { %v4022_v14 = vmul.f32 %v7105_v30, %v4003_v33 }
 0x6a6   : > { %v7123_v53 = vadd.f32 %v7111_v11, %v4022_v14  ;;  %3722 = vadd.xlane.f32.xlu2 %v7117_v27 }
 0x6a8   : > { %v4057_v50 = vpack.c.bf16 %v7120_v1, %v7123_v53 }
 0x6aa   : > { %4141 = vmatmul.bf16.vlgmr.msra.gmra.mxu2 %v4057_v50 }
 0x6bc   : > { %v3784_v22 = vpop.xlane.xlu2 %3783 }
 0x6bd   : > { %v3813_v16 = vmul.f32 %v3784_v22, %v7013_v57 }
 0x6bf   : > { %v3829_v3 = vadd.f32 1e-05, %v3813_v16 }
 0x6c1   : > { %5433 = vrsqrt.f32 %v3829_v3  ;;  %vm3869_vm13 = vweird.f32 %v3829_v3 }
 0x6c2   : > { %5435 = vrsqrt.f32 %v7130_v55 }
 0x6c4   : > { %v3711_v7 = vpop.xlane.xlu2 %3710 }
 0x6c5   : > { %v3740_v58 = vmul.f32 %v7013_v57, %v3711_v7 }
 0x6c6   : > { %v3786_v6 = vpop.xlane.xlu0 %3785 }
 0x6c7   : > { %v5434_v32 = vpop.eup %5433  ;;  %v7134_v13 = vsub.f32 %v7051_v62, %v3740_v58  ;;  %v3814_v17 = vmul.f32 %v3786_v6, %v7013_v57 }
 0x6c8   : > { %v3864_v51 = vmul.f32 %v5434_v32, %v3829_v3  ;;  %v7140_v0 = vpop.eup %5435  ;;  %vm3870_vm12 = vweird.f32 %v5434_v32 }
 0x6c9   : > { %v3830_v8 = vadd.f32 1e-05, %v3814_v17  ;;  %v3772_v37 = vmul.f32 %v7134_v13, %v7134_v13  ;;  %v3884_v29 = vmul.f32 %v7140_v0, %v7130_v55  ;;  %vm3871_vm14 = vmor %vm3869_vm13, %vm3870_vm12  ;;  %vm3890_vm3 = vweird.f32 %v7140_v0 }
 0x6ca   : > { %v3865_v5 = vmul.f32 %v5434_v32, %v3864_v51  ;;  %vm3891_vm7 = vmor %vm3889_vm6, %vm3890_vm3 }
 0x6cb   : > { %5437 = vrsqrt.f32 %v3830_v8  ;;  %3797 = vadd.xlane.f32.xlu0 %v3772_v37  ;;  %v3885_v40 = vmul.f32 %v7140_v0, %v3884_v29  ;;  %vm3879_vm0 = vweird.f32 %v3830_v8 }
 0x6cc   : > { %v3866_v44 = vmul.f32 0.5, %v3865_v5  ;;  %v3794_v46 = vpop.xlane.xlu2 %3793 }
 0x6cd   : > { %v3818_v34 = vmul.f32 %v3794_v46, %v7013_v57  ;;  %v3886_v14 = vmul.f32 0.5, %v3885_v40 }
 0x6ce   : > { %v3867_v54 = vsub.f32 1.5, %v3866_v44  ;;  %v3790_v26 = vpop.xlane.xlu0 %3789  ;;  %v3792_v56 = vpop.xlane.xlu1 %3791 }
 0x6cf   : > { %v3816_v62 = vmul.f32 %v3790_v26, %v7013_v57  ;;  %v3817_v28 = vmul.f32 %v3792_v56, %v7013_v57  ;;  %v7149_v35 = vadd.f32 1e-05, %v3818_v34  ;;  %v3887_v7 = vsub.f32 1.5, %v3886_v14 }
 0x6d0   : > { %v3868_v25 = vmul.f32 %v5434_v32, %v3867_v54 }
 0x6d1   : > { %v5438_v48 = vpop.eup %5437  ;;  %v3832_v15 = vadd.f32 1e-05, %v3816_v62  ;;  %v7147_v10 = vadd.f32 1e-05, %v3817_v28  ;;  %v3888_v54 = vmul.f32 %v7140_v0, %v3887_v7  ;;  %vm3919_vm12 = vweird.f32 %v7149_v35  ;;  %v5119_v7 = vld [vmem:[#allocation9 + $0x28] sm:$0xff] }
 0x6d2   : > { %v3874_v61 = vmul.f32 %v5438_v48, %v3830_v8  ;;  %v3872_v23 = vsel %vm3871_vm14, %v5434_v32, %v3868_v25  ;;  %vm3880_vm15 = vweird.f32 %v5438_v48 }
 0x6d3   : > { %5439 = vrsqrt.f32 %v3832_v15  ;;  %v4005_v19 = vmul.f32 %v3872_v23, %v7042_v41  ;;  %vm3881_vm1 = vmor %vm3879_vm0, %vm3880_vm15  ;;  %vm3899_vm4 = vweird.f32 %v3832_v15  ;;  %v3892_v34 = vsel %vm3891_vm7, %v7140_v0, %v3888_v54  ;;  %v5115_v54 = vld [vmem:[#allocation9 + $0x8] sm:$0xff] }
 0x6d4   : > { %v3875_v43 = vmul.f32 %v5438_v48, %v3874_v61  ;;  %5441 = vrsqrt.f32 %v7147_v10  ;;  %vm3909_vm10 = vweird.f32 %v7147_v10 }
 0x6d5   : > { %5443 = vrsqrt.f32 %v7149_v35 }
 0x6d6   : > { %v3876_v45 = vmul.f32 0.5, %v3875_v43  ;;  %v3713_v24 = vpop.xlane.xlu0 %3712  ;;  %v3719_v33 = vpop.xlane.xlu1 %3718  ;;  %v4007_v43 = vmul.f32 %v3892_v34, %v7035_v52 }
 0x6d7   : > { %v3741_v60 = vmul.f32 %v7013_v57, %v3713_v24  ;;  %v3744_v3 = vmul.f32 %v7013_v57, %v3719_v33 }
 0x6d8   : > { %v3877_v59 = vsub.f32 1.5, %v3876_v45 }
 0x6d9   : > { %v5440_v38 = vpop.eup %5439  ;;  %v7157_v49 = vsub.f32 %v7073_v36, %v3741_v60  ;;  %v4024_v36 = vmul.f32 %v7105_v30, %v4005_v19  ;;  %v7171_v5 = vsub.f32 %v7076_v42, %v3744_v3  ;;  %v4026_v60 = vmul.f32 %v7105_v30, %v4007_v43 }
 0x6da   : > { %v3878_v31 = vmul.f32 %v5438_v48, %v3877_v59  ;;  %v3894_v50 = vmul.f32 %v5440_v38, %v3832_v15  ;;  %v7162_v9 = vpop.eup %5441  ;;  %vm3900_vm2 = vweird.f32 %v5440_v38 }
 0x6db   : > { %v3773_v22 = vmul.f32 %v7157_v49, %v7157_v49  ;;  %v5444_v32 = vpop.eup %5443  ;;  %v3904_v37 = vmul.f32 %v7162_v9, %v7147_v10  ;;  %v7178_v44 = vadd.f32 %v7111_v11, %v4024_v36  ;;  %vm3901_vm5 = vmor %vm3899_vm4, %vm3900_vm2  ;;  %vm3910_vm8 = vweird.f32 %v7162_v9  ;;  %v5120_v36 = vld [vmem:[#allocation9 + $0x30] sm:$0xff] }
 0x6dc   : > { %v3882_v16 = vsel %vm3881_vm1, %v5438_v48, %v3878_v31  ;;  %v3895_v63 = vmul.f32 %v5440_v38, %v3894_v50  ;;  %v3914_v26 = vmul.f32 %v5444_v32, %v7149_v35  ;;  %v3776_v48 = vmul.f32 %v7171_v5, %v7171_v5  ;;  %vm3911_vm11 = vmor %vm3909_vm10, %vm3910_vm8 }
 0x6dd   : > { %v4006_v41 = vmul.f32 %v3882_v16, %v7048_v12  ;;  %3799 = vadd.xlane.f32.xlu0 %v3773_v22  ;;  %v3905_v28 = vmul.f32 %v7162_v9, %v3904_v37  ;;  %v7212_v52 = vadd.f32 %v7111_v11, %v4026_v60  ;;  %vm3920_vm9 = vweird.f32 %v5444_v32 }
 0x6de   : > { %v3896_v58 = vmul.f32 0.5, %v3895_v63  ;;  %v3715_v6 = vpop.xlane.xlu0 %3714  ;;  %v3915_v15 = vmul.f32 %v5444_v32, %v3914_v26  ;;  %vm3921_vm13 = vmor %vm3919_vm12, %vm3920_vm9  ;;  %v5114_v26 = vld [vmem:[#allocation9] sm:$0xff] }
 0x6df   : > { %v3742_v17 = vmul.f32 %v7013_v57, %v3715_v6  ;;  %v4025_v51 = vmul.f32 %v7105_v30, %v4006_v41  ;;  %v3906_v61 = vmul.f32 0.5, %v3905_v28  ;;  %v5121_v41 = vld [vmem:[#allocation9 + $0x38] sm:$0xff]  ;;  %v5118_v6 = vld [vmem:[#allocation9 + $0x20] sm:$0xff] }
 0x6e0   : > { %v3897_v8 = vsub.f32 1.5, %v3896_v58  ;;  %v3916_v23 = vmul.f32 0.5, %v3915_v15  ;;  %4274 = vmatpush.bf16.msra.mxu0 %v5121_v41  ;;  %5132 = vmatpush.bf16.msrb.mxu3 %v5121_v41 }
 0x6e1   : > { %v7175_v12 = vsub.f32 %v7081_v4, %v3742_v17  ;;  %v7181_v46 = vadd.f32 %v7111_v11, %v4025_v51  ;;  %v3907_v0 = vsub.f32 1.5, %v3906_v61  ;;  %v5116_v51 = vld [vmem:[#allocation9 + $0x10] sm:$0xff] }
 0x6e2   : > { %v3898_v56 = vmul.f32 %v5440_v38, %v3897_v8  ;;  %v3917_v59 = vsub.f32 1.5, %v3916_v23 }
 0x6e3   : > { %v4058_v42 = vpack.c.bf16 %v7181_v46, %v7178_v44  ;;  %v3774_v4 = vmul.f32 %v7175_v12, %v7175_v12 }
 0x6e4   : > { %v3902_v62 = vsel %vm3901_vm5, %v5440_v38, %v3898_v56  ;;  %v3908_v38 = vmul.f32 %v7162_v9, %v3907_v0  ;;  %4275 = vmatpush.bf16.msra.mxu0 %v5120_v36  ;;  %5133 = vmatpush.bf16.msrb.mxu3 %v5120_v36 }
 0x6e5   : > { %4146 = vmatmul.bf16.gmra.mxu2 %v4058_v42  ;;  %3801 = vadd.xlane.f32.xlu1 %v3774_v4  ;;  %v4008_v25 = vmul.f32 %v3902_v62, %v7061_v39 }
 0x6e6   : > { %3805 = vadd.xlane.f32.xlu0 %v3776_v48  ;;  %v3717_v29 = vpop.xlane.xlu0 %3716  ;;  %v3912_v33 = vsel %vm3911_vm11, %v7162_v9, %v3908_v38 }
 0x6e7   : > { %v3743_v55 = vmul.f32 %v7013_v57, %v3717_v29  ;;  %v4027_v24 = vmul.f32 %v7105_v30, %v4008_v25  ;;  %v4009_v31 = vmul.f32 %v3912_v33, %v7064_v18 }
 0x6e8   : > { %4276 = vmatpush.bf16.msra.mxu0 %v5119_v7  ;;  %5134 = vmatpush.bf16.msrb.mxu3 %v5119_v7 }
 0x6e9   : > { %v7200_v40 = vsub.f32 %v7086_v2, %v3743_v55  ;;  %v7207_v39 = vadd.f32 %v7111_v11, %v4027_v24  ;;  %v3918_v2 = vmul.f32 %v5444_v32, %v3917_v59  ;;  %v4028_v22 = vmul.f32 %v7105_v30, %v4009_v31 }
 0x6eb   : > { %v3775_v45 = vmul.f32 %v7200_v40, %v7200_v40  ;;  %v4059_v19 = vpack.c.bf16 %v7207_v39, %v7212_v52  ;;  %v3922_v14 = vsel %vm3921_vm13, %v5444_v32, %v3918_v2  ;;  %v7224_v10 = vadd.f32 %v7111_v11, %v4028_v22  ;;  %v5117_v32 = vld [vmem:[#allocation9 + $0x18] sm:$0xff] }
 0x6ec   : > { %v4010_v50 = vmul.f32 %v3922_v14, %v7058_v20  ;;  %4277 = vmatpush.bf16.msra.mxu0 %v5118_v6  ;;  %5135 = vmatpush.bf16.msrb.mxu3 %v5118_v6 }
 0x6ed   : > { %3803 = vadd.xlane.f32.xlu2 %v3775_v45 }
 0x6ee   : > { %v4029_v16 = vmul.f32 %v7105_v30, %v4010_v50 }
 0x6f0   : > { %v7227_v3 = vadd.f32 %v7111_v11, %v4029_v16  ;;  %4278 = vmatpush.bf16.msra.mxu0 %v5117_v32  ;;  %5136 = vmatpush.bf16.msrb.mxu3 %v5117_v32 }
 0x6f2   : > { %v4060_v9 = vpack.c.bf16 %v7227_v3, %v7224_v10 }
 0x6f4   : > { %4279 = vmatpush.bf16.msra.mxu0 %v5116_v51  ;;  %5137 = vmatpush.bf16.msrb.mxu3 %v5116_v51 }
 0x6f5   : > { %4151 = vmatmul.bf16.gmra.mxu2 %v4059_v19 }
 0x6f8   : > { %4280 = vmatpush.bf16.msra.mxu0 %v5115_v54  ;;  %5138 = vmatpush.bf16.msrb.mxu3 %v5115_v54 }
 0x6fc   : > { %4281 = vmatpush.bf16.msra.mxu0 %v5114_v26  ;;  %5139 = vmatpush.bf16.msrb.mxu3 %v5114_v26 }
 0x701   : > { %v3721_v63 = vpop.xlane.xlu1 %3720 }
 0x702   : > { %v3745_v35 = vmul.f32 %v7013_v57, %v3721_v63 }
 0x704   : > { %v7233_v18 = vsub.f32 %v7093_v47, %v3745_v35 }
 0x705   : > { %4156 = vmatmul.bf16.gmra.mxu2 %v4060_v9 }
 0x706   : > { %v3777_v20 = vmul.f32 %v7233_v18, %v7233_v18 }
 0x708   : > { %3807 = vadd.xlane.f32.xlu1 %v3777_v20 }
 0x711   : > { %v3796_v58 = vpop.xlane.xlu2 %3795 }
 0x712   : > { %v3819_v56 = vmul.f32 %v3796_v58, %v7013_v57 }
 0x714   : > { %v3835_v42 = vadd.f32 1e-05, %v3819_v56 }
 0x716   : > { %5445 = vrsqrt.f32 %v3835_v42  ;;  %vm3929_vm15 = vweird.f32 %v3835_v42 }
 0x719   : > { %v3723_v47 = vpop.xlane.xlu2 %3722 }
 0x71a   : > { %v3746_v17 = vmul.f32 %v7013_v57, %v3723_v47 }
 0x71c   : > { %v7239_v8 = vsub.f32 %v7117_v27, %v3746_v17  ;;  %v7247_v27 = vld [vmem:[%s7628_s3] ss:$0 sm:$0xff]  ;;  %v5446_v34 = vpop.eup %5445 }
 0x71d   : > { %v3924_v25 = vmul.f32 %v5446_v34, %v3835_v42  ;;  %vm3930_vm14 = vweird.f32 %v5446_v34 }
 0x71e   : > { %v3778_v37 = vmul.f32 %v7239_v8, %v7239_v8  ;;  %vm3931_vm0 = vmor %vm3929_vm15, %vm3930_vm14 }
 0x71f   : > { %v3925_v61 = vmul.f32 %v5446_v34, %v3924_v25 }
 0x720   : > { %3809 = vadd.xlane.f32.xlu2 %v3778_v37 }
 0x721   : > { %v3926_v24 = vmul.f32 0.5, %v3925_v61 }
 0x723   : > { %v3927_v0 = vsub.f32 1.5, %v3926_v24 }
 0x725   : > { %v3928_v59 = vmul.f32 %v5446_v34, %v3927_v0 }
 0x727   : > { %v3932_v19 = vsel %vm3931_vm0, %v5446_v34, %v3928_v59 }
 0x728   : > { %v4011_v50 = vmul.f32 %v3932_v19, %v7098_v21 }
 0x72a   : > { %v4030_v20 = vmul.f32 %v7105_v30, %v4011_v50 }
 0x72c   : > { %v7259_v21 = vadd.f32 %v7111_v11, %v4030_v20 }
 0x72d   : > { %v4142_v4 = vpop.f32.mrf.mxu2 }
 0x72e   : > { %v4143_v62 = vadd.f32 %v7247_v27, %v4142_v4 }
 0x730   : > { %v4182_v15 = vmax.f32 %v4143_v62, 0.0 }
 0x735   : > { %v4144_v28 = vpop.f32.mrf.mxu2 }
 0x736   : > { %v4145_v48 = vadd.f32 %v7247_v27, %v4144_v28 }
 0x738   : > { %v4183_v29 = vmax.f32 %v4145_v48, 0.0 }
 0x73a   : > { %v4198_v55 = vpack.c.bf16 %v4183_v29, %v4182_v15 }
 0x73c   : > { %4282 = vmatmul.bf16.vlgmr.msra.gmra.mxu0 %v4198_v55 }
 0x73e   : > { %v3798_v43 = vpop.xlane.xlu0 %3797 }
 0x73f   : > { %v3820_v23 = vmul.f32 %v3798_v43, %v7013_v57 }
 0x741   : > { %v3836_v45 = vadd.f32 1e-05, %v3820_v23 }
 0x743   : > { %5447 = vrsqrt.f32 %v3836_v45  ;;  %vm3939_vm2 = vweird.f32 %v3836_v45 }
 0x749   : > { %v5448_v60 = vpop.eup %5447 }
 0x74a   : > { %v3934_v38 = vmul.f32 %v5448_v60, %v3836_v45  ;;  %vm3940_vm1 = vweird.f32 %v5448_v60 }
 0x74b   : > { %vm3941_vm3 = vmor %vm3939_vm2, %vm3940_vm1 }
 0x74c   : > { %v3935_v2 = vmul.f32 %v5448_v60, %v3934_v38 }
 0x74e   : > { %v3936_v33 = vmul.f32 0.5, %v3935_v2 }
 0x750   : > { %v3937_v14 = vsub.f32 1.5, %v3936_v33  ;;  %v3800_v31 = vpop.xlane.xlu0 %3799 }
 0x751   : > { %v3821_v22 = vmul.f32 %v3800_v31, %v7013_v57 }
 0x752   : > { %v3938_v16 = vmul.f32 %v5448_v60, %v3937_v14 }
 0x753   : > { %v3837_v63 = vadd.f32 1e-05, %v3821_v22 }
 0x754   : > { %v3942_v35 = vsel %vm3941_vm3, %v5448_v60, %v3938_v16 }
 0x755   : > { %v4012_v9 = vmul.f32 %v3942_v35, %v7134_v13  ;;  %5449 = vrsqrt.f32 %v3837_v63  ;;  %vm3949_vm5 = vweird.f32 %v3837_v63 }
 0x757   : > { %v4031_v41 = vmul.f32 %v7105_v30, %v4012_v9 }
 0x758   : > { %v3802_v36 = vpop.xlane.xlu1 %3801 }
 0x759   : > { %v3806_v7 = vpop.xlane.xlu0 %3805  ;;  %v3822_v58 = vmul.f32 %v3802_v36, %v7013_v57  ;;  %v7262_v6 = vadd.f32 %v7111_v11, %v4031_v41 }
 0x75a   : > { %v3824_v32 = vmul.f32 %v3806_v7, %v7013_v57 }
 0x75b   : > { %v5450_v47 = vpop.eup %5449  ;;  %v3838_v17 = vadd.f32 1e-05, %v3822_v58  ;;  %v4061_v13 = vpack.c.bf16 %v7262_v6, %v7259_v21 }
 0x75c   : > { %v3944_v51 = vmul.f32 %v5450_v47, %v3837_v63  ;;  %v3840_v37 = vadd.f32 1e-05, %v3824_v32  ;;  %vm3950_vm4 = vweird.f32 %v5450_v47 }
 0x75d   : > { %5451 = vrsqrt.f32 %v3838_v17  ;;  %4161 = vmatmul.bf16.gmra.mxu2 %v4061_v13  ;;  %vm3951_vm6 = vmor %vm3949_vm5, %vm3950_vm4  ;;  %vm3959_vm8 = vweird.f32 %v3838_v17 }
 0x75e   : > { %v3945_v54 = vmul.f32 %v5450_v47, %v3944_v51  ;;  %5453 = vrsqrt.f32 %v3840_v37  ;;  %vm3979_vm14 = vweird.f32 %v3840_v37 }
 0x760   : > { %v3946_v26 = vmul.f32 0.5, %v3945_v54  ;;  %v3804_v56 = vpop.xlane.xlu2 %3803 }
 0x761   : > { %v3823_v42 = vmul.f32 %v3804_v56, %v7013_v57 }
 0x762   : > { %v3947_v4 = vsub.f32 1.5, %v3946_v26 }
 0x763   : > { %v5452_v62 = vpop.eup %5451  ;;  %v3839_v28 = vadd.f32 1e-05, %v3823_v42 }
 0x764   : > { %v5454_v48 = vpop.eup %5453  ;;  %v3948_v34 = vmul.f32 %v5450_v47, %v3947_v4  ;;  %v3954_v15 = vmul.f32 %v5452_v62, %v3838_v17  ;;  %vm3960_vm7 = vweird.f32 %v5452_v62 }
 0x765   : > { %v3974_v29 = vmul.f32 %v5454_v48, %v3840_v37  ;;  %5455 = vrsqrt.f32 %v3839_v28  ;;  %vm3961_vm9 = vmor %vm3959_vm8, %vm3960_vm7  ;;  %vm3980_vm11 = vweird.f32 %v5454_v48  ;;  %vm3969_vm12 = vweird.f32 %v3839_v28 }
 0x766   : > { %v3955_v25 = vmul.f32 %v5452_v62, %v3954_v15  ;;  %v3952_v55 = vsel %vm3951_vm6, %v5450_v47, %v3948_v34  ;;  %vm3981_vm15 = vmor %vm3979_vm14, %vm3980_vm11 }
 0x767   : > { %v3975_v61 = vmul.f32 %v5454_v48, %v3974_v29  ;;  %v4013_v0 = vmul.f32 %v3952_v55, %v7157_v49 }
 0x768   : > { %v3956_v43 = vmul.f32 0.5, %v3955_v25  ;;  %v4147_v23 = vpop.f32.mrf.mxu2 }
 0x769   : > { %v3976_v60 = vmul.f32 0.5, %v3975_v61  ;;  %v4148_v14 = vadd.f32 %v7247_v27, %v4147_v23  ;;  %v4032_v31 = vmul.f32 %v7105_v30, %v4013_v0 }
 0x76a   : > { %v3957_v45 = vsub.f32 1.5, %v3956_v43 }
 0x76b   : > { %v5456_v24 = vpop.eup %5455  ;;  %v3977_v50 = vsub.f32 1.5, %v3976_v60  ;;  %v4184_v9 = vmax.f32 %v4148_v14, 0.0  ;;  %v7275_v41 = vadd.f32 %v7111_v11, %v4032_v31 }
 0x76c   : > { %v3958_v59 = vmul.f32 %v5452_v62, %v3957_v45  ;;  %v3964_v38 = vmul.f32 %v5456_v24, %v3839_v28  ;;  %vm3970_vm10 = vweird.f32 %v5456_v24 }
 0x76d   : > { %v3978_v36 = vmul.f32 %v5454_v48, %v3977_v50  ;;  %vm3971_vm13 = vmor %vm3969_vm12, %vm3970_vm10 }
 0x76e   : > { %v3962_v2 = vsel %vm3961_vm9, %v5452_v62, %v3958_v59  ;;  %v3965_v19 = vmul.f32 %v5456_v24, %v3964_v38 }
 0x76f   : > { %v4014_v33 = vmul.f32 %v3962_v2, %v7175_v12  ;;  %v3982_v17 = vsel %vm3981_vm15, %v5454_v48, %v3978_v36 }
 0x770   : > { %v3966_v22 = vmul.f32 0.5, %v3965_v19  ;;  %v4149_v16 = vpop.f32.mrf.mxu2  ;;  %v4016_v54 = vmul.f32 %v3982_v17, %v7171_v5 }
 0x771   : > { %v4150_v63 = vadd.f32 %v7247_v27, %v4149_v16  ;;  %v4033_v49 = vmul.f32 %v7105_v30, %v4014_v33 }
 0x772   : > { %v3967_v35 = vsub.f32 1.5, %v3966_v22  ;;  %v4035_v62 = vmul.f32 %v7105_v30, %v4016_v54 }
 0x773   : > { %v4185_v20 = vmax.f32 %v4150_v63, 0.0  ;;  %v7278_v12 = vadd.f32 %v7111_v11, %v4033_v49 }
 0x774   : > { %v3968_v7 = vmul.f32 %v5456_v24, %v3967_v35  ;;  %v7293_v5 = vadd.f32 %v7111_v11, %v4035_v62 }
 0x775   : > { %v4199_v58 = vpack.c.bf16 %v4185_v20, %v4184_v9  ;;  %v4062_v32 = vpack.c.bf16 %v7278_v12, %v7275_v41 }
 0x776   : > { %v3972_v47 = vsel %vm3971_vm13, %v5456_v24, %v3968_v7 }
 0x777   : > { %4166 = vmatmul.bf16.gmra.mxu2 %v4062_v32  ;;  %4287 = vmatmul.bf16.gmra.mxu0 %v4199_v58  ;;  %v4015_v51 = vmul.f32 %v3972_v47, %v7200_v40 }
 0x778   : > { %v4152_v13 = vpop.f32.mrf.mxu2 }
 0x779   : > { %v4034_v56 = vmul.f32 %v7105_v30, %v4015_v51  ;;  %v4153_v4 = vadd.f32 %v7247_v27, %v4152_v13 }
 0x77b   : > { %v3808_v26 = vpop.xlane.xlu1 %3807  ;;  %v7290_v34 = vadd.f32 %v7111_v11, %v4034_v56  ;;  %v4186_v15 = vmax.f32 %v4153_v4, 0.0 }
 0x77c   : > { %v3825_v42 = vmul.f32 %v3808_v26, %v7013_v57 }
 0x77d   : > { %v4063_v25 = vpack.c.bf16 %v7293_v5, %v7290_v34 }
 0x77e   : > { %v3841_v48 = vadd.f32 1e-05, %v3825_v42 }
 0x780   : > { %v4154_v37 = vpop.f32.mrf.mxu2  ;;  %5457 = vrsqrt.f32 %v3841_v48  ;;  %vm3989_vm1 = vweird.f32 %v3841_v48 }
 0x781   : > { %v4155_v28 = vadd.f32 %v7247_v27, %v4154_v37 }
 0x783   : > { %v4187_v40 = vmax.f32 %v4155_v28, 0.0 }
 0x785   : > { %v4200_v29 = vpack.c.bf16 %v4187_v40, %v4186_v15 }
 0x786   : > { %v5458_v61 = vpop.eup %5457 }
 0x787   : > { %4171 = vmatmul.bf16.gmra.mxu2 %v4063_v25  ;;  %4292 = vmatmul.bf16.gmra.mxu0 %v4200_v29  ;;  %v3984_v43 = vmul.f32 %v5458_v61, %v3841_v48  ;;  %vm3990_vm0 = vweird.f32 %v5458_v61 }
 0x788   : > { %v4157_v55 = vpop.f32.mrf.mxu2  ;;  %vm3991_vm2 = vmor %vm3989_vm1, %vm3990_vm0 }
 0x789   : > { %v4158_v23 = vadd.f32 %v7247_v27, %v4157_v55  ;;  %v3985_v0 = vmul.f32 %v5458_v61, %v3984_v43 }
 0x78b   : > { %v4188_v60 = vmax.f32 %v4158_v23, 0.0  ;;  %v3986_v14 = vmul.f32 0.5, %v3985_v0 }
 0x78d   : > { %v3987_v31 = vsub.f32 1.5, %v3986_v14 }
 0x78f   : > { %v3988_v22 = vmul.f32 %v5458_v61, %v3987_v31 }
 0x790   : > { %v4159_v45 = vpop.f32.mrf.mxu2 }
 0x791   : > { %v4160_v24 = vadd.f32 %v7247_v27, %v4159_v45  ;;  %v3992_v49 = vsel %vm3991_vm2, %v5458_v61, %v3988_v22 }
 0x792   : > { %v4017_v20 = vmul.f32 %v3992_v49, %v7233_v18  ;;  %v7315_v18 = vld [vmem:[%s7630_s5] ss:$0 sm:$0xff] }
 0x793   : > { %v4189_v59 = vmax.f32 %v4160_v24, 0.0  ;;  %v3810_v38 = vpop.xlane.xlu2 %3809 }
 0x794   : > { %v3826_v2 = vmul.f32 %v3810_v38, %v7013_v57  ;;  %v4036_v32 = vmul.f32 %v7105_v30, %v4017_v20 }
 0x795   : > { %v4201_v19 = vpack.c.bf16 %v4189_v59, %v4188_v60 }
 0x796   : > { %v3842_v33 = vadd.f32 1e-05, %v3826_v2  ;;  %v7305_v17 = vadd.f32 %v7111_v11, %v4036_v32 }
 0x797   : > { %4297 = vmatmul.bf16.gmra.mxu0 %v4201_v19 }
 0x798   : > { %5459 = vrsqrt.f32 %v3842_v33  ;;  %vm3999_vm4 = vweird.f32 %v3842_v33 }
 0x79e   : > { %v5460_v50 = vpop.eup %5459 }
 0x79f   : > { %v3994_v16 = vmul.f32 %v5460_v50, %v3842_v33  ;;  %vm4000_vm3 = vweird.f32 %v5460_v50 }
 0x7a0   : > { %vm4001_vm5 = vmor %vm3999_vm4, %vm4000_vm3 }
 0x7a1   : > { %v3995_v63 = vmul.f32 %v5460_v50, %v3994_v16 }
 0x7a3   : > { %v3996_v35 = vmul.f32 0.5, %v3995_v63 }
 0x7a5   : > { %v3997_v9 = vsub.f32 1.5, %v3996_v35 }
 0x7a7   : > { %v3998_v36 = vmul.f32 %v5460_v50, %v3997_v9 }
 0x7a9   : > { %v4002_v7 = vsel %vm4001_vm5, %v5460_v50, %v3998_v36 }
 0x7aa   : > { %v4018_v58 = vmul.f32 %v4002_v7, %v7239_v8 }
 0x7ac   : > { %v4037_v47 = vmul.f32 %v7105_v30, %v4018_v58 }
 0x7ae   : > { %v7308_v13 = vadd.f32 %v7111_v11, %v4037_v47 }
 0x7b0   : > { %v4064_v51 = vpack.c.bf16 %v7308_v13, %v7305_v17 }
 0x7b2   : > { %4176 = vmatmul.bf16.gmra.mxu2 %v4064_v51 }
 0x7b9   : > { %v4283_v8 = vpop.f32.mrf.mxu0 }
 0x7ba   : > { %v4284_v54 = vadd.f32 %v7315_v18, %v4283_v8 }
 0x7bc   : > { %v7319_v30 = vadd.f32 %v4284_v54, %v7123_v53 }
 0x7be   : > { %4341 = vadd.xlane.f32.xlu0 %v7319_v30 }
 0x7c1   : > { %v4285_v26 = vpop.f32.mrf.mxu0 }
 0x7c2   : > { %v4286_v11 = vadd.f32 %v7315_v18, %v4285_v26 }
 0x7c4   : > { %v7324_v56 = vadd.f32 %v4286_v11, %v7120_v1 }
 0x7c6   : > { %4343 = vadd.xlane.f32.xlu1 %v7324_v56 }
 0x7e0   : > { %v4162_v42 = vpop.f32.mrf.mxu2 }
 0x7e1   : > { %v4163_v4 = vadd.f32 %v7247_v27, %v4162_v42 }
 0x7e3   : > { %v4190_v28 = vmax.f32 %v4163_v4, 0.0 }
 0x7e8   : > { %v4164_v62 = vpop.f32.mrf.mxu2 }
 0x7e9   : > { %v4165_v37 = vadd.f32 %v7247_v27, %v4164_v62 }
 0x7eb   : > { %v4191_v48 = vmax.f32 %v4165_v37, 0.0 }
 0x7ed   : > { %v4202_v53 = vpack.c.bf16 %v4191_v48, %v4190_v28 }
 0x7ef   : > { %4302 = vmatmul.bf16.vlgmr.msrb.gmra.mxu3 %v4202_v53 }
 0x7f4   : > { %v4288_v15 = vpop.f32.mrf.mxu0 }
 0x7f5   : > { %v4289_v40 = vadd.f32 %v7315_v18, %v4288_v15 }
 0x7f7   : > { %v7331_v29 = vadd.f32 %v4289_v40, %v7178_v44 }
 0x7f9   : > { %4345 = vadd.xlane.f32.xlu2 %v7331_v29 }
 0x7fa   : > { %v4167_v1 = vpop.f32.mrf.mxu2 }
 0x7fb   : > { %v4168_v43 = vadd.f32 %v7247_v27, %v4167_v1 }
 0x7fc   : > { %v4290_v25 = vpop.f32.mrf.mxu0 }
 0x7fd   : > { %v4291_v55 = vadd.f32 %v7315_v18, %v4290_v25  ;;  %v4192_v0 = vmax.f32 %v4168_v43, 0.0 }
 0x7ff   : > { %v7336_v61 = vadd.f32 %v4291_v55, %v7181_v46 }
 0x801   : > { %4347 = vadd.xlane.f32.xlu0 %v7336_v61 }
 0x802   : > { %v4169_v23 = vpop.f32.mrf.mxu2 }
 0x803   : > { %v4170_v45 = vadd.f32 %v7247_v27, %v4169_v23 }
 0x804   : > { %v4293_v24 = vpop.f32.mrf.mxu0 }
 0x805   : > { %v4193_v44 = vmax.f32 %v4170_v45, 0.0  ;;  %v4294_v60 = vadd.f32 %v7315_v18, %v4293_v24 }
 0x807   : > { %v4203_v59 = vpack.c.bf16 %v4193_v44, %v4192_v0  ;;  %v7343_v38 = vadd.f32 %v4294_v60, %v7212_v52 }
 0x809   : > { %4349 = vadd.xlane.f32.xlu1 %v7343_v38  ;;  %4307 = vmatmul.bf16.gmra.mxu3 %v4203_v59 }
 0x80a   : > { %v4172_v46 = vpop.f32.mrf.mxu2 }
 0x80b   : > { %v4173_v14 = vadd.f32 %v7247_v27, %v4172_v46 }
 0x80c   : > { %v4295_v2 = vpop.f32.mrf.mxu0 }
 0x80d   : > { %v4296_v19 = vadd.f32 %v7315_v18, %v4295_v2  ;;  %v4194_v52 = vmax.f32 %v4173_v14, 0.0 }
 0x80f   : > { %v7348_v33 = vadd.f32 %v4296_v19, %v7207_v39 }
 0x811   : > { %4351 = vadd.xlane.f32.xlu2 %v7348_v33 }
 0x812   : > { %v4174_v31 = vpop.f32.mrf.mxu2 }
 0x813   : > { %v4175_v50 = vadd.f32 %v7247_v27, %v4174_v31 }
 0x814   : > { %v4298_v22 = vpop.f32.mrf.mxu0 }
 0x815   : > { %v4195_v16 = vmax.f32 %v4175_v50, 0.0  ;;  %v4299_v63 = vadd.f32 %v7315_v18, %v4298_v22 }
 0x817   : > { %v4204_v49 = vpack.c.bf16 %v4195_v16, %v4194_v52  ;;  %v4329_v35 = vadd.f32 %v4299_v63, %v7224_v10 }
 0x819   : > { %4353 = vadd.xlane.f32.xlu0 %v4329_v35  ;;  %4312 = vmatmul.bf16.gmra.mxu3 %v4204_v49 }
 0x81c   : > { %v4300_v9 = vpop.f32.mrf.mxu0 }
 0x81d   : > { %v4301_v39 = vadd.f32 %v7315_v18, %v4300_v9 }
 0x81f   : > { %v7357_v20 = vadd.f32 %v4301_v39, %v7227_v3 }
 0x821   : > { %4355 = vadd.xlane.f32.xlu1 %v7357_v20 }
 0x835   : > { %v4177_v36 = vpop.f32.mrf.mxu2 }
 0x836   : > { %v4178_v7 = vadd.f32 %v7247_v27, %v4177_v36 }
 0x838   : > { %v4196_v47 = vmax.f32 %v4178_v7, 0.0 }
 0x839   : > { %v4344_v44 = vpop.xlane.xlu1 %4343 }
 0x83d   : > { %v4179_v58 = vpop.f32.mrf.mxu2 }
 0x83e   : > { %v4180_v32 = vadd.f32 %v7247_v27, %v4179_v58 }
 0x840   : > { %v4197_v51 = vmax.f32 %v4180_v32, 0.0 }
 0x842   : > { %v4205_v8 = vpack.c.bf16 %v4197_v51, %v4196_v47 }
 0x844   : > { %4317 = vmatmul.bf16.gmra.mxu3 %v4205_v8 }
 0x86c   : > { %v4346_v19 = vpop.xlane.xlu2 %4345 }
 0x86d   : > { %v4375_v22 = vmul.f32 %v4346_v19, %v7013_v57 }
 0x872   : > { %v4303_v10 = vpop.f32.mrf.mxu3 }
 0x873   : > { %v4304_v54 = vadd.f32 %v7315_v18, %v4303_v10 }
 0x875   : > { %v7364_v26 = vadd.f32 %v4304_v54, %v7259_v21 }
 0x877   : > { %4357 = vadd.xlane.f32.xlu2 %v7364_v26 }
 0x87a   : > { %v4305_v3 = vpop.f32.mrf.mxu3 }
 0x87b   : > { %v4306_v11 = vadd.f32 %v7315_v18, %v4305_v3 }
 0x87c   : > { %v4350_v14 = vpop.xlane.xlu1 %4349 }
 0x87d   : > { %v7369_v42 = vadd.f32 %v4306_v11, %v7262_v6  ;;  %v4377_v52 = vmul.f32 %v4350_v14, %v7013_v57 }
 0x87f   : > { %4359 = vadd.xlane.f32.xlu0 %v7369_v42  ;;  %v7431_v63 = vsub.f32 %v7343_v38, %v4377_v52 }
 0x88c   : > { %v4308_v27 = vpop.f32.mrf.mxu3 }
 0x88d   : > { %v4309_v4 = vadd.f32 %v7315_v18, %v4308_v27 }
 0x88f   : > { %v7374_v62 = vadd.f32 %v4309_v4, %v7275_v41  ;;  %v4342_v41 = vpop.xlane.xlu0 %4341 }
 0x890   : > { %v4373_v1 = vmul.f32 %v4342_v41, %v7013_v57 }
 0x891   : > { %4361 = vadd.xlane.f32.xlu1 %v7374_v62 }
 0x894   : > { %v4310_v21 = vpop.f32.mrf.mxu3  ;;  %v4356_v49 = vpop.xlane.xlu1 %4355 }
 0x895   : > { %v4311_v37 = vadd.f32 %v7315_v18, %v4310_v21  ;;  %v4380_v9 = vmul.f32 %v4356_v49, %v7013_v57 }
 0x897   : > { %v7379_v28 = vadd.f32 %v4311_v37, %v7278_v12  ;;  %v7394_v12 = vsub.f32 %v7319_v30, %v4373_v1  ;;  %v4348_v55 = vpop.xlane.xlu0 %4347  ;;  %v7443_v38 = vsub.f32 %v7357_v20, %v4380_v9 }
 0x899   : > { %4363 = vadd.xlane.f32.xlu2 %v7379_v28  ;;  %v4405_v43 = vmul.f32 %v7394_v12, %v7394_v12  ;;  %v4412_v36 = vmul.f32 %v7443_v38, %v7443_v38 }
 0x89c   : > { %v4313_v6 = vpop.f32.mrf.mxu3 }
 0x89d   : > { %v4314_v48 = vadd.f32 %v7315_v18, %v4313_v6 }
 0x89f   : > { %v7384_v53 = vadd.f32 %v4314_v48, %v7290_v34  ;;  %v4376_v34 = vmul.f32 %v4348_v55, %v7013_v57  ;;  %v4354_v45 = vpop.xlane.xlu0 %4353 }
 0x8a0   : > { %v4379_v24 = vmul.f32 %v4354_v45, %v7013_v57 }
 0x8a1   : > { %4365 = vadd.xlane.f32.xlu0 %v7384_v53  ;;  %v7400_v23 = vsub.f32 %v7336_v61, %v4376_v34  ;;  %v4374_v61 = vmul.f32 %v4344_v44, %v7013_v57 }
 0x8a2   : > { %v7405_v0 = vsub.f32 %v4329_v35, %v4379_v24 }
 0x8a3   : > { %v7416_v2 = vsub.f32 %v7324_v56, %v4374_v61  ;;  %v7428_v56 = vsub.f32 %v7331_v29, %v4375_v22 }
 0x8a4   : > { %v4315_v15 = vpop.f32.mrf.mxu3  ;;  %v4411_v30 = vmul.f32 %v7405_v0, %v7405_v0 }
 0x8a5   : > { %v4316_v40 = vadd.f32 %v7315_v18, %v4315_v15  ;;  %v4407_v39 = vmul.f32 %v7428_v56, %v7428_v56 }
 0x8a7   : > { %v7390_v25 = vadd.f32 %v4316_v40, %v7293_v5  ;;  %v4408_v5 = vmul.f32 %v7400_v23, %v7400_v23 }
 0x8a9   : > { %4367 = vadd.xlane.f32.xlu1 %v7390_v25 }
 0x8b1   : > { %4421 = vadd.xlane.f32.xlu1 %v4405_v43 }
 0x8b9   : > { %4427 = vadd.xlane.f32.xlu1 %v4408_v5 }
 0x8c1   : > { %4433 = vadd.xlane.f32.xlu1 %v4411_v30 }
 0x8c7   : > { %v4318_v60 = vpop.f32.mrf.mxu3 }
 0x8c8   : > { %v4319_v59 = vadd.f32 %v7315_v18, %v4318_v60 }
 0x8ca   : > { %v7412_v46 = vadd.f32 %v4319_v59, %v7305_v17  ;;  %v4406_v17 = vmul.f32 %v7416_v2, %v7416_v2 }
 0x8cc   : > { %4369 = vadd.xlane.f32.xlu2 %v7412_v46 }
 0x8cf   : > { %v4320_v31 = vpop.f32.mrf.mxu3 }
 0x8d0   : > { %v4321_v50 = vadd.f32 %v7315_v18, %v4320_v31  ;;  %v4352_v18 = vpop.xlane.xlu2 %4351 }
 0x8d1   : > { %v4378_v35 = vmul.f32 %v4352_v18, %v7013_v57 }
 0x8d2   : > { %v7422_v16 = vadd.f32 %v4321_v50, %v7308_v13  ;;  %v4409_v13 = vmul.f32 %v7431_v63, %v7431_v63  ;;  %v7491_v50 = vld [vmem:[%s7633_s8] ss:$0 sm:$0xff] }
 0x8d3   : > { %v7440_v29 = vsub.f32 %v7348_v33, %v4378_v35 }
 0x8d4   : > { %4371 = vadd.xlane.f32.xlu0 %v7422_v16  ;;  %4423 = vadd.xlane.f32.xlu2 %v4406_v17  ;;  %v7496_v17 = vld [vmem:[%s7634_s9] ss:$0 sm:$0xff] }
 0x8d5   : > { %v4410_v7 = vmul.f32 %v7440_v29, %v7440_v29 }
 0x8dc   : > { %4429 = vadd.xlane.f32.xlu2 %v4409_v13  ;;  %4425 = vadd.xlane.f32.xlu0 %v4407_v39 }
 0x8e4   : > { %4435 = vadd.xlane.f32.xlu2 %v4412_v36  ;;  %4431 = vadd.xlane.f32.xlu0 %v4410_v7 }
 0x8ea   : > { %v4358_v58 = vpop.xlane.xlu2 %4357 }
 0x8eb   : > { %v4381_v32 = vmul.f32 %v4358_v58, %v7013_v57 }
 0x8ed   : > { %v7451_v47 = vsub.f32 %v7364_v26, %v4381_v32 }
 0x8ef   : > { %v4413_v33 = vmul.f32 %v7451_v47, %v7451_v47 }
 0x8f1   : > { %4437 = vadd.xlane.f32.xlu0 %v4413_v33 }
 0x8f2   : > { %v4360_v20 = vpop.xlane.xlu0 %4359 }
 0x8f3   : > { %v4382_v51 = vmul.f32 %v4360_v20, %v7013_v57 }
 0x8f5   : > { %v7457_v8 = vsub.f32 %v7369_v42, %v4382_v51 }
 0x8f7   : > { %v4414_v10 = vmul.f32 %v7457_v8, %v7457_v8 }
 0x8f9   : > { %4439 = vadd.xlane.f32.xlu1 %v4414_v10 }
 0x904   : > { %v4362_v54 = vpop.xlane.xlu1 %4361 }
 0x905   : > { %v4383_v3 = vmul.f32 %v4362_v54, %v7013_v57 }
 0x907   : > { %v7463_v26 = vsub.f32 %v7374_v62, %v4383_v3 }
 0x909   : > { %v4415_v11 = vmul.f32 %v7463_v26, %v7463_v26 }
 0x90b   : > { %4441 = vadd.xlane.f32.xlu2 %v4415_v11 }
 0x90c   : > { %v4364_v27 = vpop.xlane.xlu2 %4363 }
 0x90d   : > { %v4384_v4 = vmul.f32 %v4364_v27, %v7013_v57 }
 0x90f   : > { %v7469_v42 = vsub.f32 %v7379_v28, %v4384_v4 }
 0x911   : > { %v4416_v21 = vmul.f32 %v7469_v42, %v7469_v42 }
 0x913   : > { %4443 = vadd.xlane.f32.xlu0 %v4416_v21 }
 0x914   : > { %v4366_v37 = vpop.xlane.xlu0 %4365 }
 0x915   : > { %v4385_v6 = vmul.f32 %v4366_v37, %v7013_v57 }
 0x917   : > { %v7475_v62 = vsub.f32 %v7384_v53, %v4385_v6 }
 0x919   : > { %v4417_v48 = vmul.f32 %v7475_v62, %v7475_v62 }
 0x91b   : > { %4445 = vadd.xlane.f32.xlu1 %v4417_v48 }
 0x91c   : > { %v4368_v41 = vpop.xlane.xlu1 %4367 }
 0x91d   : > { %v4386_v15 = vmul.f32 %v4368_v41, %v7013_v57 }
 0x91f   : > { %v7481_v28 = vsub.f32 %v7390_v25, %v4386_v15 }
 0x921   : > { %v4418_v40 = vmul.f32 %v7481_v28, %v7481_v28 }
 0x923   : > { %4447 = vadd.xlane.f32.xlu2 %v4418_v40 }
 0x924   : > { %v4422_v1 = vpop.xlane.xlu1 %4421 }
 0x925   : > { %v4453_v55 = vmul.f32 %v4422_v1, %v7013_v57 }
 0x927   : > { %v4469_v34 = vadd.f32 1e-05, %v4453_v55 }
 0x929   : > { %5461 = vrsqrt.f32 %v4469_v34  ;;  %vm4491_vm7 = vweird.f32 %v4469_v34 }
 0x92c   : > { %v4428_v53 = vpop.xlane.xlu1 %4427 }
 0x92d   : > { %v4456_v43 = vmul.f32 %v4428_v53, %v7013_v57 }
 0x92f   : > { %v5462_v45 = vpop.eup %5461  ;;  %v4472_v24 = vadd.f32 1e-05, %v4456_v43 }
 0x930   : > { %v4486_v5 = vmul.f32 %v5462_v45, %v4469_v34  ;;  %vm4492_vm6 = vweird.f32 %v5462_v45 }
 0x931   : > { %5463 = vrsqrt.f32 %v4472_v24  ;;  %vm4493_vm8 = vmor %vm4491_vm7, %vm4492_vm6  ;;  %vm4521_vm10 = vweird.f32 %v4472_v24 }
 0x932   : > { %v4487_v30 = vmul.f32 %v5462_v45, %v4486_v5 }
 0x934   : > { %v4488_v44 = vmul.f32 0.5, %v4487_v30  ;;  %v4434_v25 = vpop.xlane.xlu1 %4433 }
 0x935   : > { %v4459_v60 = vmul.f32 %v4434_v25, %v7013_v57 }
 0x936   : > { %v4489_v59 = vsub.f32 1.5, %v4488_v44 }
 0x937   : > { %v5464_v61 = vpop.eup %5463  ;;  %v4475_v19 = vadd.f32 1e-05, %v4459_v60 }
 0x938   : > { %v4490_v14 = vmul.f32 %v5462_v45, %v4489_v59  ;;  %v4516_v31 = vmul.f32 %v5464_v61, %v4472_v24  ;;  %vm4522_vm9 = vweird.f32 %v5464_v61 }
 0x939   : > { %5465 = vrsqrt.f32 %v4475_v19  ;;  %vm4523_vm11 = vmor %vm4521_vm10, %vm4522_vm9  ;;  %vm4551_vm13 = vweird.f32 %v4475_v19 }
 0x93a   : > { %v4494_v22 = vsel %vm4493_vm8, %v5462_v45, %v4490_v14  ;;  %v4517_v52 = vmul.f32 %v5464_v61, %v4516_v31 }
 0x93b   : > { %v4645_v18 = vmul.f32 %v4494_v22, %v7394_v12 }
 0x93c   : > { %v4518_v49 = vmul.f32 0.5, %v4517_v52 }
 0x93d   : > { %v4664_v35 = vmul.f32 %v7491_v50, %v4645_v18 }
 0x93e   : > { %v4519_v9 = vsub.f32 1.5, %v4518_v49 }
 0x93f   : > { %v5466_v13 = vpop.eup %5465  ;;  %v4683_v39 = vadd.f32 %v7496_v17, %v4664_v35  ;;  %v4370_v36 = vpop.xlane.xlu2 %4369 }
 0x940   : > { %v4520_v7 = vmul.f32 %v5464_v61, %v4519_v9  ;;  %v4546_v58 = vmul.f32 %v5466_v13, %v4475_v19  ;;  %v4387_v32 = vmul.f32 %v4370_v36, %v7013_v57  ;;  %vm4552_vm12 = vweird.f32 %v5466_v13 }
 0x941   : > { %4699 = vst [vmem:[%s7504_s24] sm:$0xff] %v4683_v39  ;;  %vm4553_vm14 = vmor %vm4551_vm13, %vm4552_vm12 }
 0x942   : > { %v4524_v12 = vsel %vm4523_vm11, %v5464_v61, %v4520_v7  ;;  %v4547_v33 = vmul.f32 %v5466_v13, %v4546_v58  ;;  %v7508_v20 = vsub.f32 %v7412_v46, %v4387_v32 }
 0x943   : > { %v4648_v51 = vmul.f32 %v4524_v12, %v7400_v23 }
 0x944   : > { %v4548_v10 = vmul.f32 0.5, %v4547_v33  ;;  %v4419_v54 = vmul.f32 %v7508_v20, %v7508_v20 }
 0x945   : > { %v4667_v3 = vmul.f32 %v7491_v50, %v4648_v51 }
 0x946   : > { %v4549_v11 = vsub.f32 1.5, %v4548_v10  ;;  %4449 = vadd.xlane.f32.xlu0 %v4419_v54 }
 0x947   : > { %v4686_v27 = vadd.f32 %v7496_v17, %v4667_v3  ;;  %v4372_v4 = vpop.xlane.xlu0 %4371  ;;  %v4424_v21 = vpop.xlane.xlu2 %4423 }
 0x948   : > { %v4550_v37 = vmul.f32 %v5466_v13, %v4549_v11  ;;  %v4388_v46 = vmul.f32 %v4372_v4, %v7013_v57  ;;  %v4454_v6 = vmul.f32 %v4424_v21, %v7013_v57 }
 0x949   : > { %4702 = vst [vmem:[%s7504_s24 + $0x18] sm:$0xff] %v4686_v27 }
 0x94a   : > { %v4554_v23 = vsel %vm4553_vm14, %v5466_v13, %v4550_v37  ;;  %v7519_v48 = vsub.f32 %v7422_v16, %v4388_v46  ;;  %v4470_v41 = vadd.f32 1e-05, %v4454_v6 }
 0x94b   : > { %v4651_v15 = vmul.f32 %v4554_v23, %v7405_v0 }
 0x94c   : > { %5467 = vrsqrt.f32 %v4470_v41  ;;  %v4420_v40 = vmul.f32 %v7519_v48, %v7519_v48  ;;  %vm4501_vm0 = vweird.f32 %v4470_v41 }
 0x94d   : > { %v4670_v1 = vmul.f32 %v7491_v50, %v4651_v15 }
 0x94e   : > { %4451 = vadd.xlane.f32.xlu1 %v4420_v40 }
 0x94f   : > { %v4689_v55 = vadd.f32 %v7496_v17, %v4670_v1  ;;  %v4426_v34 = vpop.xlane.xlu0 %4425  ;;  %v4430_v53 = vpop.xlane.xlu2 %4429 }
 0x950   : > { %v4455_v43 = vmul.f32 %v4426_v34, %v7013_v57  ;;  %v4457_v45 = vmul.f32 %v4430_v53, %v7013_v57 }
 0x951   : > { %4705 = vst [vmem:[%s7504_s24 + $0x30] sm:$0xff] %v4689_v55 }
 0x952   : > { %v5468_v16 = vpop.eup %5467  ;;  %v4471_v24 = vadd.f32 1e-05, %v4455_v43  ;;  %v4473_v5 = vadd.f32 1e-05, %v4457_v45 }
 0x953   : > { %v4496_v0 = vmul.f32 %v5468_v16, %v4470_v41  ;;  %vm4502_vm15 = vweird.f32 %v5468_v16 }
 0x954   : > { %5469 = vrsqrt.f32 %v4471_v24  ;;  %vm4503_vm1 = vmor %vm4501_vm0, %vm4502_vm15  ;;  %vm4511_vm4 = vweird.f32 %v4471_v24  ;;  %vm4531_vm6 = vweird.f32 %v4473_v5 }
 0x955   : > { %v4497_v30 = vmul.f32 %v5468_v16, %v4496_v0  ;;  %5471 = vrsqrt.f32 %v4473_v5 }
 0x957   : > { %v4498_v44 = vmul.f32 0.5, %v4497_v30  ;;  %v4432_v25 = vpop.xlane.xlu0 %4431  ;;  %v4436_v60 = vpop.xlane.xlu2 %4435 }
 0x958   : > { %v4458_v59 = vmul.f32 %v4432_v25, %v7013_v57  ;;  %v4460_v61 = vmul.f32 %v4436_v60, %v7013_v57 }
 0x959   : > { %v4499_v19 = vsub.f32 1.5, %v4498_v44 }
 0x95a   : > { %v5470_v14 = vpop.eup %5469  ;;  %v4474_v31 = vadd.f32 1e-05, %v4458_v59  ;;  %v4476_v22 = vadd.f32 1e-05, %v4460_v61 }
 0x95b   : > { %v5472_v52 = vpop.eup %5471  ;;  %v4500_v18 = vmul.f32 %v5468_v16, %v4499_v19  ;;  %v4506_v49 = vmul.f32 %v5470_v14, %v4471_v24  ;;  %vm4512_vm2 = vweird.f32 %v5470_v14 }
 0x95c   : > { %v4526_v35 = vmul.f32 %v5472_v52, %v4473_v5  ;;  %5473 = vrsqrt.f32 %v4474_v31  ;;  %vm4532_vm3 = vweird.f32 %v5472_v52  ;;  %vm4513_vm5 = vmor %vm4511_vm4, %vm4512_vm2  ;;  %vm4541_vm10 = vweird.f32 %v4474_v31 }
 0x95d   : > { %v4504_v9 = vsel %vm4503_vm1, %v5468_v16, %v4500_v18  ;;  %v4507_v13 = vmul.f32 %v5470_v14, %v4506_v49  ;;  %5475 = vrsqrt.f32 %v4476_v22  ;;  %vm4533_vm7 = vmor %vm4531_vm6, %vm4532_vm3  ;;  %vm4561_vm12 = vweird.f32 %v4476_v22 }
 0x95e   : > { %v4646_v39 = vmul.f32 %v4504_v9, %v7416_v2  ;;  %v4527_v36 = vmul.f32 %v5472_v52, %v4526_v35 }
 0x95f   : > { %v4508_v7 = vmul.f32 0.5, %v4507_v13 }
 0x960   : > { %v4665_v58 = vmul.f32 %v7491_v50, %v4646_v39  ;;  %v4528_v32 = vmul.f32 0.5, %v4527_v36 }
 0x961   : > { %v4509_v12 = vsub.f32 1.5, %v4508_v7 }
 0x962   : > { %v5474_v33 = vpop.eup %5473  ;;  %v4684_v51 = vadd.f32 %v7496_v17, %v4665_v58  ;;  %v4529_v10 = vsub.f32 1.5, %v4528_v32 }
 0x963   : > { %v5476_v54 = vpop.eup %5475  ;;  %v4510_v3 = vmul.f32 %v5470_v14, %v4509_v12  ;;  %v4536_v11 = vmul.f32 %v5474_v33, %v4474_v31  ;;  %vm4542_vm8 = vweird.f32 %v5474_v33 }
 0x964   : > { %4700 = vst [vmem:[%s7504_s24 + $0x8] sm:$0xff] %v4684_v51  ;;  %v4530_v27 = vmul.f32 %v5472_v52, %v4529_v10  ;;  %v4556_v2 = vmul.f32 %v5476_v54, %v4476_v22  ;;  %v4438_v4 = vpop.xlane.xlu0 %4437  ;;  %vm4562_vm9 = vweird.f32 %v5476_v54  ;;  %vm4543_vm11 = vmor %vm4541_vm10, %vm4542_vm8 }
 0x965   : > { %v4514_v21 = vsel %vm4513_vm5, %v5470_v14, %v4510_v3  ;;  %v4537_v37 = vmul.f32 %v5474_v33, %v4536_v11  ;;  %v4461_v46 = vmul.f32 %v4438_v4, %v7013_v57  ;;  %vm4563_vm13 = vmor %vm4561_vm12, %vm4562_vm9 }
 0x966   : > { %v4647_v6 = vmul.f32 %v4514_v21, %v7428_v56  ;;  %v4534_v23 = vsel %vm4533_vm7, %v5472_v52, %v4530_v27  ;;  %v4557_v41 = vmul.f32 %v5476_v54, %v4556_v2 }
 0x967   : > { %v4649_v15 = vmul.f32 %v4534_v23, %v7431_v63  ;;  %v4538_v40 = vmul.f32 0.5, %v4537_v37  ;;  %v4477_v1 = vadd.f32 1e-05, %v4461_v46 }
 0x968   : > { %v4666_v55 = vmul.f32 %v7491_v50, %v4647_v6  ;;  %v4558_v34 = vmul.f32 0.5, %v4557_v41 }
 0x969   : > { %v4668_v53 = vmul.f32 %v7491_v50, %v4649_v15  ;;  %v4539_v43 = vsub.f32 1.5, %v4538_v40  ;;  %5477 = vrsqrt.f32 %v4477_v1  ;;  %vm4571_vm15 = vweird.f32 %v4477_v1 }
 0x96a   : > { %v4685_v45 = vadd.f32 %v7496_v17, %v4666_v55  ;;  %v4559_v16 = vsub.f32 1.5, %v4558_v34 }
 0x96b   : > { %v4687_v56 = vadd.f32 %v7496_v17, %v4668_v53  ;;  %v4540_v24 = vmul.f32 %v5474_v33, %v4539_v43 }
 0x96c   : > { %4701 = vst [vmem:[%s7504_s24 + $0x10] sm:$0xff] %v4685_v45  ;;  %v4560_v63 = vmul.f32 %v5476_v54, %v4559_v16  ;;  %v4440_v5 = vpop.xlane.xlu1 %4439 }
 0x96d   : > { %4703 = vst [vmem:[%s7504_s24 + $0x20] sm:$0xff] %v4687_v56  ;;  %v4544_v0 = vsel %vm4543_vm11, %v5474_v33, %v4540_v24  ;;  %v4462_v30 = vmul.f32 %v4440_v5, %v7013_v57 }
 0x96e   : > { %v4650_v44 = vmul.f32 %v4544_v0, %v7440_v29  ;;  %v4564_v25 = vsel %vm4563_vm13, %v5476_v54, %v4560_v63 }
 0x96f   : > { %v5478_v60 = vpop.eup %5477  ;;  %v4652_v59 = vmul.f32 %v4564_v25, %v7443_v38  ;;  %v4478_v61 = vadd.f32 1e-05, %v4462_v30 }
 0x970   : > { %v4669_v19 = vmul.f32 %v7491_v50, %v4650_v44  ;;  %v4566_v14 = vmul.f32 %v5478_v60, %v4477_v1  ;;  %vm4572_vm14 = vweird.f32 %v5478_v60 }
 0x971   : > { %v4671_v31 = vmul.f32 %v7491_v50, %v4652_v59  ;;  %5479 = vrsqrt.f32 %v4478_v61  ;;  %vm4573_vm0 = vmor %vm4571_vm15, %vm4572_vm14  ;;  %vm4581_vm2 = vweird.f32 %v4478_v61 }
 0x972   : > { %v4688_v22 = vadd.f32 %v7496_v17, %v4669_v19  ;;  %v4567_v52 = vmul.f32 %v5478_v60, %v4566_v14 }
 0x973   : > { %v4690_v18 = vadd.f32 %v7496_v17, %v4671_v31 }
 0x974   : > { %4704 = vst [vmem:[%s7504_s24 + $0x28] sm:$0xff] %v4688_v22  ;;  %v4568_v49 = vmul.f32 0.5, %v4567_v52 }
 0x975   : > { %4706 = vst [vmem:[%s7504_s24 + $0x38] sm:$0xff] %v4690_v18 }
 0x976   : > { %v4569_v29 = vsub.f32 1.5, %v4568_v49 }
 0x977   : > { %v5480_v35 = vpop.eup %5479 }
 0x978   : > { %v4570_v9 = vmul.f32 %v5478_v60, %v4569_v29  ;;  %v4576_v38 = vmul.f32 %v5480_v35, %v4478_v61  ;;  %vm4582_vm1 = vweird.f32 %v5480_v35 }
 0x979   : > { %vm4583_vm3 = vmor %vm4581_vm2, %vm4582_vm1 }
 0x97a   : > { %v4574_v13 = vsel %vm4573_vm0, %v5478_v60, %v4570_v9  ;;  %v4577_v39 = vmul.f32 %v5480_v35, %v4576_v38 }
 0x97b   : > { %v4653_v36 = vmul.f32 %v4574_v13, %v7451_v47 }
 0x97c   : > { %v4578_v7 = vmul.f32 0.5, %v4577_v39 }
 0x97d   : > { %v4672_v58 = vmul.f32 %v7491_v50, %v4653_v36 }
 0x97e   : > { %v4579_v32 = vsub.f32 1.5, %v4578_v7  ;;  %v4442_v12 = vpop.xlane.xlu2 %4441 }
 0x97f   : > { %v4691_v33 = vadd.f32 %v7496_v17, %v4672_v58  ;;  %v4463_v51 = vmul.f32 %v4442_v12, %v7013_v57 }
 0x980   : > { %v4580_v10 = vmul.f32 %v5480_v35, %v4579_v32 }
 0x981   : > { %4707 = vst [vmem:[%s7504_s24 + $0x40] sm:$0xff] %v4691_v33  ;;  %v4479_v54 = vadd.f32 1e-05, %v4463_v51 }
 0x982   : > { %v4584_v3 = vsel %vm4583_vm3, %v5480_v35, %v4580_v10 }
 0x983   : > { %v4654_v11 = vmul.f32 %v4584_v3, %v7457_v8  ;;  %5481 = vrsqrt.f32 %v4479_v54  ;;  %vm4591_vm5 = vweird.f32 %v4479_v54 }
 0x985   : > { %v4673_v47 = vmul.f32 %v7491_v50, %v4654_v11 }
 0x986   : > { %v4444_v27 = vpop.xlane.xlu0 %4443 }
 0x987   : > { %v4692_v2 = vadd.f32 %v7496_v17, %v4673_v47  ;;  %v4464_v4 = vmul.f32 %v4444_v27, %v7013_v57 }
 0x989   : > { %v5482_v21 = vpop.eup %5481  ;;  %4708 = vst [vmem:[%s7504_s24 + $0x48] sm:$0xff] %v4692_v2  ;;  %v4480_v37 = vadd.f32 1e-05, %v4464_v4 }
 0x98a   : > { %v4586_v46 = vmul.f32 %v5482_v21, %v4479_v54  ;;  %vm4592_vm4 = vweird.f32 %v5482_v21 }
 0x98b   : > { %5483 = vrsqrt.f32 %v4480_v37  ;;  %vm4593_vm6 = vmor %vm4591_vm5, %vm4592_vm4  ;;  %vm4601_vm8 = vweird.f32 %v4480_v37 }
 0x98c   : > { %v4587_v6 = vmul.f32 %v5482_v21, %v4586_v46 }
 0x98e   : > { %v4588_v23 = vmul.f32 0.5, %v4587_v6  ;;  %v4446_v41 = vpop.xlane.xlu1 %4445 }
 0x98f   : > { %v4465_v15 = vmul.f32 %v4446_v41, %v7013_v57 }
 0x990   : > { %v4589_v40 = vsub.f32 1.5, %v4588_v23 }
 0x991   : > { %v5484_v8 = vpop.eup %5483  ;;  %v4481_v1 = vadd.f32 1e-05, %v4465_v15 }
 0x992   : > { %v4590_v55 = vmul.f32 %v5482_v21, %v4589_v40  ;;  %v4596_v34 = vmul.f32 %v5484_v8, %v4480_v37  ;;  %vm4602_vm7 = vweird.f32 %v5484_v8 }
 0x993   : > { %5485 = vrsqrt.f32 %v4481_v1  ;;  %vm4603_vm9 = vmor %vm4601_vm8, %vm4602_vm7  ;;  %vm4611_vm11 = vweird.f32 %v4481_v1 }
 0x994   : > { %v4594_v53 = vsel %vm4593_vm6, %v5482_v21, %v4590_v55  ;;  %v4597_v43 = vmul.f32 %v5484_v8, %v4596_v34 }
 0x995   : > { %v4655_v45 = vmul.f32 %v4594_v53, %v7463_v26 }
 0x996   : > { %v4598_v16 = vmul.f32 0.5, %v4597_v43  ;;  %v4448_v56 = vpop.xlane.xlu2 %4447 }
 0x997   : > { %v4674_v24 = vmul.f32 %v7491_v50, %v4655_v45  ;;  %v4466_v63 = vmul.f32 %v4448_v56, %v7013_v57 }
 0x998   : > { %v4599_v5 = vsub.f32 1.5, %v4598_v16 }
 0x999   : > { %v5486_v0 = vpop.eup %5485  ;;  %v4693_v30 = vadd.f32 %v7496_v17, %v4674_v24  ;;  %v4482_v44 = vadd.f32 1e-05, %v4466_v63 }
 0x99a   : > { %v4600_v25 = vmul.f32 %v5484_v8, %v4599_v5  ;;  %v4606_v60 = vmul.f32 %v5486_v0, %v4481_v1  ;;  %vm4612_vm10 = vweird.f32 %v5486_v0 }
 0x99b   : > { %4709 = vst [vmem:[%s7504_s24 + $0x50] sm:$0xff] %v4693_v30  ;;  %5487 = vrsqrt.f32 %v4482_v44  ;;  %vm4613_vm12 = vmor %vm4611_vm11, %vm4612_vm10  ;;  %vm4621_vm14 = vweird.f32 %v4482_v44 }
 0x99c   : > { %v4604_v26 = vsel %vm4603_vm9, %v5484_v8, %v4600_v25  ;;  %v4607_v59 = vmul.f32 %v5486_v0, %v4606_v60 }
 0x99d   : > { %v4656_v61 = vmul.f32 %v4604_v26, %v7469_v42 }
 0x99e   : > { %v4608_v19 = vmul.f32 0.5, %v4607_v59 }
 0x99f   : > { %v4675_v14 = vmul.f32 %v7491_v50, %v4656_v61 }
 0x9a0   : > { %v4609_v31 = vsub.f32 1.5, %v4608_v19 }
 0x9a1   : > { %v5488_v22 = vpop.eup %5487  ;;  %v4694_v52 = vadd.f32 %v7496_v17, %v4675_v14 }
 0x9a2   : > { %v4610_v18 = vmul.f32 %v5486_v0, %v4609_v31  ;;  %v4616_v49 = vmul.f32 %v5488_v22, %v4482_v44  ;;  %vm4622_vm13 = vweird.f32 %v5488_v22 }
 0x9a3   : > { %4710 = vst [vmem:[%s7504_s24 + $0x58] sm:$0xff] %v4694_v52  ;;  %vm4623_vm15 = vmor %vm4621_vm14, %vm4622_vm13 }
 0x9a4   : > { %v4614_v29 = vsel %vm4613_vm12, %v5486_v0, %v4610_v18  ;;  %v4617_v35 = vmul.f32 %v5488_v22, %v4616_v49 }
 0x9a5   : > { %v4657_v9 = vmul.f32 %v4614_v29, %v7475_v62 }
 0x9a6   : > { %v4618_v42 = vmul.f32 0.5, %v4617_v35 }
 0x9a7   : > { %v4676_v38 = vmul.f32 %v7491_v50, %v4657_v9 }
 0x9a8   : > { %v4619_v13 = vsub.f32 1.5, %v4618_v42 }
 0x9a9   : > { %v4695_v39 = vadd.f32 %v7496_v17, %v4676_v38 }
 0x9aa   : > { %v4620_v36 = vmul.f32 %v5488_v22, %v4619_v13 }
 0x9ab   : > { %4711 = vst [vmem:[%s7504_s24 + $0x60] sm:$0xff] %v4695_v39 }
 0x9ac   : > { %v4624_v7 = vsel %vm4623_vm15, %v5488_v22, %v4620_v36 }
 0x9ad   : > { %v4658_v58 = vmul.f32 %v4624_v7, %v7481_v28 }
 0x9af   : > { %v4677_v32 = vmul.f32 %v7491_v50, %v4658_v58 }
 0x9b1   : > { %v4696_v12 = vadd.f32 %v7496_v17, %v4677_v32 }
 0x9b3   : > { %4712 = vst [vmem:[%s7504_s24 + $0x68] sm:$0xff] %v4696_v12 }
 0x9b9   : > { %v4450_v62 = vpop.xlane.xlu0 %4449 }
 0x9ba   : > { %v4467_v33 = vmul.f32 %v4450_v62, %v7013_v57 }
 0x9bc   : > { %v4483_v51 = vadd.f32 1e-05, %v4467_v33 }
 0x9be   : > { %5489 = vrsqrt.f32 %v4483_v51  ;;  %vm4631_vm1 = vweird.f32 %v4483_v51 }
 0x9c1   : > { %v4452_v10 = vpop.xlane.xlu1 %4451 }
 0x9c2   : > { %v4468_v54 = vmul.f32 %v4452_v10, %v7013_v57 }
 0x9c4   : > { %v5490_v3 = vpop.eup %5489  ;;  %v4484_v11 = vadd.f32 1e-05, %v4468_v54 }
 0x9c5   : > { %v4626_v47 = vmul.f32 %v5490_v3, %v4483_v51  ;;  %vm4632_vm0 = vweird.f32 %v5490_v3 }
 0x9c6   : > { %5491 = vrsqrt.f32 %v4484_v11  ;;  %vm4633_vm2 = vmor %vm4631_vm1, %vm4632_vm0  ;;  %vm4641_vm4 = vweird.f32 %v4484_v11 }
 0x9c7   : > { %v4627_v27 = vmul.f32 %v5490_v3, %v4626_v47 }
 0x9c9   : > { %v4628_v28 = vmul.f32 0.5, %v4627_v27 }
 0x9cb   : > { %v4629_v2 = vsub.f32 1.5, %v4628_v28 }
 0x9cc   : > { %v5492_v4 = vpop.eup %5491 }
 0x9cd   : > { %v4630_v21 = vmul.f32 %v5490_v3, %v4629_v2  ;;  %v4636_v37 = vmul.f32 %v5492_v4, %v4484_v11  ;;  %vm4642_vm3 = vweird.f32 %v5492_v4 }
 0x9ce   : > { %vm4643_vm5 = vmor %vm4641_vm4, %vm4642_vm3 }
 0x9cf   : > { %v4634_v46 = vsel %vm4633_vm2, %v5490_v3, %v4630_v21  ;;  %v4637_v6 = vmul.f32 %v5492_v4, %v4636_v37 }
 0x9d0   : > { %v4659_v57 = vmul.f32 %v4634_v46, %v7508_v20 }
 0x9d1   : > { %v4638_v23 = vmul.f32 0.5, %v4637_v6 }
 0x9d2   : > { %v4678_v41 = vmul.f32 %v7491_v50, %v4659_v57 }
 0x9d3   : > { %v4639_v15 = vsub.f32 1.5, %v4638_v23 }
 0x9d4   : > { %v4697_v40 = vadd.f32 %v7496_v17, %v4678_v41 }
 0x9d5   : > { %v4640_v8 = vmul.f32 %v5492_v4, %v4639_v15 }
 0x9d6   : > { %4713 = vst [vmem:[%s7504_s24 + $0x70] sm:$0xff] %v4697_v40 }
 0x9d7   : > { %v4644_v20 = vsel %vm4643_vm5, %v5492_v4, %v4640_v8 }
 0x9d8   : > { %v4660_v1 = vmul.f32 %v4644_v20, %v7519_v48 }
 0x9da   : > { %v4679_v55 = vmul.f32 %v7491_v50, %v4660_v1 }
 0x9dc   : > { %v4698_v34 = vadd.f32 %v7496_v17, %v4679_v55 }
 0x9de   : > { %4714 = vst [vmem:[%s7504_s24 + $0x78] sm:$0xff] %v4698_v34 }
 0x9df   : > { %5656 = shalt.err (!%p5653_p10)
}
 0x9e0   : > { %s5718_s1 = smov 128   ;;  %s5719_s24 = smov 8  }
 0x9e1   : > { %5154 = dma.vmem_to_hbm [thread:$0]  (%p5858_p7), %s4730_s25, 2048, %s4732_s17, %s4716_s28, %s5718_s1, %s5718_s1, %s5719_s24  }
 0x9e2 PF: > { %s4746_s4 = sand.u32 1, %s5691_s13   ;;  %p7649_p12 = scmp.ge.s32.totalorder %s5703_s16, 2 }
 0x9e3   : > { %s4747_s23 = scalar_lea.sflag [#allocation5], %s4746_s4 }
 0x9e4   : > { %p5171_p13 = pnand %p7649_p12, %p5810_p6 }
 0x9e6   : > { %p5172_p0 = pneg %p5171_p13 }
 0x9e8   : > { %5686 = dma.done.wait (%p5172_p0), %s4747_s23, 2048  }
 0x9e9   : > { %5688 = vsyncadd (%p5172_p0), %s4747_s23, 4294965248  ;;  %s7650_s12 = sld [smem:[#allocation16_spill]]  ;;  %p25_p3 = scmp.ge.s32.totalorder %s5844_s11, 4  }
 0x9ea   : > { %s7651_s13 = smov %s5695_s14  ;;  %s7652_s14 = smov %s5699_s15 }
 0x9eb   : > { %s7654_s16 = smov %s5844_s11  ;;  %27 = sbr.rel (!%p25_p3) target bundleno = 11 (0xb), region = 117 }
 0x9ef   : > { %s7653_s15 = smov %s7650_s12 }
 0x9f0   :  { %4753 = vsyncpa [#allocation4], 1 }
 0x9f1   :  { %4755 = vsyncpa [#allocation4 + $0x1], 1 }
 0x9f2   :  { %4756 = vsyncpa [#allocation7], 1 }
 0x9f3   :  { %4757 = vsyncpa [#allocation10], 1 }
 0x9f4   :  { %4758 = vsyncpa [#allocation5], 1 }
 0x9f5   :  { %4760 = vsyncpa [#allocation5 + $0x1], 1 }

</bundles_post_ra>
